<compile_context>
chip_gen: v7x
topology: tpu7x:2x2x1
jax: 0.10.0
libtpu: 0.0.40
codegen_flags: <defaults>
</compile_context>

<pallas_src>
import functools

import jax
import jax.numpy as jnp
from jax.experimental import pallas as pl
from jax.experimental.pallas import tpu as pltpu


# ----------------------------------------------------------------------------
# helpers
# ----------------------------------------------------------------------------
def _round_up(n, m):
    return ((n + m - 1) // m) * m


def _batch_tile(bp):
    """bp is a multiple of 8; pick a multiple-of-8 divisor <= 128."""
    if bp <= 128:
        return bp
    for t in range(128, 7, -8):
        if bp % t == 0:
            return t
    return bp


def _choose_time_block(T, Bt, Din, Hp, out_cols, out_bytes, cdt_bytes, fc_cols):
    """Largest divisor of T (<= 32) whose estimated VMEM footprint fits a budget."""
    budget = 24 * 1024 * 1024
    # weights (resident), state in/out blocks, h/c scratch, fc weights
    fixed = (Din * 4 * Hp + Hp * 4 * Hp) * cdt_bytes + 4 * Hp * 4
    fixed += 4 * Bt * Hp * 4 * 2          # h0/c0 in + hN/cN out (double-buffered)
    fixed += 2 * Bt * Hp * 4              # h/c VMEM scratch
    if fc_cols:
        fixed += Hp * fc_cols * cdt_bytes + fc_cols * 4
    best = 1
    for Tb in range(1, min(T, 32) + 1):
        if T % Tb:
            continue
        per = 2 * Tb * Bt * Din * cdt_bytes          # x block (double-buffered)
        per += 2 * Tb * Bt * out_cols * out_bytes    # y / logits block
        per += Tb * Bt * 4 * Hp * 4                  # hoisted x@W_ih scratch (f32)
        if fc_cols:
            per += Tb * Bt * Hp * cdt_bytes          # y buffer for fused FC
        if fixed + per <= budget:
            best = Tb
    return best


def _pad_gate_cols(w, H, Hp):
    """w: (Din, 4H) with gate blocks [i|f|g|o] along last axis -> (Din, 4Hp)."""
    din = w.shape[0]
    w4 = w.reshape(din, 4, H)
    w4 = jnp.pad(w4, ((0, 0), (0, 0), (0, Hp - H)))
    return w4.reshape(din, 4 * Hp)


# ----------------------------------------------------------------------------
# shared LSTM time-block recurrence (runs inside a kernel)
# Gate order follows PyTorch: [i, f, g, o].
# ----------------------------------------------------------------------------
def _lstm_recurrence(x_ref, wih_ref, whh_ref, b_ref, h0_ref, c0_ref,
                     h_s, c_s, xw_s, emit):
    t = pl.program_id(1)

    @pl.when(t == 0)
    def _():
        h_s[...] = h0_ref[...].astype(jnp.float32)
        c_s[...] = c0_ref[...].astype(jnp.float32)

    Tb, Bt, D = x_ref.shape
    Hp = h_s.shape[1]
    cdt = whh_ref.dtype

    # Input projection + bias for the whole time block, hoisted out of the
    # serial recurrence: one large MXU-friendly matmul, bias folded in once.
    xw_s[...] = (jnp.dot(x_ref[...].reshape(Tb * Bt, D), wih_ref[...],
                         preferred_element_type=jnp.float32)
                 + b_ref[...])

    h = h_s[...]
    c = c_s[...]
    for i in range(Tb):  # unrolled; only h @ W_hh + elementwise on serial path
        gates = xw_s[i * Bt:(i + 1) * Bt, :] + jnp.dot(
            h.astype(cdt), whh_ref[...], preferred_element_type=jnp.float32)
        i_g = jax.nn.sigmoid(gates[:, 0 * Hp:1 * Hp])
        f_g = jax.nn.sigmoid(gates[:, 1 * Hp:2 * Hp])
        g_g = jnp.tanh(gates[:, 2 * Hp:3 * Hp])
        o_g = jax.nn.sigmoid(gates[:, 3 * Hp:4 * Hp])
        c = f_g * c + i_g * g_g
        h = o_g * jnp.tanh(c)
        emit(i, h)
    h_s[...] = h
    c_s[...] = c
    return h, c


# ----------------------------------------------------------------------------
# kernel A: intermediate LSTM layer (emits the hidden sequence y)
# ----------------------------------------------------------------------------
def _lstm_layer_kernel(x_ref, wih_ref, whh_ref, b_ref, h0_ref, c0_ref,
                       y_ref, hN_ref, cN_ref, h_s, c_s, xw_s):
    def emit(i, h):
        y_ref[i] = h.astype(y_ref.dtype)

    h, c = _lstm_recurrence(x_ref, wih_ref, whh_ref, b_ref, h0_ref, c0_ref,
                            h_s, c_s, xw_s, emit)

    # hN/cN blocks are resident across the time axis (constant index_map);
    # finalize them on the last time block only.
    @pl.when(pl.program_id(1) == pl.num_programs(1) - 1)
    def _():
        hN_ref[...] = h.astype(hN_ref.dtype)
        cN_ref[...] = c.astype(cN_ref.dtype)


# ----------------------------------------------------------------------------
# kernel B: last LSTM layer with the FC head fused in
# ----------------------------------------------------------------------------
def _lstm_layer_fc_kernel(x_ref, wih_ref, whh_ref, b_ref, h0_ref, c0_ref,
                          fcw_ref, fcb_ref,
                          out_ref, hN_ref, cN_ref, h_s, c_s, xw_s, y_s):
    Bt = h_s.shape[0]

    def emit(i, h):
        y_s[i * Bt:(i + 1) * Bt, :] = h.astype(y_s.dtype)

    h, c = _lstm_recurrence(x_ref, wih_ref, whh_ref, b_ref, h0_ref, c0_ref,
                            h_s, c_s, xw_s, emit)

    # Fused FC head over the whole time block (dropout = identity in eval).
    Tb, Bt_o, Op = out_ref.shape
    out = (jnp.dot(y_s[...], fcw_ref[...], preferred_element_type=jnp.float32)
           + fcb_ref[...])
    out_ref[...] = out.reshape(Tb, Bt_o, Op).astype(out_ref.dtype)

    @pl.when(pl.program_id(1) == pl.num_programs(1) - 1)
    def _():
        hN_ref[...] = h.astype(hN_ref.dtype)
        cN_ref[...] = c.astype(cN_ref.dtype)


# ----------------------------------------------------------------------------
# layer wrapper: builds the pallas_call for one layer
# ----------------------------------------------------------------------------
def _lstm_layer(x_tm, wih, whh, b, h0, c0, fc=None):
    """x_tm: (T, Bp, D) time-major, padded. Weights pre-transposed & padded."""
    T, Bp, D = x_tm.shape
    Hp = h0.shape[-1]
    cdt = wih.dtype
    cdt_bytes = jnp.dtype(cdt).itemsize

    Bt = _batch_tile(Bp)
    if fc is None:
        out_cols, out_bytes, fc_cols = Hp, cdt_bytes, 0
    else:
        out_cols, out_bytes, fc_cols = fc[0].shape[1], 4, fc[0].shape[1]
    Tb = _choose_time_block(T, Bt, D, Hp, out_cols, out_bytes, cdt_bytes, fc_cols)
    grid = (Bp // Bt, T // Tb)

    x_spec = pl.BlockSpec((Tb, Bt, D), lambda bb, tt: (tt, bb, 0))
    wih_spec = pl.BlockSpec((D, 4 * Hp), lambda bb, tt: (0, 0))
    whh_spec = pl.BlockSpec((Hp, 4 * Hp), lambda bb, tt: (0, 0))
    b_spec = pl.BlockSpec((1, 4 * Hp), lambda bb, tt: (0, 0))
    st_spec = pl.BlockSpec((Bt, Hp), lambda bb, tt: (bb, 0))

    scratch = [pltpu.VMEM((Bt, Hp), jnp.float32),            # h state
               pltpu.VMEM((Bt, Hp), jnp.float32),            # c state
               pltpu.VMEM((Tb * Bt, 4 * Hp), jnp.float32)]   # hoisted x@W_ih + b

    if fc is None:
        kernel = _lstm_layer_kernel
        in_specs = [x_spec, wih_spec, whh_spec, b_spec, st_spec, st_spec]
        out_shape = (jax.ShapeDtypeStruct((T, Bp, Hp), cdt),
                     jax.ShapeDtypeStruct((Bp, Hp), jnp.float32),
                     jax.ShapeDtypeStruct((Bp, Hp), jnp.float32))
        out_specs = [pl.BlockSpec((Tb, Bt, Hp), lambda bb, tt: (tt, bb, 0)),
                     st_spec, st_spec]
        args = (x_tm, wih, whh, b, h0, c0)
    else:
        fcw, fcb = fc
        Op = fcw.shape[1]
        kernel = _lstm_layer_fc_kernel
        in_specs = [x_spec, wih_spec, whh_spec, b_spec, st_spec, st_spec,
                    pl.BlockSpec((Hp, Op), lambda bb, tt: (0, 0)),
                    pl.BlockSpec((1, Op), lambda bb, tt: (0, 0))]
        out_shape = (jax.ShapeDtypeStruct((T, Bp, Op), jnp.float32),
                     jax.ShapeDtypeStruct((Bp, Hp), jnp.float32),
                     jax.ShapeDtypeStruct((Bp, Hp), jnp.float32))
        out_specs = [pl.BlockSpec((Tb, Bt, Op), lambda bb, tt: (tt, bb, 0)),
                     st_spec, st_spec]
        scratch = scratch + [pltpu.VMEM((Tb * Bt, Hp), cdt)]  # y buffer for FC
        args = (x_tm, wih, whh, b, h0, c0, fcw, fcb)

    return pl.pallas_call(
        kernel,
        out_shape=out_shape,
        grid_spec=pltpu.PrefetchScalarGridSpec(
            num_scalar_prefetch=0,
            grid=grid,
            in_specs=in_specs,
            out_specs=out_specs,
            scratch_shapes=scratch),
        compiler_params=pltpu.CompilerParams(
            dimension_semantics=("parallel", "arbitrary")),
    )(*args)


# ----------------------------------------------------------------------------
# CharRNN forward (inference semantics)
# ----------------------------------------------------------------------------
def char_rnn_forward(x, hidden, params, n_layers, compute_dtype=jnp.float32):
    """x: (B, T, numBits) batch-first, hidden=(h0, c0) each (L, B, H)."""
    h0, c0 = hidden
    B, T, D = x.shape
    H = h0.shape[-1]
    O = params["fc_w_t"].shape[1]

    Hp = _round_up(H, 128)   # lane-dense hidden / gate blocks
    Op = _round_up(O, 128)   # lane-dense FC output
    Dp = _round_up(D, 128)   # lane-dense layer-0 feature dim
    Bp = _round_up(B, 8)     # sublane-dense batch

    # time-major + batch/feature padding (zero pads are mathematically inert)
    x_tm = jnp.transpose(x, (1, 0, 2))
    x_tm = jnp.pad(x_tm, ((0, 0), (0, Bp - B), (0, Dp - D))).astype(compute_dtype)
    h0p = jnp.pad(h0, ((0, 0), (0, Bp - B), (0, Hp - H)))
    c0p = jnp.pad(c0, ((0, 0), (0, Bp - B), (0, Hp - H)))

    fcw = jnp.pad(params["fc_w_t"], ((0, Hp - H), (0, Op - O))).astype(compute_dtype)
    fcb = jnp.pad(params["fc_b"], ((0, 0), (0, Op - O))).astype(jnp.float32)

    layer_in = x_tm
    out_tm = None
    h_fin, c_fin = [], []
    for l in range(n_layers):
        wih = _pad_gate_cols(params[f"w_ih_{l}"], H, Hp)
        if l == 0:
            wih = jnp.pad(wih, ((0, Dp - D), (0, 0)))        # input dim D -> Dp
        else:
            wih = jnp.pad(wih, ((0, Hp - H), (0, 0)))        # input dim H -> Hp
        wih = wih.astype(compute_dtype)
        whh = jnp.pad(_pad_gate_cols(params[f"w_hh_{l}"], H, Hp),
                      ((0, Hp - H), (0, 0))).astype(compute_dtype)
        b = _pad_gate_cols(params[f"b_{l}"], H, Hp).astype(jnp.float32)  # (1, 4Hp)

        if l < n_layers - 1:
            y, hN, cN = _lstm_layer(layer_in, wih, whh, b, h0p[l], c0p[l])
            layer_in = y   # inter-layer dropout = identity in eval
        else:
            out_tm, hN, cN = _lstm_layer(layer_in, wih, whh, b, h0p[l], c0p[l],
                                         fc=(fcw, fcb))
        h_fin.append(hN[:B, :H])
        c_fin.append(cN[:B, :H])

    # (T, Bp, Op) -> batch-first, strip padding, flatten like .view(-1, n_hidden)@fc
    out = jnp.transpose(out_tm, (1, 0, 2))[:B, :, :O].reshape(B * T, O)
    return out, (jnp.stack(h_fin), jnp.stack(c_fin))


# ----------------------------------------------------------------------------
# Pure-JAX reference (for correctness check)
# ----------------------------------------------------------------------------
def _ref_forward(x, hidden, params, n_layers):
    h0, c0 = hidden
    seq = jnp.transpose(x, (1, 0, 2))
    h_fin, c_fin = [], []
    for l in range(n_layers):
        w_ih, w_hh, b = params[f"w_ih_{l}"], params[f"w_hh_{l}"], params[f"b_{l}"]
        H = h0.shape[-1]

        def step(carry, x_t):
            h, c = carry
            g = x_t @ w_ih + h @ w_hh + b[0]
            i = jax.nn.sigmoid(g[:, 0 * H:1 * H])
            f = jax.nn.sigmoid(g[:, 1 * H:2 * H])
            gg = jnp.tanh(g[:, 2 * H:3 * H])
            o = jax.nn.sigmoid(g[:, 3 * H:4 * H])
            c = f * c + i * gg
            h = o * jnp.tanh(c)
            return (h, c), h

        (hN, cN), ys = jax.lax.scan(step, (h0[l], c0[l]), seq)
        seq = ys
        h_fin.append(hN)
        c_fin.append(cN)
    r_out = jnp.transpose(seq, (1, 0, 2)).reshape(-1, seq.shape[-1])
    out = r_out @ params["fc_w_t"] + params["fc_b"][0]
    return out, (jnp.stack(h_fin), jnp.stack(c_fin))


# ----------------------------------------------------------------------------
# Deterministic parameter init (PyTorch default: U(-1/sqrt(H), 1/sqrt(H)))
# Weights stored pre-transposed: W_ih (D_in, 4H), W_hh (H, 4H), fc (H, O).
# ----------------------------------------------------------------------------
def init_params(key, num_bits, n_hidden, n_layers, dtype=jnp.float32):
    params = {}
    stdv = 1.0 / jnp.sqrt(jnp.array(n_hidden, jnp.float32))
    for l in range(n_layers):
        d_in = num_bits if l == 0 else n_hidden
        key, k1, k2, k3, k4 = jax.random.split(key, 5)
        params[f"w_ih_{l}"] = jax.random.uniform(k1, (d_in, 4 * n_hidden), dtype, -stdv, stdv)
        params[f"w_hh_{l}"] = jax.random.uniform(k2, (n_hidden, 4 * n_hidden), dtype, -stdv, stdv)
        b_ih = jax.random.uniform(k3, (4 * n_hidden,), dtype, -stdv, stdv)
        b_hh = jax.random.uniform(k4, (4 * n_hidden,), dtype, -stdv, stdv)
        params[f"b_{l}"] = (b_ih + b_hh)[None, :]           # (1, 4H)
    key, k5, k6 = jax.random.split(key, 3)
    params["fc_w_t"] = jax.random.uniform(k5, (n_hidden, num_bits), dtype, -stdv, stdv)
    params["fc_b"] = jax.random.uniform(k6, (num_bits,), dtype, -stdv, stdv)[None, :]
    return params


if __name__ == "__main__":
    # Small shapes consistent with the module's forward:
    #   x: (batch, seq, numBits), hidden: 2 x (n_layers, batch, n_hidden)
    batch, seq = 2, 8
    num_bits, n_hidden, n_layers = 64, 32, 2

    key = jax.random.PRNGKey(0)
    key, kx = jax.random.split(key)
    x = jax.random.normal(kx, (batch, seq, num_bits), jnp.float32)
    h0 = jnp.zeros((n_layers, batch, n_hidden), jnp.float32)   # init_hidden()
    c0 = jnp.zeros((n_layers, batch, n_hidden), jnp.float32)
    params = init_params(key, num_bits, n_hidden, n_layers)

    # f32 matmul path (exact check against the pure-JAX reference)
    fwd_f32 = jax.jit(functools.partial(char_rnn_forward, n_layers=n_layers,
                                        compute_dtype=jnp.float32))
    out, (hN, cN) = fwd_f32(x, (h0, c0), params)
    jax.block_until_ready((out, hN, cN))

    ref_out, (ref_h, ref_c) = _ref_forward(x, (h0, c0), params, n_layers)
    assert out.shape == (batch * seq, num_bits)
    assert hN.shape == (n_layers, batch, n_hidden)
    assert jnp.allclose(out, ref_out, atol=1e-4, rtol=1e-4)
    assert jnp.allclose(hN, ref_h, atol=1e-4, rtol=1e-4)
    assert jnp.allclose(cN, ref_c, atol=1e-4, rtol=1e-4)

    # bf16 MXU-input path (v6e/v7x throughput mode): f32 state + f32 accumulation.
    fwd_bf16 = jax.jit(functools.partial(char_rnn_forward, n_layers=n_layers,
                                         compute_dtype=jnp.bfloat16))
    out_bf, (h_bf, c_bf) = fwd_bf16(x, (h0, c0), params)
    jax.block_until_ready((out_bf, h_bf, c_bf))
    assert jnp.all(jnp.isfinite(out_bf))
    assert float(jnp.max(jnp.abs(out_bf - ref_out))) < 0.1

    print("KERNEL_OK")
</pallas_src>

<mosaic_0001>
module attributes {stable_mosaic.version = 11 : i64} {
  func.func @_lstm_layer_kernel(%arg0: i32, %arg1: i32, %arg2: memref<8x8x128xf32, #tpu.memory_space<vmem>>, %arg3: memref<128x512xf32, #tpu.memory_space<vmem>>, %arg4: memref<128x512xf32, #tpu.memory_space<vmem>>, %arg5: memref<1x512xf32, #tpu.memory_space<vmem>>, %arg6: memref<8x128xf32, #tpu.memory_space<vmem>>, %arg7: memref<8x128xf32, #tpu.memory_space<vmem>>, %arg8: memref<8x8x128xf32, #tpu.memory_space<vmem>>, %arg9: memref<8x128xf32, #tpu.memory_space<vmem>>, %arg10: memref<8x128xf32, #tpu.memory_space<vmem>>, %arg11: memref<8x128xf32, #tpu.memory_space<vmem>>, %arg12: memref<8x128xf32, #tpu.memory_space<vmem>>, %arg13: memref<64x512xf32, #tpu.memory_space<vmem>>) attributes {dimension_semantics = [#tpu.dimension_semantics<parallel>, #tpu.dimension_semantics<arbitrary>], iteration_bounds = array<i64: 1, 1>, scalar_prefetch = 0 : i64, scratch_operands = 3 : i64, tpu.core_type = #tpu.core_type<tc>, window_params = [{transform_indices = @transform_0, window_bounds = array<i64: 8, 8, 128>}, {pipeline_mode = #tpu.pipeline_mode<synchronous>, transform_indices = @transform_1, window_bounds = array<i64: 128, 512>}, {pipeline_mode = #tpu.pipeline_mode<synchronous>, transform_indices = @transform_2, window_bounds = array<i64: 128, 512>}, {pipeline_mode = #tpu.pipeline_mode<synchronous>, transform_indices = @transform_3, window_bounds = array<i64: 1, 512>}, {transform_indices = @transform_4, window_bounds = array<i64: 8, 128>}, {transform_indices = @transform_5, window_bounds = array<i64: 8, 128>}, {transform_indices = @transform_6, window_bounds = array<i64: 8, 8, 128>}, {transform_indices = @transform_7, window_bounds = array<i64: 8, 128>}, {transform_indices = @transform_8, window_bounds = array<i64: 8, 128>}]} {
    %c0_i32 = arith.constant 0 : i32
    %0 = arith.cmpi eq, %arg1, %c0_i32 : i32
    %1 = arith.extui %0 : i1 to i32
    %c0_i32_0 = arith.constant 0 : i32
    %2 = arith.cmpi ne, %1, %c0_i32_0 : i32
    scf.if %2 {
      %c0_93 = arith.constant 0 : index
      %c0_94 = arith.constant 0 : index
      %274 = vector.load %arg6[%c0_93, %c0_94] : memref<8x128xf32, #tpu.memory_space<vmem>>, vector<8x128xf32>
      %c0_95 = arith.constant 0 : index
      %c0_96 = arith.constant 0 : index
      %275 = vector.load %arg11[%c0_95, %c0_96] : memref<8x128xf32, #tpu.memory_space<vmem>>, vector<8x128xf32>
      tpu.vector_store %arg11[%c0_95, %c0_96], %274 {strides = array<i32>} : memref<8x128xf32, #tpu.memory_space<vmem>>, vector<8x128xf32>,
      %c0_97 = arith.constant 0 : index
      %c0_98 = arith.constant 0 : index
      %276 = vector.load %arg7[%c0_97, %c0_98] : memref<8x128xf32, #tpu.memory_space<vmem>>, vector<8x128xf32>
      %c0_99 = arith.constant 0 : index
      %c0_100 = arith.constant 0 : index
      %277 = vector.load %arg12[%c0_99, %c0_100] : memref<8x128xf32, #tpu.memory_space<vmem>>, vector<8x128xf32>
      tpu.vector_store %arg12[%c0_99, %c0_100], %276 {strides = array<i32>} : memref<8x128xf32, #tpu.memory_space<vmem>>, vector<8x128xf32>,
    } else {
    }
    %c0 = arith.constant 0 : index
    %c0_1 = arith.constant 0 : index
    %c0_2 = arith.constant 0 : index
    %3 = vector.load %arg2[%c0, %c0_1, %c0_2] : memref<8x8x128xf32, #tpu.memory_space<vmem>>, vector<8x8x128xf32>
    %4 = vector.shape_cast %3 : vector<8x8x128xf32> to vector<64x128xf32>
    %c0_3 = arith.constant 0 : index
    %c0_4 = arith.constant 0 : index
    %5 = vector.load %arg3[%c0_3, %c0_4] : memref<128x512xf32, #tpu.memory_space<vmem>>, vector<128x512xf32>
    %cst = arith.constant dense<0.000000e+00> : vector<64x512xf32>
    %6 = tpu.matmul %4, %5, %cst {dimension_numbers = #tpu.dot_dimension_numbers<[1], [0], [0], [1], [0, 0, 1, 1], [], []>} : vector<64x128xf32>, vector<128x512xf32>, vector<64x512xf32> -> vector<64x512xf32>
    %c0_5 = arith.constant 0 : index
    %c0_6 = arith.constant 0 : index
    %7 = vector.load %arg5[%c0_5, %c0_6] : memref<1x512xf32, #tpu.memory_space<vmem>>, vector<1x512xf32>
    %8 = vector.broadcast %7 : vector<1x512xf32> to vector<64x512xf32>
    %9 = arith.addf %6, %8 : vector<64x512xf32>
    %c0_7 = arith.constant 0 : index
    %c0_8 = arith.constant 0 : index
    %10 = vector.load %arg13[%c0_7, %c0_8] : memref<64x512xf32, #tpu.memory_space<vmem>>, vector<64x512xf32>
    tpu.vector_store %arg13[%c0_7, %c0_8], %9 {strides = array<i32>} : memref<64x512xf32, #tpu.memory_space<vmem>>, vector<64x512xf32>,
    %c0_9 = arith.constant 0 : index
    %c0_10 = arith.constant 0 : index
    %11 = vector.load %arg11[%c0_9, %c0_10] : memref<8x128xf32, #tpu.memory_space<vmem>>, vector<8x128xf32>
    %c0_11 = arith.constant 0 : index
    %c0_12 = arith.constant 0 : index
    %12 = vector.load %arg12[%c0_11, %c0_12] : memref<8x128xf32, #tpu.memory_space<vmem>>, vector<8x128xf32>
    %c0_13 = arith.constant 0 : index
    %c0_14 = arith.constant 0 : index
    %13 = vector.load %arg13[%c0_13, %c0_14] : memref<64x512xf32, #tpu.memory_space<vmem>>, vector<8x512xf32>
    %c0_15 = arith.constant 0 : index
    %c0_16 = arith.constant 0 : index
    %14 = vector.load %arg4[%c0_15, %c0_16] : memref<128x512xf32, #tpu.memory_space<vmem>>, vector<128x512xf32>
    %cst_17 = arith.constant dense<0.000000e+00> : vector<8x512xf32>
    %15 = tpu.matmul %11, %14, %cst_17 {dimension_numbers = #tpu.dot_dimension_numbers<[1], [0], [0], [1], [0, 0, 1, 1], [], []>} : vector<8x128xf32>, vector<128x512xf32>, vector<8x512xf32> -> vector<8x512xf32>
    %16 = arith.addf %13, %15 : vector<8x512xf32>
    %17 = vector.extract_strided_slice %16 {offsets = [0, 0], sizes = [8, 128], strides = [1, 1]} : vector<8x512xf32> to vector<8x128xf32>
    %18 = arith.negf %17 : vector<8x128xf32>
    %19 = math.exp %18 : vector<8x128xf32>
    %cst_18 = arith.constant 1.000000e+00 : f32
    %20 = vector.broadcast %cst_18 : f32 to vector<8x128xf32>
    %21 = arith.addf %20, %19 : vector<8x128xf32>
    %22 = arith.divf %20, %21 : vector<8x128xf32>
    %23 = vector.extract_strided_slice %16 {offsets = [0, 128], sizes = [8, 128], strides = [1, 1]} : vector<8x512xf32> to vector<8x128xf32>
    %24 = arith.negf %23 : vector<8x128xf32>
    %25 = math.exp %24 : vector<8x128xf32>
    %cst_19 = arith.constant 1.000000e+00 : f32
    %26 = vector.broadcast %cst_19 : f32 to vector<8x128xf32>
    %27 = arith.addf %26, %25 : vector<8x128xf32>
    %28 = arith.divf %26, %27 : vector<8x128xf32>
    %29 = vector.extract_strided_slice %16 {offsets = [0, 256], sizes = [8, 128], strides = [1, 1]} : vector<8x512xf32> to vector<8x128xf32>
    %30 = math.tanh %29 : vector<8x128xf32>
    %31 = vector.extract_strided_slice %16 {offsets = [0, 384], sizes = [8, 128], strides = [1, 1]} : vector<8x512xf32> to vector<8x128xf32>
    %32 = arith.negf %31 : vector<8x128xf32>
    %33 = math.exp %32 : vector<8x128xf32>
    %cst_20 = arith.constant 1.000000e+00 : f32
    %34 = vector.broadcast %cst_20 : f32 to vector<8x128xf32>
    %35 = arith.addf %34, %33 : vector<8x128xf32>
    %36 = arith.divf %34, %35 : vector<8x128xf32>
    %37 = arith.mulf %28, %12 : vector<8x128xf32>
    %38 = arith.mulf %22, %30 : vector<8x128xf32>
    %39 = arith.addf %37, %38 : vector<8x128xf32>
    %40 = math.tanh %39 : vector<8x128xf32>
    %41 = arith.mulf %36, %40 : vector<8x128xf32>
    %c0_21 = arith.constant 0 : index
    %c0_22 = arith.constant 0 : index
    %c0_23 = arith.constant 0 : index
    %42 = vector.load %arg8[%c0_21, %c0_22, %c0_23] : memref<8x8x128xf32, #tpu.memory_space<vmem>>, vector<1x8x128xf32>
    %43 = vector.shape_cast %42 : vector<1x8x128xf32> to vector<8x128xf32>
    %44 = vector.shape_cast %41 : vector<8x128xf32> to vector<1x8x128xf32>
    tpu.vector_store %arg8[%c0_21, %c0_22, %c0_23], %44 {strides = array<i32>} : memref<8x8x128xf32, #tpu.memory_space<vmem>>, vector<1x8x128xf32>,
    %c8 = arith.constant 8 : index
    %c0_24 = arith.constant 0 : index
    %45 = vector.load %arg13[%c8, %c0_24] : memref<64x512xf32, #tpu.memory_space<vmem>>, vector<8x512xf32>
    %c0_25 = arith.constant 0 : index
    %c0_26 = arith.constant 0 : index
    %46 = vector.load %arg4[%c0_25, %c0_26] : memref<128x512xf32, #tpu.memory_space<vmem>>, vector<128x512xf32>
    %cst_27 = arith.constant dense<0.000000e+00> : vector<8x512xf32>
    %47 = tpu.matmul %41, %46, %cst_27 {dimension_numbers = #tpu.dot_dimension_numbers<[1], [0], [0], [1], [0, 0, 1, 1], [], []>} : vector<8x128xf32>, vector<128x512xf32>, vector<8x512xf32> -> vector<8x512xf32>
    %48 = arith.addf %45, %47 : vector<8x512xf32>
    %49 = vector.extract_strided_slice %48 {offsets = [0, 0], sizes = [8, 128], strides = [1, 1]} : vector<8x512xf32> to vector<8x128xf32>
    %50 = arith.negf %49 : vector<8x128xf32>
    %51 = math.exp %50 : vector<8x128xf32>
    %cst_28 = arith.constant 1.000000e+00 : f32
    %52 = vector.broadcast %cst_28 : f32 to vector<8x128xf32>
    %53 = arith.addf %52, %51 : vector<8x128xf32>
    %54 = arith.divf %52, %53 : vector<8x128xf32>
    %55 = vector.extract_strided_slice %48 {offsets = [0, 128], sizes = [8, 128], strides = [1, 1]} : vector<8x512xf32> to vector<8x128xf32>
    %56 = arith.negf %55 : vector<8x128xf32>
    %57 = math.exp %56 : vector<8x128xf32>
    %cst_29 = arith.constant 1.000000e+00 : f32
    %58 = vector.broadcast %cst_29 : f32 to vector<8x128xf32>
    %59 = arith.addf %58, %57 : vector<8x128xf32>
    %60 = arith.divf %58, %59 : vector<8x128xf32>
    %61 = vector.extract_strided_slice %48 {offsets = [0, 256], sizes = [8, 128], strides = [1, 1]} : vector<8x512xf32> to vector<8x128xf32>
    %62 = math.tanh %61 : vector<8x128xf32>
    %63 = vector.extract_strided_slice %48 {offsets = [0, 384], sizes = [8, 128], strides = [1, 1]} : vector<8x512xf32> to vector<8x128xf32>
    %64 = arith.negf %63 : vector<8x128xf32>
    %65 = math.exp %64 : vector<8x128xf32>
    %cst_30 = arith.constant 1.000000e+00 : f32
    %66 = vector.broadcast %cst_30 : f32 to vector<8x128xf32>
    %67 = arith.addf %66, %65 : vector<8x128xf32>
    %68 = arith.divf %66, %67 : vector<8x128xf32>
    %69 = arith.mulf %60, %39 : vector<8x128xf32>
    %70 = arith.mulf %54, %62 : vector<8x128xf32>
    %71 = arith.addf %69, %70 : vector<8x128xf32>
    %72 = math.tanh %71 : vector<8x128xf32>
    %73 = arith.mulf %68, %72 : vector<8x128xf32>
    %c1 = arith.constant 1 : index
    %c0_31 = arith.constant 0 : index
    %c0_32 = arith.constant 0 : index
    %74 = vector.load %arg8[%c1, %c0_31, %c0_32] : memref<8x8x128xf32, #tpu.memory_space<vmem>>, vector<1x8x128xf32>
    %75 = vector.shape_cast %74 : vector<1x8x128xf32> to vector<8x128xf32>
    %76 = vector.shape_cast %73 : vector<8x128xf32> to vector<1x8x128xf32>
    tpu.vector_store %arg8[%c1, %c0_31, %c0_32], %76 {strides = array<i32>} : memref<8x8x128xf32, #tpu.memory_space<vmem>>, vector<1x8x128xf32>,
    %c16 = arith.constant 16 : index
    %c0_33 = arith.constant 0 : index
    %77 = vector.load %arg13[%c16, %c0_33] : memref<64x512xf32, #tpu.memory_space<vmem>>, vector<8x512xf32>
    %c0_34 = arith.constant 0 : index
    %c0_35 = arith.constant 0 : index
    %78 = vector.load %arg4[%c0_34, %c0_35] : memref<128x512xf32, #tpu.memory_space<vmem>>, vector<128x512xf32>
    %cst_36 = arith.constant dense<0.000000e+00> : vector<8x512xf32>
    %79 = tpu.matmul %73, %78, %cst_36 {dimension_numbers = #tpu.dot_dimension_numbers<[1], [0], [0], [1], [0, 0, 1, 1], [], []>} : vector<8x128xf32>, vector<128x512xf32>, vector<8x512xf32> -> vector<8x512xf32>
    %80 = arith.addf %77, %79 : vector<8x512xf32>
    %81 = vector.extract_strided_slice %80 {offsets = [0, 0], sizes = [8, 128], strides = [1, 1]} : vector<8x512xf32> to vector<8x128xf32>
    %82 = arith.negf %81 : vector<8x128xf32>
    %83 = math.exp %82 : vector<8x128xf32>
    %cst_37 = arith.constant 1.000000e+00 : f32
    %84 = vector.broadcast %cst_37 : f32 to vector<8x128xf32>
    %85 = arith.addf %84, %83 : vector<8x128xf32>
    %86 = arith.divf %84, %85 : vector<8x128xf32>
    %87 = vector.extract_strided_slice %80 {offsets = [0, 128], sizes = [8, 128], strides = [1, 1]} : vector<8x512xf32> to vector<8x128xf32>
    %88 = arith.negf %87 : vector<8x128xf32>
    %89 = math.exp %88 : vector<8x128xf32>
    %cst_38 = arith.constant 1.000000e+00 : f32
    %90 = vector.broadcast %cst_38 : f32 to vector<8x128xf32>
    %91 = arith.addf %90, %89 : vector<8x128xf32>
    %92 = arith.divf %90, %91 : vector<8x128xf32>
    %93 = vector.extract_strided_slice %80 {offsets = [0, 256], sizes = [8, 128], strides = [1, 1]} : vector<8x512xf32> to vector<8x128xf32>
    %94 = math.tanh %93 : vector<8x128xf32>
    %95 = vector.extract_strided_slice %80 {offsets = [0, 384], sizes = [8, 128], strides = [1, 1]} : vector<8x512xf32> to vector<8x128xf32>
    %96 = arith.negf %95 : vector<8x128xf32>
    %97 = math.exp %96 : vector<8x128xf32>
    %cst_39 = arith.constant 1.000000e+00 : f32
    %98 = vector.broadcast %cst_39 : f32 to vector<8x128xf32>
    %99 = arith.addf %98, %97 : vector<8x128xf32>
    %100 = arith.divf %98, %99 : vector<8x128xf32>
    %101 = arith.mulf %92, %71 : vector<8x128xf32>
    %102 = arith.mulf %86, %94 : vector<8x128xf32>
    %103 = arith.addf %101, %102 : vector<8x128xf32>
    %104 = math.tanh %103 : vector<8x128xf32>
    %105 = arith.mulf %100, %104 : vector<8x128xf32>
    %c2 = arith.constant 2 : index
    %c0_40 = arith.constant 0 : index
    %c0_41 = arith.constant 0 : index
    %106 = vector.load %arg8[%c2, %c0_40, %c0_41] : memref<8x8x128xf32, #tpu.memory_space<vmem>>, vector<1x8x128xf32>
    %107 = vector.shape_cast %106 : vector<1x8x128xf32> to vector<8x128xf32>
    %108 = vector.shape_cast %105 : vector<8x128xf32> to vector<1x8x128xf32>
    tpu.vector_store %arg8[%c2, %c0_40, %c0_41], %108 {strides = array<i32>} : memref<8x8x128xf32, #tpu.memory_space<vmem>>, vector<1x8x128xf32>,
    %c24 = arith.constant 24 : index
    %c0_42 = arith.constant 0 : index
    %109 = vector.load %arg13[%c24, %c0_42] : memref<64x512xf32, #tpu.memory_space<vmem>>, vector<8x512xf32>
    %c0_43 = arith.constant 0 : index
    %c0_44 = arith.constant 0 : index
    %110 = vector.load %arg4[%c0_43, %c0_44] : memref<128x512xf32, #tpu.memory_space<vmem>>, vector<128x512xf32>
    %cst_45 = arith.constant dense<0.000000e+00> : vector<8x512xf32>
    %111 = tpu.matmul %105, %110, %cst_45 {dimension_numbers = #tpu.dot_dimension_numbers<[1], [0], [0], [1], [0, 0, 1, 1], [], []>} : vector<8x128xf32>, vector<128x512xf32>, vector<8x512xf32> -> vector<8x512xf32>
    %112 = arith.addf %109, %111 : vector<8x512xf32>
    %113 = vector.extract_strided_slice %112 {offsets = [0, 0], sizes = [8, 128], strides = [1, 1]} : vector<8x512xf32> to vector<8x128xf32>
    %114 = arith.negf %113 : vector<8x128xf32>
    %115 = math.exp %114 : vector<8x128xf32>
    %cst_46 = arith.constant 1.000000e+00 : f32
    %116 = vector.broadcast %cst_46 : f32 to vector<8x128xf32>
    %117 = arith.addf %116, %115 : vector<8x128xf32>
    %118 = arith.divf %116, %117 : vector<8x128xf32>
    %119 = vector.extract_strided_slice %112 {offsets = [0, 128], sizes = [8, 128], strides = [1, 1]} : vector<8x512xf32> to vector<8x128xf32>
    %120 = arith.negf %119 : vector<8x128xf32>
    %121 = math.exp %120 : vector<8x128xf32>
    %cst_47 = arith.constant 1.000000e+00 : f32
    %122 = vector.broadcast %cst_47 : f32 to vector<8x128xf32>
    %123 = arith.addf %122, %121 : vector<8x128xf32>
    %124 = arith.divf %122, %123 : vector<8x128xf32>
    %125 = vector.extract_strided_slice %112 {offsets = [0, 256], sizes = [8, 128], strides = [1, 1]} : vector<8x512xf32> to vector<8x128xf32>
    %126 = math.tanh %125 : vector<8x128xf32>
    %127 = vector.extract_strided_slice %112 {offsets = [0, 384], sizes = [8, 128], strides = [1, 1]} : vector<8x512xf32> to vector<8x128xf32>
    %128 = arith.negf %127 : vector<8x128xf32>
    %129 = math.exp %128 : vector<8x128xf32>
    %cst_48 = arith.constant 1.000000e+00 : f32
    %130 = vector.broadcast %cst_48 : f32 to vector<8x128xf32>
    %131 = arith.addf %130, %129 : vector<8x128xf32>
    %132 = arith.divf %130, %131 : vector<8x128xf32>
    %133 = arith.mulf %124, %103 : vector<8x128xf32>
    %134 = arith.mulf %118, %126 : vector<8x128xf32>
    %135 = arith.addf %133, %134 : vector<8x128xf32>
    %136 = math.tanh %135 : vector<8x128xf32>
    %137 = arith.mulf %132, %136 : vector<8x128xf32>
    %c3 = arith.constant 3 : index
    %c0_49 = arith.constant 0 : index
    %c0_50 = arith.constant 0 : index
    %138 = vector.load %arg8[%c3, %c0_49, %c0_50] : memref<8x8x128xf32, #tpu.memory_space<vmem>>, vector<1x8x128xf32>
    %139 = vector.shape_cast %138 : vector<1x8x128xf32> to vector<8x128xf32>
    %140 = vector.shape_cast %137 : vector<8x128xf32> to vector<1x8x128xf32>
    tpu.vector_store %arg8[%c3, %c0_49, %c0_50], %140 {strides = array<i32>} : memref<8x8x128xf32, #tpu.memory_space<vmem>>, vector<1x8x128xf32>,
    %c32 = arith.constant 32 : index
    %c0_51 = arith.constant 0 : index
    %141 = vector.load %arg13[%c32, %c0_51] : memref<64x512xf32, #tpu.memory_space<vmem>>, vector<8x512xf32>
    %c0_52 = arith.constant 0 : index
    %c0_53 = arith.constant 0 : index
    %142 = vector.load %arg4[%c0_52, %c0_53] : memref<128x512xf32, #tpu.memory_space<vmem>>, vector<128x512xf32>
    %cst_54 = arith.constant dense<0.000000e+00> : vector<8x512xf32>
    %143 = tpu.matmul %137, %142, %cst_54 {dimension_numbers = #tpu.dot_dimension_numbers<[1], [0], [0], [1], [0, 0, 1, 1], [], []>} : vector<8x128xf32>, vector<128x512xf32>, vector<8x512xf32> -> vector<8x512xf32>
    %144 = arith.addf %141, %143 : vector<8x512xf32>
    %145 = vector.extract_strided_slice %144 {offsets = [0, 0], sizes = [8, 128], strides = [1, 1]} : vector<8x512xf32> to vector<8x128xf32>
    %146 = arith.negf %145 : vector<8x128xf32>
    %147 = math.exp %146 : vector<8x128xf32>
    %cst_55 = arith.constant 1.000000e+00 : f32
    %148 = vector.broadcast %cst_55 : f32 to vector<8x128xf32>
    %149 = arith.addf %148, %147 : vector<8x128xf32>
    %150 = arith.divf %148, %149 : vector<8x128xf32>
    %151 = vector.extract_strided_slice %144 {offsets = [0, 128], sizes = [8, 128], strides = [1, 1]} : vector<8x512xf32> to vector<8x128xf32>
    %152 = arith.negf %151 : vector<8x128xf32>
    %153 = math.exp %152 : vector<8x128xf32>
    %cst_56 = arith.constant 1.000000e+00 : f32
    %154 = vector.broadcast %cst_56 : f32 to vector<8x128xf32>
    %155 = arith.addf %154, %153 : vector<8x128xf32>
    %156 = arith.divf %154, %155 : vector<8x128xf32>
    %157 = vector.extract_strided_slice %144 {offsets = [0, 256], sizes = [8, 128], strides = [1, 1]} : vector<8x512xf32> to vector<8x128xf32>
    %158 = math.tanh %157 : vector<8x128xf32>
    %159 = vector.extract_strided_slice %144 {offsets = [0, 384], sizes = [8, 128], strides = [1, 1]} : vector<8x512xf32> to vector<8x128xf32>
    %160 = arith.negf %159 : vector<8x128xf32>
    %161 = math.exp %160 : vector<8x128xf32>
    %cst_57 = arith.constant 1.000000e+00 : f32
    %162 = vector.broadcast %cst_57 : f32 to vector<8x128xf32>
    %163 = arith.addf %162, %161 : vector<8x128xf32>
    %164 = arith.divf %162, %163 : vector<8x128xf32>
    %165 = arith.mulf %156, %135 : vector<8x128xf32>
    %166 = arith.mulf %150, %158 : vector<8x128xf32>
    %167 = arith.addf %165, %166 : vector<8x128xf32>
    %168 = math.tanh %167 : vector<8x128xf32>
    %169 = arith.mulf %164, %168 : vector<8x128xf32>
    %c4 = arith.constant 4 : index
    %c0_58 = arith.constant 0 : index
    %c0_59 = arith.constant 0 : index
    %170 = vector.load %arg8[%c4, %c0_58, %c0_59] : memref<8x8x128xf32, #tpu.memory_space<vmem>>, vector<1x8x128xf32>
    %171 = vector.shape_cast %170 : vector<1x8x128xf32> to vector<8x128xf32>
    %172 = vector.shape_cast %169 : vector<8x128xf32> to vector<1x8x128xf32>
    tpu.vector_store %arg8[%c4, %c0_58, %c0_59], %172 {strides = array<i32>} : memref<8x8x128xf32, #tpu.memory_space<vmem>>, vector<1x8x128xf32>,
    %c40 = arith.constant 40 : index
    %c0_60 = arith.constant 0 : index
    %173 = vector.load %arg13[%c40, %c0_60] : memref<64x512xf32, #tpu.memory_space<vmem>>, vector<8x512xf32>
    %c0_61 = arith.constant 0 : index
    %c0_62 = arith.constant 0 : index
    %174 = vector.load %arg4[%c0_61, %c0_62] : memref<128x512xf32, #tpu.memory_space<vmem>>, vector<128x512xf32>
    %cst_63 = arith.constant dense<0.000000e+00> : vector<8x512xf32>
    %175 = tpu.matmul %169, %174, %cst_63 {dimension_numbers = #tpu.dot_dimension_numbers<[1], [0], [0], [1], [0, 0, 1, 1], [], []>} : vector<8x128xf32>, vector<128x512xf32>, vector<8x512xf32> -> vector<8x512xf32>
    %176 = arith.addf %173, %175 : vector<8x512xf32>
    %177 = vector.extract_strided_slice %176 {offsets = [0, 0], sizes = [8, 128], strides = [1, 1]} : vector<8x512xf32> to vector<8x128xf32>
    %178 = arith.negf %177 : vector<8x128xf32>
    %179 = math.exp %178 : vector<8x128xf32>
    %cst_64 = arith.constant 1.000000e+00 : f32
    %180 = vector.broadcast %cst_64 : f32 to vector<8x128xf32>
    %181 = arith.addf %180, %179 : vector<8x128xf32>
    %182 = arith.divf %180, %181 : vector<8x128xf32>
    %183 = vector.extract_strided_slice %176 {offsets = [0, 128], sizes = [8, 128], strides = [1, 1]} : vector<8x512xf32> to vector<8x128xf32>
    %184 = arith.negf %183 : vector<8x128xf32>
    %185 = math.exp %184 : vector<8x128xf32>
    %cst_65 = arith.constant 1.000000e+00 : f32
    %186 = vector.broadcast %cst_65 : f32 to vector<8x128xf32>
    %187 = arith.addf %186, %185 : vector<8x128xf32>
    %188 = arith.divf %186, %187 : vector<8x128xf32>
    %189 = vector.extract_strided_slice %176 {offsets = [0, 256], sizes = [8, 128], strides = [1, 1]} : vector<8x512xf32> to vector<8x128xf32>
    %190 = math.tanh %189 : vector<8x128xf32>
    %191 = vector.extract_strided_slice %176 {offsets = [0, 384], sizes = [8, 128], strides = [1, 1]} : vector<8x512xf32> to vector<8x128xf32>
    %192 = arith.negf %191 : vector<8x128xf32>
    %193 = math.exp %192 : vector<8x128xf32>
    %cst_66 = arith.constant 1.000000e+00 : f32
    %194 = vector.broadcast %cst_66 : f32 to vector<8x128xf32>
    %195 = arith.addf %194, %193 : vector<8x128xf32>
    %196 = arith.divf %194, %195 : vector<8x128xf32>
    %197 = arith.mulf %188, %167 : vector<8x128xf32>
    %198 = arith.mulf %182, %190 : vector<8x128xf32>
    %199 = arith.addf %197, %198 : vector<8x128xf32>
    %200 = math.tanh %199 : vector<8x128xf32>
    %201 = arith.mulf %196, %200 : vector<8x128xf32>
    %c5 = arith.constant 5 : index
    %c0_67 = arith.constant 0 : index
    %c0_68 = arith.constant 0 : index
    %202 = vector.load %arg8[%c5, %c0_67, %c0_68] : memref<8x8x128xf32, #tpu.memory_space<vmem>>, vector<1x8x128xf32>
    %203 = vector.shape_cast %202 : vector<1x8x128xf32> to vector<8x128xf32>
    %204 = vector.shape_cast %201 : vector<8x128xf32> to vector<1x8x128xf32>
    tpu.vector_store %arg8[%c5, %c0_67, %c0_68], %204 {strides = array<i32>} : memref<8x8x128xf32, #tpu.memory_space<vmem>>, vector<1x8x128xf32>,
    %c48 = arith.constant 48 : index
    %c0_69 = arith.constant 0 : index
    %205 = vector.load %arg13[%c48, %c0_69] : memref<64x512xf32, #tpu.memory_space<vmem>>, vector<8x512xf32>
    %c0_70 = arith.constant 0 : index
    %c0_71 = arith.constant 0 : index
    %206 = vector.load %arg4[%c0_70, %c0_71] : memref<128x512xf32, #tpu.memory_space<vmem>>, vector<128x512xf32>
    %cst_72 = arith.constant dense<0.000000e+00> : vector<8x512xf32>
    %207 = tpu.matmul %201, %206, %cst_72 {dimension_numbers = #tpu.dot_dimension_numbers<[1], [0], [0], [1], [0, 0, 1, 1], [], []>} : vector<8x128xf32>, vector<128x512xf32>, vector<8x512xf32> -> vector<8x512xf32>
    %208 = arith.addf %205, %207 : vector<8x512xf32>
    %209 = vector.extract_strided_slice %208 {offsets = [0, 0], sizes = [8, 128], strides = [1, 1]} : vector<8x512xf32> to vector<8x128xf32>
    %210 = arith.negf %209 : vector<8x128xf32>
    %211 = math.exp %210 : vector<8x128xf32>
    %cst_73 = arith.constant 1.000000e+00 : f32
    %212 = vector.broadcast %cst_73 : f32 to vector<8x128xf32>
    %213 = arith.addf %212, %211 : vector<8x128xf32>
    %214 = arith.divf %212, %213 : vector<8x128xf32>
    %215 = vector.extract_strided_slice %208 {offsets = [0, 128], sizes = [8, 128], strides = [1, 1]} : vector<8x512xf32> to vector<8x128xf32>
    %216 = arith.negf %215 : vector<8x128xf32>
    %217 = math.exp %216 : vector<8x128xf32>
    %cst_74 = arith.constant 1.000000e+00 : f32
    %218 = vector.broadcast %cst_74 : f32 to vector<8x128xf32>
    %219 = arith.addf %218, %217 : vector<8x128xf32>
    %220 = arith.divf %218, %219 : vector<8x128xf32>
    %221 = vector.extract_strided_slice %208 {offsets = [0, 256], sizes = [8, 128], strides = [1, 1]} : vector<8x512xf32> to vector<8x128xf32>
    %222 = math.tanh %221 : vector<8x128xf32>
    %223 = vector.extract_strided_slice %208 {offsets = [0, 384], sizes = [8, 128], strides = [1, 1]} : vector<8x512xf32> to vector<8x128xf32>
    %224 = arith.negf %223 : vector<8x128xf32>
    %225 = math.exp %224 : vector<8x128xf32>
    %cst_75 = arith.constant 1.000000e+00 : f32
    %226 = vector.broadcast %cst_75 : f32 to vector<8x128xf32>
    %227 = arith.addf %226, %225 : vector<8x128xf32>
    %228 = arith.divf %226, %227 : vector<8x128xf32>
    %229 = arith.mulf %220, %199 : vector<8x128xf32>
    %230 = arith.mulf %214, %222 : vector<8x128xf32>
    %231 = arith.addf %229, %230 : vector<8x128xf32>
    %232 = math.tanh %231 : vector<8x128xf32>
    %233 = arith.mulf %228, %232 : vector<8x128xf32>
    %c6 = arith.constant 6 : index
    %c0_76 = arith.constant 0 : index
    %c0_77 = arith.constant 0 : index
    %234 = vector.load %arg8[%c6, %c0_76, %c0_77] : memref<8x8x128xf32, #tpu.memory_space<vmem>>, vector<1x8x128xf32>
    %235 = vector.shape_cast %234 : vector<1x8x128xf32> to vector<8x128xf32>
    %236 = vector.shape_cast %233 : vector<8x128xf32> to vector<1x8x128xf32>
    tpu.vector_store %arg8[%c6, %c0_76, %c0_77], %236 {strides = array<i32>} : memref<8x8x128xf32, #tpu.memory_space<vmem>>, vector<1x8x128xf32>,
    %c56 = arith.constant 56 : index
    %c0_78 = arith.constant 0 : index
    %237 = vector.load %arg13[%c56, %c0_78] : memref<64x512xf32, #tpu.memory_space<vmem>>, vector<8x512xf32>
    %c0_79 = arith.constant 0 : index
    %c0_80 = arith.constant 0 : index
    %238 = vector.load %arg4[%c0_79, %c0_80] : memref<128x512xf32, #tpu.memory_space<vmem>>, vector<128x512xf32>
    %cst_81 = arith.constant dense<0.000000e+00> : vector<8x512xf32>
    %239 = tpu.matmul %233, %238, %cst_81 {dimension_numbers = #tpu.dot_dimension_numbers<[1], [0], [0], [1], [0, 0, 1, 1], [], []>} : vector<8x128xf32>, vector<128x512xf32>, vector<8x512xf32> -> vector<8x512xf32>
    %240 = arith.addf %237, %239 : vector<8x512xf32>
    %241 = vector.extract_strided_slice %240 {offsets = [0, 0], sizes = [8, 128], strides = [1, 1]} : vector<8x512xf32> to vector<8x128xf32>
    %242 = arith.negf %241 : vector<8x128xf32>
    %243 = math.exp %242 : vector<8x128xf32>
    %cst_82 = arith.constant 1.000000e+00 : f32
    %244 = vector.broadcast %cst_82 : f32 to vector<8x128xf32>
    %245 = arith.addf %244, %243 : vector<8x128xf32>
    %246 = arith.divf %244, %245 : vector<8x128xf32>
    %247 = vector.extract_strided_slice %240 {offsets = [0, 128], sizes = [8, 128], strides = [1, 1]} : vector<8x512xf32> to vector<8x128xf32>
    %248 = arith.negf %247 : vector<8x128xf32>
    %249 = math.exp %248 : vector<8x128xf32>
    %cst_83 = arith.constant 1.000000e+00 : f32
    %250 = vector.broadcast %cst_83 : f32 to vector<8x128xf32>
    %251 = arith.addf %250, %249 : vector<8x128xf32>
    %252 = arith.divf %250, %251 : vector<8x128xf32>
    %253 = vector.extract_strided_slice %240 {offsets = [0, 256], sizes = [8, 128], strides = [1, 1]} : vector<8x512xf32> to vector<8x128xf32>
    %254 = math.tanh %253 : vector<8x128xf32>
    %255 = vector.extract_strided_slice %240 {offsets = [0, 384], sizes = [8, 128], strides = [1, 1]} : vector<8x512xf32> to vector<8x128xf32>
    %256 = arith.negf %255 : vector<8x128xf32>
    %257 = math.exp %256 : vector<8x128xf32>
    %cst_84 = arith.constant 1.000000e+00 : f32
    %258 = vector.broadcast %cst_84 : f32 to vector<8x128xf32>
    %259 = arith.addf %258, %257 : vector<8x128xf32>
    %260 = arith.divf %258, %259 : vector<8x128xf32>
    %261 = arith.mulf %252, %231 : vector<8x128xf32>
    %262 = arith.mulf %246, %254 : vector<8x128xf32>
    %263 = arith.addf %261, %262 : vector<8x128xf32>
    %264 = math.tanh %263 : vector<8x128xf32>
    %265 = arith.mulf %260, %264 : vector<8x128xf32>
    %c7 = arith.constant 7 : index
    %c0_85 = arith.constant 0 : index
    %c0_86 = arith.constant 0 : index
    %266 = vector.load %arg8[%c7, %c0_85, %c0_86] : memref<8x8x128xf32, #tpu.memory_space<vmem>>, vector<1x8x128xf32>
    %267 = vector.shape_cast %266 : vector<1x8x128xf32> to vector<8x128xf32>
    %268 = vector.shape_cast %265 : vector<8x128xf32> to vector<1x8x128xf32>
    tpu.vector_store %arg8[%c7, %c0_85, %c0_86], %268 {strides = array<i32>} : memref<8x8x128xf32, #tpu.memory_space<vmem>>, vector<1x8x128xf32>,
    %c0_87 = arith.constant 0 : index
    %c0_88 = arith.constant 0 : index
    %269 = vector.load %arg11[%c0_87, %c0_88] : memref<8x128xf32, #tpu.memory_space<vmem>>, vector<8x128xf32>
    tpu.vector_store %arg11[%c0_87, %c0_88], %265 {strides = array<i32>} : memref<8x128xf32, #tpu.memory_space<vmem>>, vector<8x128xf32>,
    %c0_89 = arith.constant 0 : index
    %c0_90 = arith.constant 0 : index
    %270 = vector.load %arg12[%c0_89, %c0_90] : memref<8x128xf32, #tpu.memory_space<vmem>>, vector<8x128xf32>
    tpu.vector_store %arg12[%c0_89, %c0_90], %263 {strides = array<i32>} : memref<8x128xf32, #tpu.memory_space<vmem>>, vector<8x128xf32>,
    %c0_i32_91 = arith.constant 0 : i32
    %271 = arith.cmpi eq, %arg1, %c0_i32_91 : i32
    %272 = arith.extui %271 : i1 to i32
    %c0_i32_92 = arith.constant 0 : i32
    %273 = arith.cmpi ne, %272, %c0_i32_92 : i32
    scf.if %273 {
      %c0_93 = arith.constant 0 : index
      %c0_94 = arith.constant 0 : index
      %274 = vector.load %arg9[%c0_93, %c0_94] : memref<8x128xf32, #tpu.memory_space<vmem>>, vector<8x128xf32>
      tpu.vector_store %arg9[%c0_93, %c0_94], %265 {strides = array<i32>} : memref<8x128xf32, #tpu.memory_space<vmem>>, vector<8x128xf32>,
      %c0_95 = arith.constant 0 : index
      %c0_96 = arith.constant 0 : index
      %275 = vector.load %arg10[%c0_95, %c0_96] : memref<8x128xf32, #tpu.memory_space<vmem>>, vector<8x128xf32>
      tpu.vector_store %arg10[%c0_95, %c0_96], %263 {strides = array<i32>} : memref<8x128xf32, #tpu.memory_space<vmem>>, vector<8x128xf32>,
    } else {
    }
    return
  }
  func.func @transform_0(%arg0: i32, %arg1: i32) -> (i32, i32, i32) {
    %c0_i32 = arith.constant 0 : i32
    %c0_i32_0 = arith.constant 0 : i32
    return %arg1, %arg0, %c0_i32 : i32, i32, i32
  }
  func.func @transform_1(%arg0: i32, %arg1: i32) -> (i32, i32) {
    %c0_i32 = arith.constant 0 : i32
    %c0_i32_0 = arith.constant 0 : i32
    %c0_i32_1 = arith.constant 0 : i32
    return %c0_i32, %c0_i32_0 : i32, i32
  }
  func.func @transform_2(%arg0: i32, %arg1: i32) -> (i32, i32) {
    %c0_i32 = arith.constant 0 : i32
    %c0_i32_0 = arith.constant 0 : i32
    %c0_i32_1 = arith.constant 0 : i32
    return %c0_i32, %c0_i32_0 : i32, i32
  }
  func.func @transform_3(%arg0: i32, %arg1: i32) -> (i32, i32) {
    %c0_i32 = arith.constant 0 : i32
    %c0_i32_0 = arith.constant 0 : i32
    %c0_i32_1 = arith.constant 0 : i32
    return %c0_i32, %c0_i32_0 : i32, i32
  }
  func.func @transform_4(%arg0: i32, %arg1: i32) -> (i32, i32) {
    %c0_i32 = arith.constant 0 : i32
    %c0_i32_0 = arith.constant 0 : i32
    return %arg0, %c0_i32 : i32, i32
  }
  func.func @transform_5(%arg0: i32, %arg1: i32) -> (i32, i32) {
    %c0_i32 = arith.constant 0 : i32
    %c0_i32_0 = arith.constant 0 : i32
    return %arg0, %c0_i32 : i32, i32
  }
  func.func @transform_6(%arg0: i32, %arg1: i32) -> (i32, i32, i32) {
    %c0_i32 = arith.constant 0 : i32
    %c0_i32_0 = arith.constant 0 : i32
    return %arg1, %arg0, %c0_i32 : i32, i32, i32
  }
  func.func @transform_7(%arg0: i32, %arg1: i32) -> (i32, i32) {
    %c0_i32 = arith.constant 0 : i32
    %c0_i32_0 = arith.constant 0 : i32
    return %arg0, %c0_i32 : i32, i32
  }
  func.func @transform_8(%arg0: i32, %arg1: i32) -> (i32, i32) {
    %c0_i32 = arith.constant 0 : i32
    %c0_i32_0 = arith.constant 0 : i32
    return %arg0, %c0_i32 : i32, i32
  }
}

module attributes {stable_mosaic.version = 11 : i64} {
  func.func @_lstm_layer_fc_kernel(%arg0: i32, %arg1: i32, %arg2: memref<8x8x128xf32, #tpu.memory_space<vmem>>, %arg3: memref<128x512xf32, #tpu.memory_space<vmem>>, %arg4: memref<128x512xf32, #tpu.memory_space<vmem>>, %arg5: memref<1x512xf32, #tpu.memory_space<vmem>>, %arg6: memref<8x128xf32, #tpu.memory_space<vmem>>, %arg7: memref<8x128xf32, #tpu.memory_space<vmem>>, %arg8: memref<128x128xf32, #tpu.memory_space<vmem>>, %arg9: memref<1x128xf32, #tpu.memory_space<vmem>>, %arg10: memref<8x8x128xf32, #tpu.memory_space<vmem>>, %arg11: memref<8x128xf32, #tpu.memory_space<vmem>>, %arg12: memref<8x128xf32, #tpu.memory_space<vmem>>, %arg13: memref<8x128xf32, #tpu.memory_space<vmem>>, %arg14: memref<8x128xf32, #tpu.memory_space<vmem>>, %arg15: memref<64x512xf32, #tpu.memory_space<vmem>>, %arg16: memref<64x128xf32, #tpu.memory_space<vmem>>) attributes {dimension_semantics = [#tpu.dimension_semantics<parallel>, #tpu.dimension_semantics<arbitrary>], iteration_bounds = array<i64: 1, 1>, scalar_prefetch = 0 : i64, scratch_operands = 4 : i64, tpu.core_type = #tpu.core_type<tc>, window_params = [{transform_indices = @transform_0, window_bounds = array<i64: 8, 8, 128>}, {pipeline_mode = #tpu.pipeline_mode<synchronous>, transform_indices = @transform_1, window_bounds = array<i64: 128, 512>}, {pipeline_mode = #tpu.pipeline_mode<synchronous>, transform_indices = @transform_2, window_bounds = array<i64: 128, 512>}, {pipeline_mode = #tpu.pipeline_mode<synchronous>, transform_indices = @transform_3, window_bounds = array<i64: 1, 512>}, {transform_indices = @transform_4, window_bounds = array<i64: 8, 128>}, {transform_indices = @transform_5, window_bounds = array<i64: 8, 128>}, {pipeline_mode = #tpu.pipeline_mode<synchronous>, transform_indices = @transform_6, window_bounds = array<i64: 128, 128>}, {pipeline_mode = #tpu.pipeline_mode<synchronous>, transform_indices = @transform_7, window_bounds = array<i64: 1, 128>}, {transform_indices = @transform_8, window_bounds = array<i64: 8, 8, 128>}, {transform_indices = @transform_9, window_bounds = array<i64: 8, 128>}, {transform_indices = @transform_10, window_bounds = array<i64: 8, 128>}]} {
    %c0_i32 = arith.constant 0 : i32
    %0 = arith.cmpi eq, %arg1, %c0_i32 : i32
    %1 = arith.extui %0 : i1 to i32
    %c0_i32_0 = arith.constant 0 : i32
    %2 = arith.cmpi ne, %1, %c0_i32_0 : i32
    scf.if %2 {
      %c0_102 = arith.constant 0 : index
      %c0_103 = arith.constant 0 : index
      %266 = vector.load %arg6[%c0_102, %c0_103] : memref<8x128xf32, #tpu.memory_space<vmem>>, vector<8x128xf32>
      %c0_104 = arith.constant 0 : index
      %c0_105 = arith.constant 0 : index
      %267 = vector.load %arg13[%c0_104, %c0_105] : memref<8x128xf32, #tpu.memory_space<vmem>>, vector<8x128xf32>
      tpu.vector_store %arg13[%c0_104, %c0_105], %266 {strides = array<i32>} : memref<8x128xf32, #tpu.memory_space<vmem>>, vector<8x128xf32>,
      %c0_106 = arith.constant 0 : index
      %c0_107 = arith.constant 0 : index
      %268 = vector.load %arg7[%c0_106, %c0_107] : memref<8x128xf32, #tpu.memory_space<vmem>>, vector<8x128xf32>
      %c0_108 = arith.constant 0 : index
      %c0_109 = arith.constant 0 : index
      %269 = vector.load %arg14[%c0_108, %c0_109] : memref<8x128xf32, #tpu.memory_space<vmem>>, vector<8x128xf32>
      tpu.vector_store %arg14[%c0_108, %c0_109], %268 {strides = array<i32>} : memref<8x128xf32, #tpu.memory_space<vmem>>, vector<8x128xf32>,
    } else {
    }
    %c0 = arith.constant 0 : index
    %c0_1 = arith.constant 0 : index
    %c0_2 = arith.constant 0 : index
    %3 = vector.load %arg2[%c0, %c0_1, %c0_2] : memref<8x8x128xf32, #tpu.memory_space<vmem>>, vector<8x8x128xf32>
    %4 = vector.shape_cast %3 : vector<8x8x128xf32> to vector<64x128xf32>
    %c0_3 = arith.constant 0 : index
    %c0_4 = arith.constant 0 : index
    %5 = vector.load %arg3[%c0_3, %c0_4] : memref<128x512xf32, #tpu.memory_space<vmem>>, vector<128x512xf32>
    %cst = arith.constant dense<0.000000e+00> : vector<64x512xf32>
    %6 = tpu.matmul %4, %5, %cst {dimension_numbers = #tpu.dot_dimension_numbers<[1], [0], [0], [1], [0, 0, 1, 1], [], []>} : vector<64x128xf32>, vector<128x512xf32>, vector<64x512xf32> -> vector<64x512xf32>
    %c0_5 = arith.constant 0 : index
    %c0_6 = arith.constant 0 : index
    %7 = vector.load %arg5[%c0_5, %c0_6] : memref<1x512xf32, #tpu.memory_space<vmem>>, vector<1x512xf32>
    %8 = vector.broadcast %7 : vector<1x512xf32> to vector<64x512xf32>
    %9 = arith.addf %6, %8 : vector<64x512xf32>
    %c0_7 = arith.constant 0 : index
    %c0_8 = arith.constant 0 : index
    %10 = vector.load %arg15[%c0_7, %c0_8] : memref<64x512xf32, #tpu.memory_space<vmem>>, vector<64x512xf32>
    tpu.vector_store %arg15[%c0_7, %c0_8], %9 {strides = array<i32>} : memref<64x512xf32, #tpu.memory_space<vmem>>, vector<64x512xf32>,
    %c0_9 = arith.constant 0 : index
    %c0_10 = arith.constant 0 : index
    %11 = vector.load %arg13[%c0_9, %c0_10] : memref<8x128xf32, #tpu.memory_space<vmem>>, vector<8x128xf32>
    %c0_11 = arith.constant 0 : index
    %c0_12 = arith.constant 0 : index
    %12 = vector.load %arg14[%c0_11, %c0_12] : memref<8x128xf32, #tpu.memory_space<vmem>>, vector<8x128xf32>
    %c0_13 = arith.constant 0 : index
    %c0_14 = arith.constant 0 : index
    %13 = vector.load %arg15[%c0_13, %c0_14] : memref<64x512xf32, #tpu.memory_space<vmem>>, vector<8x512xf32>
    %c0_15 = arith.constant 0 : index
    %c0_16 = arith.constant 0 : index
    %14 = vector.load %arg4[%c0_15, %c0_16] : memref<128x512xf32, #tpu.memory_space<vmem>>, vector<128x512xf32>
    %cst_17 = arith.constant dense<0.000000e+00> : vector<8x512xf32>
    %15 = tpu.matmul %11, %14, %cst_17 {dimension_numbers = #tpu.dot_dimension_numbers<[1], [0], [0], [1], [0, 0, 1, 1], [], []>} : vector<8x128xf32>, vector<128x512xf32>, vector<8x512xf32> -> vector<8x512xf32>
    %16 = arith.addf %13, %15 : vector<8x512xf32>
    %17 = vector.extract_strided_slice %16 {offsets = [0, 0], sizes = [8, 128], strides = [1, 1]} : vector<8x512xf32> to vector<8x128xf32>
    %18 = arith.negf %17 : vector<8x128xf32>
    %19 = math.exp %18 : vector<8x128xf32>
    %cst_18 = arith.constant 1.000000e+00 : f32
    %20 = vector.broadcast %cst_18 : f32 to vector<8x128xf32>
    %21 = arith.addf %20, %19 : vector<8x128xf32>
    %22 = arith.divf %20, %21 : vector<8x128xf32>
    %23 = vector.extract_strided_slice %16 {offsets = [0, 128], sizes = [8, 128], strides = [1, 1]} : vector<8x512xf32> to vector<8x128xf32>
    %24 = arith.negf %23 : vector<8x128xf32>
    %25 = math.exp %24 : vector<8x128xf32>
    %cst_19 = arith.constant 1.000000e+00 : f32
    %26 = vector.broadcast %cst_19 : f32 to vector<8x128xf32>
    %27 = arith.addf %26, %25 : vector<8x128xf32>
    %28 = arith.divf %26, %27 : vector<8x128xf32>
    %29 = vector.extract_strided_slice %16 {offsets = [0, 256], sizes = [8, 128], strides = [1, 1]} : vector<8x512xf32> to vector<8x128xf32>
    %30 = math.tanh %29 : vector<8x128xf32>
    %31 = vector.extract_strided_slice %16 {offsets = [0, 384], sizes = [8, 128], strides = [1, 1]} : vector<8x512xf32> to vector<8x128xf32>
    %32 = arith.negf %31 : vector<8x128xf32>
    %33 = math.exp %32 : vector<8x128xf32>
    %cst_20 = arith.constant 1.000000e+00 : f32
    %34 = vector.broadcast %cst_20 : f32 to vector<8x128xf32>
    %35 = arith.addf %34, %33 : vector<8x128xf32>
    %36 = arith.divf %34, %35 : vector<8x128xf32>
    %37 = arith.mulf %28, %12 : vector<8x128xf32>
    %38 = arith.mulf %22, %30 : vector<8x128xf32>
    %39 = arith.addf %37, %38 : vector<8x128xf32>
    %40 = math.tanh %39 : vector<8x128xf32>
    %41 = arith.mulf %36, %40 : vector<8x128xf32>
    %c0_21 = arith.constant 0 : index
    %c0_22 = arith.constant 0 : index
    %42 = vector.load %arg16[%c0_21, %c0_22] : memref<64x128xf32, #tpu.memory_space<vmem>>, vector<8x128xf32>
    tpu.vector_store %arg16[%c0_21, %c0_22], %41 {strides = array<i32>} : memref<64x128xf32, #tpu.memory_space<vmem>>, vector<8x128xf32>,
    %c8 = arith.constant 8 : index
    %c0_23 = arith.constant 0 : index
    %43 = vector.load %arg15[%c8, %c0_23] : memref<64x512xf32, #tpu.memory_space<vmem>>, vector<8x512xf32>
    %c0_24 = arith.constant 0 : index
    %c0_25 = arith.constant 0 : index
    %44 = vector.load %arg4[%c0_24, %c0_25] : memref<128x512xf32, #tpu.memory_space<vmem>>, vector<128x512xf32>
    %cst_26 = arith.constant dense<0.000000e+00> : vector<8x512xf32>
    %45 = tpu.matmul %41, %44, %cst_26 {dimension_numbers = #tpu.dot_dimension_numbers<[1], [0], [0], [1], [0, 0, 1, 1], [], []>} : vector<8x128xf32>, vector<128x512xf32>, vector<8x512xf32> -> vector<8x512xf32>
    %46 = arith.addf %43, %45 : vector<8x512xf32>
    %47 = vector.extract_strided_slice %46 {offsets = [0, 0], sizes = [8, 128], strides = [1, 1]} : vector<8x512xf32> to vector<8x128xf32>
    %48 = arith.negf %47 : vector<8x128xf32>
    %49 = math.exp %48 : vector<8x128xf32>
    %cst_27 = arith.constant 1.000000e+00 : f32
    %50 = vector.broadcast %cst_27 : f32 to vector<8x128xf32>
    %51 = arith.addf %50, %49 : vector<8x128xf32>
    %52 = arith.divf %50, %51 : vector<8x128xf32>
    %53 = vector.extract_strided_slice %46 {offsets = [0, 128], sizes = [8, 128], strides = [1, 1]} : vector<8x512xf32> to vector<8x128xf32>
    %54 = arith.negf %53 : vector<8x128xf32>
    %55 = math.exp %54 : vector<8x128xf32>
    %cst_28 = arith.constant 1.000000e+00 : f32
    %56 = vector.broadcast %cst_28 : f32 to vector<8x128xf32>
    %57 = arith.addf %56, %55 : vector<8x128xf32>
    %58 = arith.divf %56, %57 : vector<8x128xf32>
    %59 = vector.extract_strided_slice %46 {offsets = [0, 256], sizes = [8, 128], strides = [1, 1]} : vector<8x512xf32> to vector<8x128xf32>
    %60 = math.tanh %59 : vector<8x128xf32>
    %61 = vector.extract_strided_slice %46 {offsets = [0, 384], sizes = [8, 128], strides = [1, 1]} : vector<8x512xf32> to vector<8x128xf32>
    %62 = arith.negf %61 : vector<8x128xf32>
    %63 = math.exp %62 : vector<8x128xf32>
    %cst_29 = arith.constant 1.000000e+00 : f32
    %64 = vector.broadcast %cst_29 : f32 to vector<8x128xf32>
    %65 = arith.addf %64, %63 : vector<8x128xf32>
    %66 = arith.divf %64, %65 : vector<8x128xf32>
    %67 = arith.mulf %58, %39 : vector<8x128xf32>
    %68 = arith.mulf %52, %60 : vector<8x128xf32>
    %69 = arith.addf %67, %68 : vector<8x128xf32>
    %70 = math.tanh %69 : vector<8x128xf32>
    %71 = arith.mulf %66, %70 : vector<8x128xf32>
    %c8_30 = arith.constant 8 : index
    %c0_31 = arith.constant 0 : index
    %72 = vector.load %arg16[%c8_30, %c0_31] : memref<64x128xf32, #tpu.memory_space<vmem>>, vector<8x128xf32>
    tpu.vector_store %arg16[%c8_30, %c0_31], %71 {strides = array<i32>} : memref<64x128xf32, #tpu.memory_space<vmem>>, vector<8x128xf32>,
    %c16 = arith.constant 16 : index
    %c0_32 = arith.constant 0 : index
    %73 = vector.load %arg15[%c16, %c0_32] : memref<64x512xf32, #tpu.memory_space<vmem>>, vector<8x512xf32>
    %c0_33 = arith.constant 0 : index
    %c0_34 = arith.constant 0 : index
    %74 = vector.load %arg4[%c0_33, %c0_34] : memref<128x512xf32, #tpu.memory_space<vmem>>, vector<128x512xf32>
    %cst_35 = arith.constant dense<0.000000e+00> : vector<8x512xf32>
    %75 = tpu.matmul %71, %74, %cst_35 {dimension_numbers = #tpu.dot_dimension_numbers<[1], [0], [0], [1], [0, 0, 1, 1], [], []>} : vector<8x128xf32>, vector<128x512xf32>, vector<8x512xf32> -> vector<8x512xf32>
    %76 = arith.addf %73, %75 : vector<8x512xf32>
    %77 = vector.extract_strided_slice %76 {offsets = [0, 0], sizes = [8, 128], strides = [1, 1]} : vector<8x512xf32> to vector<8x128xf32>
    %78 = arith.negf %77 : vector<8x128xf32>
    %79 = math.exp %78 : vector<8x128xf32>
    %cst_36 = arith.constant 1.000000e+00 : f32
    %80 = vector.broadcast %cst_36 : f32 to vector<8x128xf32>
    %81 = arith.addf %80, %79 : vector<8x128xf32>
    %82 = arith.divf %80, %81 : vector<8x128xf32>
    %83 = vector.extract_strided_slice %76 {offsets = [0, 128], sizes = [8, 128], strides = [1, 1]} : vector<8x512xf32> to vector<8x128xf32>
    %84 = arith.negf %83 : vector<8x128xf32>
    %85 = math.exp %84 : vector<8x128xf32>
    %cst_37 = arith.constant 1.000000e+00 : f32
    %86 = vector.broadcast %cst_37 : f32 to vector<8x128xf32>
    %87 = arith.addf %86, %85 : vector<8x128xf32>
    %88 = arith.divf %86, %87 : vector<8x128xf32>
    %89 = vector.extract_strided_slice %76 {offsets = [0, 256], sizes = [8, 128], strides = [1, 1]} : vector<8x512xf32> to vector<8x128xf32>
    %90 = math.tanh %89 : vector<8x128xf32>
    %91 = vector.extract_strided_slice %76 {offsets = [0, 384], sizes = [8, 128], strides = [1, 1]} : vector<8x512xf32> to vector<8x128xf32>
    %92 = arith.negf %91 : vector<8x128xf32>
    %93 = math.exp %92 : vector<8x128xf32>
    %cst_38 = arith.constant 1.000000e+00 : f32
    %94 = vector.broadcast %cst_38 : f32 to vector<8x128xf32>
    %95 = arith.addf %94, %93 : vector<8x128xf32>
    %96 = arith.divf %94, %95 : vector<8x128xf32>
    %97 = arith.mulf %88, %69 : vector<8x128xf32>
    %98 = arith.mulf %82, %90 : vector<8x128xf32>
    %99 = arith.addf %97, %98 : vector<8x128xf32>
    %100 = math.tanh %99 : vector<8x128xf32>
    %101 = arith.mulf %96, %100 : vector<8x128xf32>
    %c16_39 = arith.constant 16 : index
    %c0_40 = arith.constant 0 : index
    %102 = vector.load %arg16[%c16_39, %c0_40] : memref<64x128xf32, #tpu.memory_space<vmem>>, vector<8x128xf32>
    tpu.vector_store %arg16[%c16_39, %c0_40], %101 {strides = array<i32>} : memref<64x128xf32, #tpu.memory_space<vmem>>, vector<8x128xf32>,
    %c24 = arith.constant 24 : index
    %c0_41 = arith.constant 0 : index
    %103 = vector.load %arg15[%c24, %c0_41] : memref<64x512xf32, #tpu.memory_space<vmem>>, vector<8x512xf32>
    %c0_42 = arith.constant 0 : index
    %c0_43 = arith.constant 0 : index
    %104 = vector.load %arg4[%c0_42, %c0_43] : memref<128x512xf32, #tpu.memory_space<vmem>>, vector<128x512xf32>
    %cst_44 = arith.constant dense<0.000000e+00> : vector<8x512xf32>
    %105 = tpu.matmul %101, %104, %cst_44 {dimension_numbers = #tpu.dot_dimension_numbers<[1], [0], [0], [1], [0, 0, 1, 1], [], []>} : vector<8x128xf32>, vector<128x512xf32>, vector<8x512xf32> -> vector<8x512xf32>
    %106 = arith.addf %103, %105 : vector<8x512xf32>
    %107 = vector.extract_strided_slice %106 {offsets = [0, 0], sizes = [8, 128], strides = [1, 1]} : vector<8x512xf32> to vector<8x128xf32>
    %108 = arith.negf %107 : vector<8x128xf32>
    %109 = math.exp %108 : vector<8x128xf32>
    %cst_45 = arith.constant 1.000000e+00 : f32
    %110 = vector.broadcast %cst_45 : f32 to vector<8x128xf32>
    %111 = arith.addf %110, %109 : vector<8x128xf32>
    %112 = arith.divf %110, %111 : vector<8x128xf32>
    %113 = vector.extract_strided_slice %106 {offsets = [0, 128], sizes = [8, 128], strides = [1, 1]} : vector<8x512xf32> to vector<8x128xf32>
    %114 = arith.negf %113 : vector<8x128xf32>
    %115 = math.exp %114 : vector<8x128xf32>
    %cst_46 = arith.constant 1.000000e+00 : f32
    %116 = vector.broadcast %cst_46 : f32 to vector<8x128xf32>
    %117 = arith.addf %116, %115 : vector<8x128xf32>
    %118 = arith.divf %116, %117 : vector<8x128xf32>
    %119 = vector.extract_strided_slice %106 {offsets = [0, 256], sizes = [8, 128], strides = [1, 1]} : vector<8x512xf32> to vector<8x128xf32>
    %120 = math.tanh %119 : vector<8x128xf32>
    %121 = vector.extract_strided_slice %106 {offsets = [0, 384], sizes = [8, 128], strides = [1, 1]} : vector<8x512xf32> to vector<8x128xf32>
    %122 = arith.negf %121 : vector<8x128xf32>
    %123 = math.exp %122 : vector<8x128xf32>
    %cst_47 = arith.constant 1.000000e+00 : f32
    %124 = vector.broadcast %cst_47 : f32 to vector<8x128xf32>
    %125 = arith.addf %124, %123 : vector<8x128xf32>
    %126 = arith.divf %124, %125 : vector<8x128xf32>
    %127 = arith.mulf %118, %99 : vector<8x128xf32>
    %128 = arith.mulf %112, %120 : vector<8x128xf32>
    %129 = arith.addf %127, %128 : vector<8x128xf32>
    %130 = math.tanh %129 : vector<8x128xf32>
    %131 = arith.mulf %126, %130 : vector<8x128xf32>
    %c24_48 = arith.constant 24 : index
    %c0_49 = arith.constant 0 : index
    %132 = vector.load %arg16[%c24_48, %c0_49] : memref<64x128xf32, #tpu.memory_space<vmem>>, vector<8x128xf32>
    tpu.vector_store %arg16[%c24_48, %c0_49], %131 {strides = array<i32>} : memref<64x128xf32, #tpu.memory_space<vmem>>, vector<8x128xf32>,
    %c32 = arith.constant 32 : index
    %c0_50 = arith.constant 0 : index
    %133 = vector.load %arg15[%c32, %c0_50] : memref<64x512xf32, #tpu.memory_space<vmem>>, vector<8x512xf32>
    %c0_51 = arith.constant 0 : index
    %c0_52 = arith.constant 0 : index
    %134 = vector.load %arg4[%c0_51, %c0_52] : memref<128x512xf32, #tpu.memory_space<vmem>>, vector<128x512xf32>
    %cst_53 = arith.constant dense<0.000000e+00> : vector<8x512xf32>
    %135 = tpu.matmul %131, %134, %cst_53 {dimension_numbers = #tpu.dot_dimension_numbers<[1], [0], [0], [1], [0, 0, 1, 1], [], []>} : vector<8x128xf32>, vector<128x512xf32>, vector<8x512xf32> -> vector<8x512xf32>
    %136 = arith.addf %133, %135 : vector<8x512xf32>
    %137 = vector.extract_strided_slice %136 {offsets = [0, 0], sizes = [8, 128], strides = [1, 1]} : vector<8x512xf32> to vector<8x128xf32>
    %138 = arith.negf %137 : vector<8x128xf32>
    %139 = math.exp %138 : vector<8x128xf32>
    %cst_54 = arith.constant 1.000000e+00 : f32
    %140 = vector.broadcast %cst_54 : f32 to vector<8x128xf32>
    %141 = arith.addf %140, %139 : vector<8x128xf32>
    %142 = arith.divf %140, %141 : vector<8x128xf32>
    %143 = vector.extract_strided_slice %136 {offsets = [0, 128], sizes = [8, 128], strides = [1, 1]} : vector<8x512xf32> to vector<8x128xf32>
    %144 = arith.negf %143 : vector<8x128xf32>
    %145 = math.exp %144 : vector<8x128xf32>
    %cst_55 = arith.constant 1.000000e+00 : f32
    %146 = vector.broadcast %cst_55 : f32 to vector<8x128xf32>
    %147 = arith.addf %146, %145 : vector<8x128xf32>
    %148 = arith.divf %146, %147 : vector<8x128xf32>
    %149 = vector.extract_strided_slice %136 {offsets = [0, 256], sizes = [8, 128], strides = [1, 1]} : vector<8x512xf32> to vector<8x128xf32>
    %150 = math.tanh %149 : vector<8x128xf32>
    %151 = vector.extract_strided_slice %136 {offsets = [0, 384], sizes = [8, 128], strides = [1, 1]} : vector<8x512xf32> to vector<8x128xf32>
    %152 = arith.negf %151 : vector<8x128xf32>
    %153 = math.exp %152 : vector<8x128xf32>
    %cst_56 = arith.constant 1.000000e+00 : f32
    %154 = vector.broadcast %cst_56 : f32 to vector<8x128xf32>
    %155 = arith.addf %154, %153 : vector<8x128xf32>
    %156 = arith.divf %154, %155 : vector<8x128xf32>
    %157 = arith.mulf %148, %129 : vector<8x128xf32>
    %158 = arith.mulf %142, %150 : vector<8x128xf32>
    %159 = arith.addf %157, %158 : vector<8x128xf32>
    %160 = math.tanh %159 : vector<8x128xf32>
    %161 = arith.mulf %156, %160 : vector<8x128xf32>
    %c32_57 = arith.constant 32 : index
    %c0_58 = arith.constant 0 : index
    %162 = vector.load %arg16[%c32_57, %c0_58] : memref<64x128xf32, #tpu.memory_space<vmem>>, vector<8x128xf32>
    tpu.vector_store %arg16[%c32_57, %c0_58], %161 {strides = array<i32>} : memref<64x128xf32, #tpu.memory_space<vmem>>, vector<8x128xf32>,
    %c40 = arith.constant 40 : index
    %c0_59 = arith.constant 0 : index
    %163 = vector.load %arg15[%c40, %c0_59] : memref<64x512xf32, #tpu.memory_space<vmem>>, vector<8x512xf32>
    %c0_60 = arith.constant 0 : index
    %c0_61 = arith.constant 0 : index
    %164 = vector.load %arg4[%c0_60, %c0_61] : memref<128x512xf32, #tpu.memory_space<vmem>>, vector<128x512xf32>
    %cst_62 = arith.constant dense<0.000000e+00> : vector<8x512xf32>
    %165 = tpu.matmul %161, %164, %cst_62 {dimension_numbers = #tpu.dot_dimension_numbers<[1], [0], [0], [1], [0, 0, 1, 1], [], []>} : vector<8x128xf32>, vector<128x512xf32>, vector<8x512xf32> -> vector<8x512xf32>
    %166 = arith.addf %163, %165 : vector<8x512xf32>
    %167 = vector.extract_strided_slice %166 {offsets = [0, 0], sizes = [8, 128], strides = [1, 1]} : vector<8x512xf32> to vector<8x128xf32>
    %168 = arith.negf %167 : vector<8x128xf32>
    %169 = math.exp %168 : vector<8x128xf32>
    %cst_63 = arith.constant 1.000000e+00 : f32
    %170 = vector.broadcast %cst_63 : f32 to vector<8x128xf32>
    %171 = arith.addf %170, %169 : vector<8x128xf32>
    %172 = arith.divf %170, %171 : vector<8x128xf32>
    %173 = vector.extract_strided_slice %166 {offsets = [0, 128], sizes = [8, 128], strides = [1, 1]} : vector<8x512xf32> to vector<8x128xf32>
    %174 = arith.negf %173 : vector<8x128xf32>
    %175 = math.exp %174 : vector<8x128xf32>
    %cst_64 = arith.constant 1.000000e+00 : f32
    %176 = vector.broadcast %cst_64 : f32 to vector<8x128xf32>
    %177 = arith.addf %176, %175 : vector<8x128xf32>
    %178 = arith.divf %176, %177 : vector<8x128xf32>
    %179 = vector.extract_strided_slice %166 {offsets = [0, 256], sizes = [8, 128], strides = [1, 1]} : vector<8x512xf32> to vector<8x128xf32>
    %180 = math.tanh %179 : vector<8x128xf32>
    %181 = vector.extract_strided_slice %166 {offsets = [0, 384], sizes = [8, 128], strides = [1, 1]} : vector<8x512xf32> to vector<8x128xf32>
    %182 = arith.negf %181 : vector<8x128xf32>
    %183 = math.exp %182 : vector<8x128xf32>
    %cst_65 = arith.constant 1.000000e+00 : f32
    %184 = vector.broadcast %cst_65 : f32 to vector<8x128xf32>
    %185 = arith.addf %184, %183 : vector<8x128xf32>
    %186 = arith.divf %184, %185 : vector<8x128xf32>
    %187 = arith.mulf %178, %159 : vector<8x128xf32>
    %188 = arith.mulf %172, %180 : vector<8x128xf32>
    %189 = arith.addf %187, %188 : vector<8x128xf32>
    %190 = math.tanh %189 : vector<8x128xf32>
    %191 = arith.mulf %186, %190 : vector<8x128xf32>
    %c40_66 = arith.constant 40 : index
    %c0_67 = arith.constant 0 : index
    %192 = vector.load %arg16[%c40_66, %c0_67] : memref<64x128xf32, #tpu.memory_space<vmem>>, vector<8x128xf32>
    tpu.vector_store %arg16[%c40_66, %c0_67], %191 {strides = array<i32>} : memref<64x128xf32, #tpu.memory_space<vmem>>, vector<8x128xf32>,
    %c48 = arith.constant 48 : index
    %c0_68 = arith.constant 0 : index
    %193 = vector.load %arg15[%c48, %c0_68] : memref<64x512xf32, #tpu.memory_space<vmem>>, vector<8x512xf32>
    %c0_69 = arith.constant 0 : index
    %c0_70 = arith.constant 0 : index
    %194 = vector.load %arg4[%c0_69, %c0_70] : memref<128x512xf32, #tpu.memory_space<vmem>>, vector<128x512xf32>
    %cst_71 = arith.constant dense<0.000000e+00> : vector<8x512xf32>
    %195 = tpu.matmul %191, %194, %cst_71 {dimension_numbers = #tpu.dot_dimension_numbers<[1], [0], [0], [1], [0, 0, 1, 1], [], []>} : vector<8x128xf32>, vector<128x512xf32>, vector<8x512xf32> -> vector<8x512xf32>
    %196 = arith.addf %193, %195 : vector<8x512xf32>
    %197 = vector.extract_strided_slice %196 {offsets = [0, 0], sizes = [8, 128], strides = [1, 1]} : vector<8x512xf32> to vector<8x128xf32>
    %198 = arith.negf %197 : vector<8x128xf32>
    %199 = math.exp %198 : vector<8x128xf32>
    %cst_72 = arith.constant 1.000000e+00 : f32
    %200 = vector.broadcast %cst_72 : f32 to vector<8x128xf32>
    %201 = arith.addf %200, %199 : vector<8x128xf32>
    %202 = arith.divf %200, %201 : vector<8x128xf32>
    %203 = vector.extract_strided_slice %196 {offsets = [0, 128], sizes = [8, 128], strides = [1, 1]} : vector<8x512xf32> to vector<8x128xf32>
    %204 = arith.negf %203 : vector<8x128xf32>
    %205 = math.exp %204 : vector<8x128xf32>
    %cst_73 = arith.constant 1.000000e+00 : f32
    %206 = vector.broadcast %cst_73 : f32 to vector<8x128xf32>
    %207 = arith.addf %206, %205 : vector<8x128xf32>
    %208 = arith.divf %206, %207 : vector<8x128xf32>
    %209 = vector.extract_strided_slice %196 {offsets = [0, 256], sizes = [8, 128], strides = [1, 1]} : vector<8x512xf32> to vector<8x128xf32>
    %210 = math.tanh %209 : vector<8x128xf32>
    %211 = vector.extract_strided_slice %196 {offsets = [0, 384], sizes = [8, 128], strides = [1, 1]} : vector<8x512xf32> to vector<8x128xf32>
    %212 = arith.negf %211 : vector<8x128xf32>
    %213 = math.exp %212 : vector<8x128xf32>
    %cst_74 = arith.constant 1.000000e+00 : f32
    %214 = vector.broadcast %cst_74 : f32 to vector<8x128xf32>
    %215 = arith.addf %214, %213 : vector<8x128xf32>
    %216 = arith.divf %214, %215 : vector<8x128xf32>
    %217 = arith.mulf %208, %189 : vector<8x128xf32>
    %218 = arith.mulf %202, %210 : vector<8x128xf32>
    %219 = arith.addf %217, %218 : vector<8x128xf32>
    %220 = math.tanh %219 : vector<8x128xf32>
    %221 = arith.mulf %216, %220 : vector<8x128xf32>
    %c48_75 = arith.constant 48 : index
    %c0_76 = arith.constant 0 : index
    %222 = vector.load %arg16[%c48_75, %c0_76] : memref<64x128xf32, #tpu.memory_space<vmem>>, vector<8x128xf32>
    tpu.vector_store %arg16[%c48_75, %c0_76], %221 {strides = array<i32>} : memref<64x128xf32, #tpu.memory_space<vmem>>, vector<8x128xf32>,
    %c56 = arith.constant 56 : index
    %c0_77 = arith.constant 0 : index
    %223 = vector.load %arg15[%c56, %c0_77] : memref<64x512xf32, #tpu.memory_space<vmem>>, vector<8x512xf32>
    %c0_78 = arith.constant 0 : index
    %c0_79 = arith.constant 0 : index
    %224 = vector.load %arg4[%c0_78, %c0_79] : memref<128x512xf32, #tpu.memory_space<vmem>>, vector<128x512xf32>
    %cst_80 = arith.constant dense<0.000000e+00> : vector<8x512xf32>
    %225 = tpu.matmul %221, %224, %cst_80 {dimension_numbers = #tpu.dot_dimension_numbers<[1], [0], [0], [1], [0, 0, 1, 1], [], []>} : vector<8x128xf32>, vector<128x512xf32>, vector<8x512xf32> -> vector<8x512xf32>
    %226 = arith.addf %223, %225 : vector<8x512xf32>
    %227 = vector.extract_strided_slice %226 {offsets = [0, 0], sizes = [8, 128], strides = [1, 1]} : vector<8x512xf32> to vector<8x128xf32>
    %228 = arith.negf %227 : vector<8x128xf32>
    %229 = math.exp %228 : vector<8x128xf32>
    %cst_81 = arith.constant 1.000000e+00 : f32
    %230 = vector.broadcast %cst_81 : f32 to vector<8x128xf32>
    %231 = arith.addf %230, %229 : vector<8x128xf32>
    %232 = arith.divf %230, %231 : vector<8x128xf32>
    %233 = vector.extract_strided_slice %226 {offsets = [0, 128], sizes = [8, 128], strides = [1, 1]} : vector<8x512xf32> to vector<8x128xf32>
    %234 = arith.negf %233 : vector<8x128xf32>
    %235 = math.exp %234 : vector<8x128xf32>
    %cst_82 = arith.constant 1.000000e+00 : f32
    %236 = vector.broadcast %cst_82 : f32 to vector<8x128xf32>
    %237 = arith.addf %236, %235 : vector<8x128xf32>
    %238 = arith.divf %236, %237 : vector<8x128xf32>
    %239 = vector.extract_strided_slice %226 {offsets = [0, 256], sizes = [8, 128], strides = [1, 1]} : vector<8x512xf32> to vector<8x128xf32>
    %240 = math.tanh %239 : vector<8x128xf32>
    %241 = vector.extract_strided_slice %226 {offsets = [0, 384], sizes = [8, 128], strides = [1, 1]} : vector<8x512xf32> to vector<8x128xf32>
    %242 = arith.negf %241 : vector<8x128xf32>
    %243 = math.exp %242 : vector<8x128xf32>
    %cst_83 = arith.constant 1.000000e+00 : f32
    %244 = vector.broadcast %cst_83 : f32 to vector<8x128xf32>
    %245 = arith.addf %244, %243 : vector<8x128xf32>
    %246 = arith.divf %244, %245 : vector<8x128xf32>
    %247 = arith.mulf %238, %219 : vector<8x128xf32>
    %248 = arith.mulf %232, %240 : vector<8x128xf32>
    %249 = arith.addf %247, %248 : vector<8x128xf32>
    %250 = math.tanh %249 : vector<8x128xf32>
    %251 = arith.mulf %246, %250 : vector<8x128xf32>
    %c56_84 = arith.constant 56 : index
    %c0_85 = arith.constant 0 : index
    %252 = vector.load %arg16[%c56_84, %c0_85] : memref<64x128xf32, #tpu.memory_space<vmem>>, vector<8x128xf32>
    tpu.vector_store %arg16[%c56_84, %c0_85], %251 {strides = array<i32>} : memref<64x128xf32, #tpu.memory_space<vmem>>, vector<8x128xf32>,
    %c0_86 = arith.constant 0 : index
    %c0_87 = arith.constant 0 : index
    %253 = vector.load %arg13[%c0_86, %c0_87] : memref<8x128xf32, #tpu.memory_space<vmem>>, vector<8x128xf32>
    tpu.vector_store %arg13[%c0_86, %c0_87], %251 {strides = array<i32>} : memref<8x128xf32, #tpu.memory_space<vmem>>, vector<8x128xf32>,
    %c0_88 = arith.constant 0 : index
    %c0_89 = arith.constant 0 : index
    %254 = vector.load %arg14[%c0_88, %c0_89] : memref<8x128xf32, #tpu.memory_space<vmem>>, vector<8x128xf32>
    tpu.vector_store %arg14[%c0_88, %c0_89], %249 {strides = array<i32>} : memref<8x128xf32, #tpu.memory_space<vmem>>, vector<8x128xf32>,
    %c0_90 = arith.constant 0 : index
    %c0_91 = arith.constant 0 : index
    %255 = vector.load %arg16[%c0_90, %c0_91] : memref<64x128xf32, #tpu.memory_space<vmem>>, vector<64x128xf32>
    %c0_92 = arith.constant 0 : index
    %c0_93 = arith.constant 0 : index
    %256 = vector.load %arg8[%c0_92, %c0_93] : memref<128x128xf32, #tpu.memory_space<vmem>>, vector<128x128xf32>
    %cst_94 = arith.constant dense<0.000000e+00> : vector<64x128xf32>
    %257 = tpu.matmul %255, %256, %cst_94 {dimension_numbers = #tpu.dot_dimension_numbers<[1], [0], [0], [1], [0, 0, 1, 1], [], []>} : vector<64x128xf32>, vector<128x128xf32>, vector<64x128xf32> -> vector<64x128xf32>
    %c0_95 = arith.constant 0 : index
    %c0_96 = arith.constant 0 : index
    %258 = vector.load %arg9[%c0_95, %c0_96] : memref<1x128xf32, #tpu.memory_space<vmem>>, vector<1x128xf32>
    %259 = vector.broadcast %258 : vector<1x128xf32> to vector<64x128xf32>
    %260 = arith.addf %257, %259 : vector<64x128xf32>
    %261 = vector.shape_cast %260 : vector<64x128xf32> to vector<8x8x128xf32>
    %c0_97 = arith.constant 0 : index
    %c0_98 = arith.constant 0 : index
    %c0_99 = arith.constant 0 : index
    %262 = vector.load %arg10[%c0_97, %c0_98, %c0_99] : memref<8x8x128xf32, #tpu.memory_space<vmem>>, vector<8x8x128xf32>
    tpu.vector_store %arg10[%c0_97, %c0_98, %c0_99], %261 {strides = array<i32>} : memref<8x8x128xf32, #tpu.memory_space<vmem>>, vector<8x8x128xf32>,
    %c0_i32_100 = arith.constant 0 : i32
    %263 = arith.cmpi eq, %arg1, %c0_i32_100 : i32
    %264 = arith.extui %263 : i1 to i32
    %c0_i32_101 = arith.constant 0 : i32
    %265 = arith.cmpi ne, %264, %c0_i32_101 : i32
    scf.if %265 {
      %c0_102 = arith.constant 0 : index
      %c0_103 = arith.constant 0 : index
      %266 = vector.load %arg11[%c0_102, %c0_103] : memref<8x128xf32, #tpu.memory_space<vmem>>, vector<8x128xf32>
      tpu.vector_store %arg11[%c0_102, %c0_103], %251 {strides = array<i32>} : memref<8x128xf32, #tpu.memory_space<vmem>>, vector<8x128xf32>,
      %c0_104 = arith.constant 0 : index
      %c0_105 = arith.constant 0 : index
      %267 = vector.load %arg12[%c0_104, %c0_105] : memref<8x128xf32, #tpu.memory_space<vmem>>, vector<8x128xf32>
      tpu.vector_store %arg12[%c0_104, %c0_105], %249 {strides = array<i32>} : memref<8x128xf32, #tpu.memory_space<vmem>>, vector<8x128xf32>,
    } else {
    }
    return
  }
  func.func @transform_0(%arg0: i32, %arg1: i32) -> (i32, i32, i32) {
    %c0_i32 = arith.constant 0 : i32
    %c0_i32_0 = arith.constant 0 : i32
    return %arg1, %arg0, %c0_i32 : i32, i32, i32
  }
  func.func @transform_1(%arg0: i32, %arg1: i32) -> (i32, i32) {
    %c0_i32 = arith.constant 0 : i32
    %c0_i32_0 = arith.constant 0 : i32
    %c0_i32_1 = arith.constant 0 : i32
    return %c0_i32, %c0_i32_0 : i32, i32
  }
  func.func @transform_2(%arg0: i32, %arg1: i32) -> (i32, i32) {
    %c0_i32 = arith.constant 0 : i32
    %c0_i32_0 = arith.constant 0 : i32
    %c0_i32_1 = arith.constant 0 : i32
    return %c0_i32, %c0_i32_0 : i32, i32
  }
  func.func @transform_3(%arg0: i32, %arg1: i32) -> (i32, i32) {
    %c0_i32 = arith.constant 0 : i32
    %c0_i32_0 = arith.constant 0 : i32
    %c0_i32_1 = arith.constant 0 : i32
    return %c0_i32, %c0_i32_0 : i32, i32
  }
  func.func @transform_4(%arg0: i32, %arg1: i32) -> (i32, i32) {
    %c0_i32 = arith.constant 0 : i32
    %c0_i32_0 = arith.constant 0 : i32
    return %arg0, %c0_i32 : i32, i32
  }
  func.func @transform_5(%arg0: i32, %arg1: i32) -> (i32, i32) {
    %c0_i32 = arith.constant 0 : i32
    %c0_i32_0 = arith.constant 0 : i32
    return %arg0, %c0_i32 : i32, i32
  }
  func.func @transform_6(%arg0: i32, %arg1: i32) -> (i32, i32) {
    %c0_i32 = arith.constant 0 : i32
    %c0_i32_0 = arith.constant 0 : i32
    %c0_i32_1 = arith.constant 0 : i32
    return %c0_i32, %c0_i32_0 : i32, i32
  }
  func.func @transform_7(%arg0: i32, %arg1: i32) -> (i32, i32) {
    %c0_i32 = arith.constant 0 : i32
    %c0_i32_0 = arith.constant 0 : i32
    %c0_i32_1 = arith.constant 0 : i32
    return %c0_i32, %c0_i32_0 : i32, i32
  }
  func.func @transform_8(%arg0: i32, %arg1: i32) -> (i32, i32, i32) {
    %c0_i32 = arith.constant 0 : i32
    %c0_i32_0 = arith.constant 0 : i32
    return %arg1, %arg0, %c0_i32 : i32, i32, i32
  }
  func.func @transform_9(%arg0: i32, %arg1: i32) -> (i32, i32) {
    %c0_i32 = arith.constant 0 : i32
    %c0_i32_0 = arith.constant 0 : i32
    return %arg0, %c0_i32 : i32, i32
  }
  func.func @transform_10(%arg0: i32, %arg1: i32) -> (i32, i32) {
    %c0_i32 = arith.constant 0 : i32
    %c0_i32_0 = arith.constant 0 : i32
    return %arg0, %c0_i32 : i32, i32
  }
}

</mosaic_0001>

<bundles_post_ra>
// kernel: char_rnn_forward.3
= control target key start
LH: loop header
LB: loop body
LE: loop exit
PB: predicated region body
PF: predicated region fallthrough
CT: control target
= control target key end

     0   :  { %v3363_v3 = vmov 0.0   ;;  %s4810_s1 = inlined_call_operand.vmem [shape: f32[128,512], index: 1, kind: input, shape index: {}]   ;;  %s4811_s2 = inlined_call_operand.vmem [shape: f32[128,512], index: 2, kind: input, shape index: {}]   ;;  %s4812_s0 = inlined_call_operand.vmem [shape: f32[8,8,128], index: 0, kind: input, shape index: {}]   ;;  %s4813_s4 = inlined_call_operand.vmem [shape: f32[8,128], index: 4, kind: input, shape index: {}]   ;;  %s4814_s3 = inlined_call_operand.vmem [shape: f32[1,512], index: 3, kind: input, shape index: {}]   ;;  %s4815_s5 = inlined_call_operand.vmem [shape: f32[8,128], index: 5, kind: input, shape index: {}]   ;;  %s4816_s6 = inlined_call_operand.vmem [shape: f32[128,128], index: 6, kind: input, shape index: {}]   ;;  %s4817_s7 = inlined_call_operand.vmem [shape: f32[1,128], index: 7, kind: input, shape index: {}]   ;;  %s4818_s10 = inlined_call_operand.vmem [shape: f32[8,128], index: 10, kind: output, shape index: {2}]   ;;  %s4819_s8 = inlined_call_operand.vmem [shape: f32[8,8,128], index: 8, kind: output, shape index: {0}]   ;;  %s4820_s9 = inlined_call_operand.vmem [shape: f32[8,128], index: 9, kind: output, shape index: {1}]  }
   0x1   :  { %v49_v0 = vld [vmem:[%s4810_s1 + $0x8] sm:$0xff]  ;;  %v48_v2 = vld [vmem:[%s4810_s1] sm:$0xff]  ;;  %198 = vmatprep.mubr.f32.mxu1 %v3363_v3  ;;  %526 = vmatprep.mubr.f32.mxu0 %v3363_v3 }
   0x2   :  { %v53_v1 = vld [vmem:[%s4810_s1 + $0x28] sm:$0xff]  ;;  %v52_v5 = vld [vmem:[%s4810_s1 + $0x20] sm:$0xff] }
   0x3   :  { %v2562_v4 = vpack.c.bf16 %v53_v1, %v49_v0  ;;  %v399_v6 = vld [vmem:[%s4811_s2 + $0x8] sm:$0xff]  ;;  %v2564_v8 = vpack.c.bf16 %v52_v5, %v48_v2  ;;  %v398_v10 = vld [vmem:[%s4811_s2] sm:$0xff] }
   0x4   :  { %v403_v7 = vld [vmem:[%s4811_s2 + $0x28] sm:$0xff]  ;;  %v402_v11 = vld [vmem:[%s4811_s2 + $0x20] sm:$0xff] }
   0x5   :  { %v3439_v9 = vpack.c.bf16 %v403_v7, %v399_v6  ;;  %v57_v12 = vld [vmem:[%s4810_s1 + $0x48] sm:$0xff]  ;;  %2563 = vmatprep.subr.bf16.mxu1 %v2562_v4  ;;  %v3450_v13 = vpack.c.bf16 %v402_v11, %v398_v10  ;;  %v56_v15 = vld [vmem:[%s4810_s1 + $0x40] sm:$0xff] }
   0x6   :  { %v61_v14 = vld [vmem:[%s4810_s1 + $0x68] sm:$0xff]  ;;  %v60_v16 = vld [vmem:[%s4810_s1 + $0x60] sm:$0xff]  ;;  %2565 = vmatpush1.bf16.msra.mxu1 %v2564_v8 }
   0x7   :  { %2627 = vmatprep.subr.bf16.mxu0 %v3439_v9  ;;  %v2566_v17 = vpack.c.bf16 %v61_v14, %v57_v12  ;;  %v2568_v18 = vpack.c.bf16 %v60_v16, %v56_v15  ;;  %v407_v19 = vld [vmem:[%s4811_s2 + $0x48] sm:$0xff]  ;;  %v406_v21 = vld [vmem:[%s4811_s2 + $0x40] sm:$0xff] }
   0x8   :  { %v411_v20 = vld [vmem:[%s4811_s2 + $0x68] sm:$0xff]  ;;  %2629 = vmatpush1.bf16.msra.mxu0 %v3450_v13  ;;  %v410_v23 = vld [vmem:[%s4811_s2 + $0x60] sm:$0xff] }
   0x9   :  { %v3472_v22 = vpack.c.bf16 %v411_v20, %v407_v19  ;;  %v65_v24 = vld [vmem:[%s4810_s1 + $0x88] sm:$0xff]  ;;  %2567 = vmatprep.subr.bf16.mxu1 %v2566_v17  ;;  %v3483_v26 = vpack.c.bf16 %v410_v23, %v406_v21  ;;  %v64_v28 = vld [vmem:[%s4810_s1 + $0x80] sm:$0xff] }
   0xa   :  { %v69_v25 = vld [vmem:[%s4810_s1 + $0xa8] sm:$0xff]  ;;  %v68_v29 = vld [vmem:[%s4810_s1 + $0xa0] sm:$0xff]  ;;  %2569 = vmatpush1.bf16.msra.mxu1 %v2568_v18 }
   0xb   :  { %v2570_v27 = vpack.c.bf16 %v69_v25, %v65_v24  ;;  %v415_v30 = vld [vmem:[%s4811_s2 + $0x88] sm:$0xff]  ;;  %2631 = vmatprep.subr.bf16.mxu0 %v3472_v22  ;;  %v414_v32 = vld [vmem:[%s4811_s2 + $0x80] sm:$0xff]  ;;  %v2572_v34 = vpack.c.bf16 %v68_v29, %v64_v28 }
   0xc   :  { %v419_v31 = vld [vmem:[%s4811_s2 + $0xa8] sm:$0xff]  ;;  %v418_v33 = vld [vmem:[%s4811_s2 + $0xa0] sm:$0xff]  ;;  %2633 = vmatpush1.bf16.msra.mxu0 %v3483_v26 }
   0xd   :  { %v3504_v35 = vpack.c.bf16 %v419_v31, %v415_v30  ;;  %v73_v36 = vld [vmem:[%s4810_s1 + $0xc8] sm:$0xff]  ;;  %v72_v38 = vld [vmem:[%s4810_s1 + $0xc0] sm:$0xff]  ;;  %2571 = vmatprep.subr.bf16.mxu1 %v2570_v27  ;;  %v3516_v39 = vpack.c.bf16 %v418_v33, %v414_v32 }
   0xe   :  { %v77_v37 = vld [vmem:[%s4810_s1 + $0xe8] sm:$0xff]  ;;  %v76_v41 = vld [vmem:[%s4810_s1 + $0xe0] sm:$0xff]  ;;  %2573 = vmatpush1.bf16.msra.mxu1 %v2572_v34 }
   0xf   :  { %v2574_v40 = vpack.c.bf16 %v77_v37, %v73_v36  ;;  %v423_v42 = vld [vmem:[%s4811_s2 + $0xc8] sm:$0xff]  ;;  %2635 = vmatprep.subr.bf16.mxu0 %v3504_v35  ;;  %v422_v45 = vld [vmem:[%s4811_s2 + $0xc0] sm:$0xff]  ;;  %v2576_v49 = vpack.c.bf16 %v76_v41, %v72_v38  ;;  %v51_v37 = vld [vmem:[%s4810_s1 + $0x18] sm:$0xff] }
  0x10   :  { %v427_v43 = vld [vmem:[%s4811_s2 + $0xe8] sm:$0xff]  ;;  %v426_v46 = vld [vmem:[%s4811_s2 + $0xe0] sm:$0xff]  ;;  %2637 = vmatpush1.bf16.msra.mxu0 %v3516_v39  ;;  %v55_v38 = vld [vmem:[%s4810_s1 + $0x38] sm:$0xff] }
  0x11   :  { %v3528_v44 = vpack.c.bf16 %v427_v43, %v423_v42  ;;  %v81_v47 = vld [vmem:[%s4810_s1 + $0x108] sm:$0xff]  ;;  %2575 = vmatprep.subr.bf16.mxu1 %v2574_v40  ;;  %v3549_v52 = vpack.c.bf16 %v426_v46, %v422_v45  ;;  %v80_v54 = vld [vmem:[%s4810_s1 + $0x100] sm:$0xff]  ;;  %v2594_v42 = vpack.c.bf16 %v55_v38, %v51_v37  ;;  %v50_v43 = vld [vmem:[%s4810_s1 + $0x10] sm:$0xff] }
  0x12   :  { %v85_v48 = vld [vmem:[%s4810_s1 + $0x128] sm:$0xff]  ;;  %v84_v55 = vld [vmem:[%s4810_s1 + $0x120] sm:$0xff]  ;;  %2577 = vmatpush1.bf16.msra.mxu1 %v2576_v49  ;;  %v54_v45 = vld [vmem:[%s4810_s1 + $0x30] sm:$0xff] }
  0x13   :  { %v431_v50 = vld [vmem:[%s4811_s2 + $0x108] sm:$0xff]  ;;  %v2578_v53 = vpack.c.bf16 %v85_v48, %v81_v47  ;;  %v430_v56 = vld [vmem:[%s4811_s2 + $0x100] sm:$0xff]  ;;  %2639 = vmatprep.subr.bf16.mxu0 %v3528_v44  ;;  %v2580_v63 = vpack.c.bf16 %v84_v55, %v80_v54  ;;  %v59_v46 = vld [vmem:[%s4810_s1 + $0x58] sm:$0xff]  ;;  %v2596_v49 = vpack.c.bf16 %v54_v45, %v50_v43 }
  0x14   :  { %v435_v51 = vld [vmem:[%s4811_s2 + $0x128] sm:$0xff]  ;;  %v434_v58 = vld [vmem:[%s4811_s2 + $0x120] sm:$0xff]  ;;  %2641 = vmatpush1.bf16.msra.mxu0 %v3549_v52  ;;  %v63_v47 = vld [vmem:[%s4810_s1 + $0x78] sm:$0xff] }
  0x15   :  { %v3561_v57 = vpack.c.bf16 %v435_v51, %v431_v50  ;;  %v89_v59 = vld [vmem:[%s4810_s1 + $0x148] sm:$0xff]  ;;  %2579 = vmatprep.subr.bf16.mxu1 %v2578_v53  ;;  %v3579_v0 = vpack.c.bf16 %v434_v58, %v430_v56  ;;  %v88_v2 = vld [vmem:[%s4810_s1 + $0x140] sm:$0xff]  ;;  %v2598_v51 = vpack.c.bf16 %v63_v47, %v59_v46  ;;  %v58_v53 = vld [vmem:[%s4810_s1 + $0x50] sm:$0xff] }
  0x16   :  { %v93_v60 = vld [vmem:[%s4810_s1 + $0x168] sm:$0xff]  ;;  %v92_v4 = vld [vmem:[%s4810_s1 + $0x160] sm:$0xff]  ;;  %2581 = vmatpush1.bf16.msra.mxu1 %v2580_v63  ;;  %v62_v54 = vld [vmem:[%s4810_s1 + $0x70] sm:$0xff] }
  0x17   :  { %v439_v61 = vld [vmem:[%s4811_s2 + $0x148] sm:$0xff]  ;;  %v2582_v1 = vpack.c.bf16 %v93_v60, %v89_v59  ;;  %v438_v5 = vld [vmem:[%s4811_s2 + $0x140] sm:$0xff]  ;;  %2643 = vmatprep.subr.bf16.mxu0 %v3561_v57  ;;  %v2584_v14 = vpack.c.bf16 %v92_v4, %v88_v2  ;;  %v67_v55 = vld [vmem:[%s4810_s1 + $0x98] sm:$0xff]  ;;  %v2600_v59 = vpack.c.bf16 %v62_v54, %v58_v53 }
  0x18   :  { %v443_v62 = vld [vmem:[%s4811_s2 + $0x168] sm:$0xff]  ;;  %v442_v7 = vld [vmem:[%s4811_s2 + $0x160] sm:$0xff]  ;;  %2645 = vmatpush1.bf16.msra.mxu0 %v3579_v0  ;;  %v71_v56 = vld [vmem:[%s4810_s1 + $0xb8] sm:$0xff] }
  0x19   :  { %v3591_v6 = vpack.c.bf16 %v443_v62, %v439_v61  ;;  %v97_v8 = vld [vmem:[%s4810_s1 + $0x188] sm:$0xff]  ;;  %2583 = vmatprep.subr.bf16.mxu1 %v2582_v1  ;;  %v3609_v15 = vpack.c.bf16 %v442_v7, %v438_v5  ;;  %v96_v17 = vld [vmem:[%s4810_s1 + $0x180] sm:$0xff]  ;;  %v2602_v60 = vpack.c.bf16 %v71_v56, %v67_v55  ;;  %v66_v61 = vld [vmem:[%s4810_s1 + $0x90] sm:$0xff] }
  0x1a   :  { %v101_v10 = vld [vmem:[%s4810_s1 + $0x1a8] sm:$0xff]  ;;  %v100_v18 = vld [vmem:[%s4810_s1 + $0x1a0] sm:$0xff]  ;;  %2585 = vmatpush1.bf16.msra.mxu1 %v2584_v14  ;;  %v75_v62 = vld [vmem:[%s4810_s1 + $0xd8] sm:$0xff] }
  0x1b   :  { %v447_v11 = vld [vmem:[%s4811_s2 + $0x188] sm:$0xff]  ;;  %v2586_v16 = vpack.c.bf16 %v101_v10, %v97_v8  ;;  %v446_v19 = vld [vmem:[%s4811_s2 + $0x180] sm:$0xff]  ;;  %2647 = vmatprep.subr.bf16.mxu0 %v3591_v6  ;;  %v2588_v28 = vpack.c.bf16 %v100_v18, %v96_v17  ;;  %v79_v63 = vld [vmem:[%s4810_s1 + $0xf8] sm:$0xff] }
  0x1c   :  { %v451_v12 = vld [vmem:[%s4811_s2 + $0x1a8] sm:$0xff]  ;;  %v450_v21 = vld [vmem:[%s4811_s2 + $0x1a0] sm:$0xff]  ;;  %2649 = vmatpush1.bf16.msra.mxu0 %v3609_v15  ;;  %v3730_v1 = vld [vmem:[%s4812_s0 + $0x10] sm:$0xff]  ;;  %v2606_v4 = vpack.c.bf16 %v79_v63, %v75_v62 }
  0x1d   :  { %v3621_v20 = vpack.c.bf16 %v451_v12, %v447_v11  ;;  %v105_v23 = vld [vmem:[%s4810_s1 + $0x1c8] sm:$0xff]  ;;  %2587 = vmatprep.subr.bf16.mxu1 %v2586_v16  ;;  %v3639_v29 = vpack.c.bf16 %v450_v21, %v446_v19  ;;  %v104_v31 = vld [vmem:[%s4810_s1 + $0x1c0] sm:$0xff]  ;;  %v78_v5 = vld [vmem:[%s4810_s1 + $0xf0] sm:$0xff] }
  0x1e   :  { %v109_v24 = vld [vmem:[%s4810_s1 + $0x1e8] sm:$0xff]  ;;  %v108_v32 = vld [vmem:[%s4810_s1 + $0x1e0] sm:$0xff]  ;;  %2589 = vmatpush1.bf16.msra.mxu1 %v2588_v28  ;;  %v87_v7 = vld [vmem:[%s4810_s1 + $0x138] sm:$0xff] }
  0x1f   :  { %v455_v25 = vld [vmem:[%s4811_s2 + $0x1c8] sm:$0xff]  ;;  %v2590_v30 = vpack.c.bf16 %v109_v24, %v105_v23  ;;  %v454_v33 = vld [vmem:[%s4811_s2 + $0x1c0] sm:$0xff]  ;;  %2651 = vmatprep.subr.bf16.mxu0 %v3621_v20  ;;  %v2592_v40 = vpack.c.bf16 %v108_v32, %v104_v31  ;;  %v3751_v8 = vld [vmem:[%s4812_s0 + $0x18] sm:$0xff] }
  0x20   :  { %v459_v27 = vld [vmem:[%s4811_s2 + $0x1e8] sm:$0xff]  ;;  %v458_v36 = vld [vmem:[%s4811_s2 + $0x1e0] sm:$0xff]  ;;  %2653 = vmatpush1.bf16.msra.mxu0 %v3639_v29  ;;  %v82_v12 = vld [vmem:[%s4810_s1 + $0x110] sm:$0xff] }
  0x21   :  { %v3651_v34 = vpack.c.bf16 %v459_v27, %v455_v25  ;;  %2591 = vmatprep.subr.bf16.mxu1 %v2590_v30  ;;  %v3663_v41 = vpack.c.bf16 %v458_v36, %v454_v33  ;;  %v3681_v48 = vld [vmem:[%s4812_s0] sm:$0xff]  ;;  %v3707_v58 = vld [vmem:[%s4812_s0 + $0x8] sm:$0xff]  ;;  %v95_v14 = vld [vmem:[%s4810_s1 + $0x178] sm:$0xff] }
  0x22   :  { %2593 = vmatpush1.bf16.msra.mxu1 %v2592_v40  ;;  %v3687_v50 = vld [vmem:[%s4813_s4] sm:$0xff]  ;;  %v90_v19 = vld [vmem:[%s4810_s1 + $0x150] sm:$0xff]  ;;  %v103_v21 = vld [vmem:[%s4810_s1 + $0x1b8] sm:$0xff] }
  0x23   :  { %2655 = vmatprep.subr.bf16.mxu0 %v3651_v34  ;;  %2595 = vmatprep.subr.bf16.mxu1 %v2594_v42  ;;  %v3772_v16 = vld [vmem:[%s4812_s0 + $0x20] sm:$0xff]  ;;  %v3793_v23 = vld [vmem:[%s4812_s0 + $0x28] sm:$0xff]  ;;  %v98_v27 = vld [vmem:[%s4810_s1 + $0x190] sm:$0xff] }
  0x24   :  { %2657 = vmatpush1.bf16.msra.mxu0 %v3663_v41  ;;  %v111_v28 = vld [vmem:[%s4810_s1 + $0x1f8] sm:$0xff]  ;;  %v3814_v30 = vld [vmem:[%s4812_s0 + $0x30] sm:$0xff] }
  0x25   :  { %2691 = vmatprep.subr.bf16.mxu0 %v3439_v9  ;;  %199 = vmatmul.mubr.f32.vlgmr.msra.gmra.mrb[0].mxu1 %v3681_v48  ;;  %v70_v9 = vld [vmem:[%s4810_s1 + $0xb0] sm:$0xff]  ;;  %v405_v36 = vld [vmem:[%s4811_s2 + $0x38] sm:$0xff] }
  0x26   :  { %2597 = vmatpush1.bf16.msra.mxu1 %v2596_v49  ;;  %204 = vmatprep.mubr.f32.mxu1 %v3363_v3  ;;  %v2604_v2 = vpack.c.bf16 %v70_v9, %v66_v61  ;;  %v106_v33 = vld [vmem:[%s4810_s1 + $0x1d0] sm:$0xff]  ;;  %v3835_v37 = vld [vmem:[%s4812_s0 + $0x38] sm:$0xff] }
  0x27   :  { %527 = vmatmul.mubr.f32.vlgmr.msra.gmra.mrb[0].mxu0 %v3687_v50  ;;  %2599 = vmatprep.subr.bf16.mxu1 %v2598_v51  ;;  %v409_v42 = vld [vmem:[%s4811_s2 + $0x58] sm:$0xff]  ;;  %v408_v47 = vld [vmem:[%s4811_s2 + $0x50] sm:$0xff] }
  0x28   :  { %2693 = vmatpush1.bf16.msra.mxu0 %v3450_v13  ;;  %765 = vmatprep.mubr.f32.mxu0 %v3363_v3  ;;  %v74_v13 = vld [vmem:[%s4810_s1 + $0xd0] sm:$0xff]  ;;  %v413_v43 = vld [vmem:[%s4811_s2 + $0x78] sm:$0xff] }
  0x29   :  { %205 = vmatmul.mubr.f32.gmra.mrb[2].mxu1 %v3707_v58  ;;  %2695 = vmatprep.subr.bf16.mxu0 %v3472_v22  ;;  %v83_v22 = vld [vmem:[%s4810_s1 + $0x118] sm:$0xff]  ;;  %v2608_v10 = vpack.c.bf16 %v78_v5, %v74_v13  ;;  %v3858_v46 = vpack.c.bf16 %v413_v43, %v409_v42  ;;  %v416_v54 = vld [vmem:[%s4811_s2 + $0x90] sm:$0xff] }
  0x2a   :  { %2601 = vmatpush1.bf16.msra.mxu1 %v2600_v59  ;;  %210 = vmatprep.mubr.f32.mxu1 %v3363_v3  ;;  %v2610_v11 = vpack.c.bf16 %v87_v7, %v83_v22  ;;  %v421_v49 = vld [vmem:[%s4811_s2 + $0xb8] sm:$0xff]  ;;  %v428_v61 = vld [vmem:[%s4811_s2 + $0xf0] sm:$0xff] }
  0x2b   :  { %2603 = vmatprep.subr.bf16.mxu1 %v2602_v60  ;;  %v429_v55 = vld [vmem:[%s4811_s2 + $0xf8] sm:$0xff]  ;;  %v424_v60 = vld [vmem:[%s4811_s2 + $0xd0] sm:$0xff] }
  0x2c   :  { %2697 = vmatpush1.bf16.msra.mxu0 %v3483_v26  ;;  %v86_v26 = vld [vmem:[%s4810_s1 + $0x130] sm:$0xff]  ;;  %v437_v9 = vld [vmem:[%s4811_s2 + $0x138] sm:$0xff]  ;;  %v3916_v62 = vpack.c.bf16 %v428_v61, %v424_v60 }
  0x2d   :  { %211 = vmatmul.mubr.f32.gmra.mrb[4].mxu1 %v3730_v1  ;;  %2699 = vmatprep.subr.bf16.mxu0 %v3504_v35  ;;  %v91_v35 = vld [vmem:[%s4810_s1 + $0x158] sm:$0xff]  ;;  %v2612_v17 = vpack.c.bf16 %v86_v26, %v82_v12  ;;  %v440_v7 = vld [vmem:[%s4811_s2 + $0x150] sm:$0xff] }
  0x2e   :  { %2605 = vmatpush1.bf16.msra.mxu1 %v2604_v2  ;;  %216 = vmatprep.mubr.f32.mxu1 %v3363_v3  ;;  %v2614_v18 = vpack.c.bf16 %v95_v14, %v91_v35  ;;  %v432_v2 = vld [vmem:[%s4811_s2 + $0x110] sm:$0xff]  ;;  %v445_v13 = vld [vmem:[%s4811_s2 + $0x178] sm:$0xff] }
  0x2f   :  { %2607 = vmatprep.subr.bf16.mxu1 %v2606_v4  ;;  %v436_v4 = vld [vmem:[%s4811_s2 + $0x130] sm:$0xff] }
  0x30   :  { %2701 = vmatpush1.bf16.msra.mxu0 %v3516_v39  ;;  %v94_v39 = vld [vmem:[%s4810_s1 + $0x170] sm:$0xff]  ;;  %v3936_v5 = vpack.c.bf16 %v436_v4, %v432_v2 }
  0x31   :  { %217 = vmatmul.mubr.f32.gmra.mrb[6].mxu1 %v3751_v8  ;;  %2703 = vmatprep.subr.bf16.mxu0 %v3528_v44  ;;  %v99_v44 = vld [vmem:[%s4810_s1 + $0x198] sm:$0xff]  ;;  %v2616_v24 = vpack.c.bf16 %v94_v39, %v90_v19  ;;  %v448_v35 = vld [vmem:[%s4811_s2 + $0x190] sm:$0xff] }
  0x32   :  { %2609 = vmatpush1.bf16.msra.mxu1 %v2608_v10  ;;  %222 = vmatprep.mubr.f32.mxu1 %v3363_v3  ;;  %v2618_v25 = vpack.c.bf16 %v103_v21, %v99_v44  ;;  %v444_v10 = vld [vmem:[%s4811_s2 + $0x170] sm:$0xff] }
  0x33   :  { %2611 = vmatprep.subr.bf16.mxu1 %v2610_v11  ;;  %v453_v11 = vld [vmem:[%s4811_s2 + $0x1b8] sm:$0xff]  ;;  %v3956_v12 = vpack.c.bf16 %v444_v10, %v440_v7  ;;  %v452_v14 = vld [vmem:[%s4811_s2 + $0x1b0] sm:$0xff] }
  0x34   :  { %2705 = vmatpush1.bf16.msra.mxu0 %v3549_v52  ;;  %v102_v52 = vld [vmem:[%s4810_s1 + $0x1b0] sm:$0xff] }
  0x35   :  { %223 = vmatmul.mubr.f32.gmra.mrb[8].mxu1 %v3772_v16  ;;  %2707 = vmatprep.subr.bf16.mxu0 %v3561_v57  ;;  %v107_v57 = vld [vmem:[%s4810_s1 + $0x1d8] sm:$0xff]  ;;  %v2620_v31 = vpack.c.bf16 %v102_v52, %v98_v27  ;;  %v456_v39 = vld [vmem:[%s4811_s2 + $0x1d0] sm:$0xff] }
  0x36   :  { %2613 = vmatpush1.bf16.msra.mxu1 %v2612_v17  ;;  %228 = vmatprep.mubr.f32.mxu1 %v3363_v3  ;;  %v2622_v32 = vpack.c.bf16 %v111_v28, %v107_v57  ;;  %v461_v17 = vld [vmem:[%s4811_s2 + $0x1f8] sm:$0xff]  ;;  %v460_v44 = vld [vmem:[%s4811_s2 + $0x1f0] sm:$0xff] }
  0x37   :  { %2615 = vmatprep.subr.bf16.mxu1 %v2614_v18  ;;  %v3976_v18 = vpack.c.bf16 %v452_v14, %v448_v35  ;;  %v3990_v21 = vpack.c.bf16 %v460_v44, %v456_v39 }
  0x38   :  { %2709 = vmatpush1.bf16.msra.mxu0 %v3579_v0  ;;  %v110_v0 = vld [vmem:[%s4810_s1 + $0x1f0] sm:$0xff] }
  0x39   :  { %229 = vmatmul.mubr.f32.gmra.mrb[10].mxu1 %v3793_v23  ;;  %2711 = vmatprep.subr.bf16.mxu0 %v3591_v6  ;;  %v401_v6 = vld [vmem:[%s4811_s2 + $0x18] sm:$0xff]  ;;  %v2624_v38 = vpack.c.bf16 %v110_v0, %v106_v33 }
  0x3a   :  { %2617 = vmatpush1.bf16.msra.mxu1 %v2616_v24  ;;  %234 = vmatprep.mubr.f32.mxu1 %v3363_v3  ;;  %v3837_v40 = vpack.c.bf16 %v405_v36, %v401_v6 }
  0x3b   :  { %2619 = vmatprep.subr.bf16.mxu1 %v2618_v25  ;;  %v112_v25 = vld [vmem:[%s4814_s3] sm:$0xf] }
  0x3c   :  { %2713 = vmatpush1.bf16.msra.mxu0 %v3609_v15  ;;  %v400_v15 = vld [vmem:[%s4811_s2 + $0x10] sm:$0xff] }
  0x3d   :  { %235 = vmatmul.mubr.f32.gmra.mrb[12].mxu1 %v3814_v30  ;;  %2715 = vmatprep.subr.bf16.mxu0 %v3621_v20  ;;  %v404_v20 = vld [vmem:[%s4811_s2 + $0x30] sm:$0xff] }
  0x3e   :  { %2621 = vmatpush1.bf16.msra.mxu1 %v2620_v31  ;;  %240 = vmatprep.mubr.f32.mxu1 %v3363_v3  ;;  %v3855_v45 = vpack.c.bf16 %v404_v20, %v400_v15 }
  0x3f   :  { %2623 = vmatprep.subr.bf16.mxu1 %v2622_v32 }
  0x40   :  { %2717 = vmatpush1.bf16.msra.mxu0 %v3639_v29  ;;  %v412_v29 = vld [vmem:[%s4811_s2 + $0x70] sm:$0xff] }
  0x41   :  { %241 = vmatmul.mubr.f32.gmra.mrb[14].mxu1 %v3835_v37  ;;  %2719 = vmatprep.subr.bf16.mxu0 %v3651_v34  ;;  %v417_v34 = vld [vmem:[%s4811_s2 + $0x98] sm:$0xff]  ;;  %v3876_v51 = vpack.c.bf16 %v412_v29, %v408_v47 }
  0x42   :  { %2625 = vmatpush1.bf16.msra.mxu1 %v2624_v38  ;;  %311 = vmatprep.mubr.f32.mxu1 %v3363_v3  ;;  %v3879_v53 = vpack.c.bf16 %v421_v49, %v417_v34 }
  0x43   :  { %2659 = vmatprep.subr.bf16.mxu1 %v3837_v40 }
  0x44   :  { %2721 = vmatpush1.bf16.msra.mxu0 %v3663_v41  ;;  %v420_v41 = vld [vmem:[%s4811_s2 + $0xb0] sm:$0xff] }
  0x45   :  { %312 = vmatmul.mubr.f32.vlgmr.msra.gmra.mrb[16].mxu1 %v3681_v48  ;;  %v425_v48 = vld [vmem:[%s4811_s2 + $0xd8] sm:$0xff]  ;;  %v3896_v56 = vpack.c.bf16 %v420_v41, %v416_v54 }
  0x46   :  { %2661 = vmatpush1.bf16.msra.mxu1 %v3855_v45  ;;  %317 = vmatprep.mubr.f32.mxu1 %v3363_v3  ;;  %v3899_v59 = vpack.c.bf16 %v429_v55, %v425_v48 }
  0x47   :  { %2663 = vmatprep.subr.bf16.mxu1 %v3858_v46 }
  0x49   :  { %318 = vmatmul.mubr.f32.gmra.mrb[18].mxu1 %v3707_v58  ;;  %v433_v58 = vld [vmem:[%s4811_s2 + $0x118] sm:$0xff] }
  0x4a   :  { %2665 = vmatpush1.bf16.msra.mxu1 %v3876_v51  ;;  %323 = vmatprep.mubr.f32.mxu1 %v3363_v3  ;;  %v3919_v63 = vpack.c.bf16 %v437_v9, %v433_v58 }
  0x4b   :  { %2667 = vmatprep.subr.bf16.mxu1 %v3879_v53 }
  0x4d   :  { %324 = vmatmul.mubr.f32.gmra.mrb[20].mxu1 %v3730_v1  ;;  %v441_v1 = vld [vmem:[%s4811_s2 + $0x158] sm:$0xff] }
  0x4e   :  { %2669 = vmatpush1.bf16.msra.mxu1 %v3896_v56  ;;  %329 = vmatprep.mubr.f32.mxu1 %v3363_v3  ;;  %v3939_v22 = vpack.c.bf16 %v445_v13, %v441_v1 }
  0x4f   :  { %2671 = vmatprep.subr.bf16.mxu1 %v3899_v59 }
  0x51   :  { %330 = vmatmul.mubr.f32.gmra.mrb[22].mxu1 %v3751_v8  ;;  %v449_v8 = vld [vmem:[%s4811_s2 + $0x198] sm:$0xff] }
  0x52   :  { %2673 = vmatpush1.bf16.msra.mxu1 %v3916_v62  ;;  %335 = vmatprep.mubr.f32.mxu1 %v3363_v3  ;;  %v3959_v26 = vpack.c.bf16 %v453_v11, %v449_v8 }
  0x53   :  { %2675 = vmatprep.subr.bf16.mxu1 %v3919_v63 }
  0x55   :  { %336 = vmatmul.mubr.f32.gmra.mrb[24].mxu1 %v3772_v16  ;;  %v457_v16 = vld [vmem:[%s4811_s2 + $0x1d8] sm:$0xff] }
  0x56   :  { %2677 = vmatpush1.bf16.msra.mxu1 %v3936_v5  ;;  %341 = vmatprep.mubr.f32.mxu1 %v3363_v3  ;;  %v3979_v19 = vpack.c.bf16 %v461_v17, %v457_v16 }
  0x57   :  { %2679 = vmatprep.subr.bf16.mxu1 %v3939_v22 }
  0x59   :  { %342 = vmatmul.mubr.f32.gmra.mrb[26].mxu1 %v3793_v23 }
  0x5a   :  { %2681 = vmatpush1.bf16.msra.mxu1 %v3956_v12  ;;  %347 = vmatprep.mubr.f32.mxu1 %v3363_v3 }
  0x5b   :  { %2683 = vmatprep.subr.bf16.mxu1 %v3959_v26 }
  0x5d   :  { %348 = vmatmul.mubr.f32.gmra.mrb[28].mxu1 %v3814_v30 }
  0x5e   :  { %2685 = vmatpush1.bf16.msra.mxu1 %v3976_v18  ;;  %353 = vmatprep.mubr.f32.mxu1 %v3363_v3 }
  0x5f   :  { %2687 = vmatprep.subr.bf16.mxu1 %v3979_v19 }
  0x61   :  { %354 = vmatmul.mubr.f32.gmra.mrb[30].mxu1 %v3835_v37 }
  0x62   :  { %2689 = vmatpush1.bf16.msra.mxu1 %v3990_v21  ;;  %597 = vmatprep.mubr.f32.mxu1 %v3363_v3 }
  0x63   :  { %2723 = vmatprep.subr.bf16.mxu1 %v3837_v40 }
  0x65   :  { %598 = vmatmul.mubr.f32.vlgmr.msra.gmra.mrb[16].mxu1 %v3687_v50  ;;  %v114_v50 = vlaneseq }
  0x66   :  { %2725 = vmatpush1.bf16.msra.mxu1 %v3855_v45  ;;  %836 = vmatprep.mubr.f32.mxu1 %v3363_v3 }
  0x67   :  { %2727 = vmatprep.subr.bf16.mxu1 %v3858_v46  ;;  %v115_v23 = vshrl.u32 %v114_v50, 7 }
  0x69   :  { %v116_v24 = vsub.s32 0, %v115_v23  ;;  %v120_v27 = vsub.s32 1, %v115_v23  ;;  %v124_v39 = vsub.s32 2, %v115_v23  ;;  %v128_v50 = vsub.s32 3, %v115_v23  ;;  %v38_v23 = vld [vmem:[%s4815_s5] sm:$0xff] }
  0x6a   :  { %2729 = vmatpush1.bf16.msra.mxu1 %v3876_v51 }
  0x6b   :  { %2731 = vmatprep.subr.bf16.mxu1 %v3879_v53  ;;  %v117_v52 = vrot.slane %v112_v25, %v116_v24  ;;  %v121_v57 = vrot.slane %v112_v25, %v120_v27 }
  0x6e   :  { %2733 = vmatpush1.bf16.msra.mxu1 %v3896_v56 }
  0x6f   :  { %2735 = vmatprep.subr.bf16.mxu1 %v3899_v59 }
  0x72   :  { %2737 = vmatpush1.bf16.msra.mxu1 %v3916_v62 }
  0x73   :  { %2739 = vmatprep.subr.bf16.mxu1 %v3919_v63 }
  0x76   :  { %2741 = vmatpush1.bf16.msra.mxu1 %v3936_v5 }
  0x77   :  { %2743 = vmatprep.subr.bf16.mxu1 %v3939_v22 }
  0x7a   :  { %2745 = vmatpush1.bf16.msra.mxu1 %v3956_v12 }
  0x7b   :  { %2747 = vmatprep.subr.bf16.mxu1 %v3959_v26 }
  0x7e   :  { %2749 = vmatpush1.bf16.msra.mxu1 %v3976_v18 }
  0x7f   :  { %2751 = vmatprep.subr.bf16.mxu1 %v3979_v19 }
  0x82   :  { %2753 = vmatpush1.bf16.msra.mxu1 %v3990_v21 }
  0x83   :  { %2787 = vmatprep.subr.bf16.mxu1 %v3837_v40 }
  0xf8   :  { %v200_v28 = vpop.f32.mrb[0].mxu1 }
  0xf9   :  { %v201_v30 = vadd.f32 %v200_v28, %v117_v52  ;;  %v202_v31 = vpop.f32.mrb[1].mxu1  ;;  %v4046_v28 = vrot.slane %v112_v25, %v124_v39  ;;  %v888_v39 = vld [vmem:[%s4811_s2 + $0x60] sm:$0xff] }
  0xfa   :  { %v528_v32 = vpop.f32.mrb[0].mxu0  ;;  %v203_v33 = vadd.f32 %v202_v31, %v121_v57  ;;  %v4048_v31 = vrot.slane %v112_v25, %v128_v50  ;;  %v893_v50 = vld [vmem:[%s4811_s2 + $0x88] sm:$0xff] }
  0xfb   :  { %v530_v0 = vpop.f32.mrb[1].mxu0  ;;  %v604_v6 = vadd.f32 %v528_v32, %v201_v30 }
  0xfc   :  { %v605_v36 = vadd.f32 %v530_v0, %v203_v33  ;;  %v206_v37 = vpop.f32.mrb[2].mxu1 }
  0xfd   :  { %v4018_v38 = vadd.f32 %v206_v37, %v117_v52  ;;  %v208_v15 = vpop.f32.mrb[3].mxu1  ;;  %v2469_v17 = vmul.f32 -1.442695, %v604_v6 }
  0xfe   :  { %v4020_v20 = vadd.f32 %v208_v15, %v121_v57  ;;  %v2470_v16 = vmul.f32 -1.442695, %v605_v36 }
 0x100   :  { %v212_v42 = vpop.f32.mrb[4].mxu1  ;;  %3235 = vpow2.f32 %v2470_v16 }
 0x101   :  { %v4022_v43 = vadd.f32 %v212_v42, %v117_v52  ;;  %v214_v47 = vpop.f32.mrb[5].mxu1  ;;  %3237 = vpow2.f32 %v2469_v17  ;;  %v884_v17 = vld [vmem:[%s4811_s2 + $0x40] sm:$0xff] }
 0x102   :  { %v4024_v29 = vadd.f32 %v214_v47, %v121_v57 }
 0x104   :  { %v218_v34 = vpop.f32.mrb[6].mxu1 }
 0x105   :  { %v4026_v49 = vadd.f32 %v218_v34, %v117_v52  ;;  %v220_v54 = vpop.f32.mrb[7].mxu1 }
 0x106   :  { %v4028_v41 = vadd.f32 %v220_v54, %v121_v57 }
 0x108   :  { %v224_v48 = vpop.f32.mrb[8].mxu1 }
 0x109   :  { %v4030_v55 = vadd.f32 %v224_v48, %v117_v52  ;;  %v226_v60 = vpop.f32.mrb[9].mxu1 }
 0x10a   :  { %v4032_v61 = vadd.f32 %v226_v60, %v121_v57  ;;  %v3236_v44 = vpop.eup %3235 }
 0x10b   :  { %v3238_v24 = vpop.eup %3237  ;;  %v617_v27 = vadd.f32 1.0, %v3236_v44  ;;  %v4112_v44 = vpack.c.bf16 %v888_v39, %v884_v17 }
 0x10c   :  { %v230_v58 = vpop.f32.mrb[10].mxu1  ;;  %v611_v30 = vadd.f32 1.0, %v3238_v24  ;;  %v897_v24 = vld [vmem:[%s4811_s2 + $0xa8] sm:$0xff] }
 0x10d   :  { %v4034_v9 = vadd.f32 %v230_v58, %v117_v52  ;;  %v232_v2 = vpop.f32.mrb[11].mxu1  ;;  %3239 = vrcp.f32 %v617_v27  ;;  %v877_v58 = vld [vmem:[%s4811_s2 + $0x8] sm:$0xff]  ;;  %v4122_v27 = vpack.c.bf16 %v897_v24, %v893_v50  ;;  %v924_v50 = vld [vmem:[%s4811_s2 + $0x180] sm:$0xff] }
 0x10e   :  { %v4036_v4 = vadd.f32 %v232_v2, %v121_v57  ;;  %3241 = vrcp.f32 %v611_v30  ;;  %v881_v2 = vld [vmem:[%s4811_s2 + $0x28] sm:$0xff]  ;;  %v892_v30 = vld [vmem:[%s4811_s2 + $0x80] sm:$0xff] }
 0x10f   :  { %v928_v24 = vld [vmem:[%s4811_s2 + $0x1a0] sm:$0xff] }
 0x110   :  { %v236_v1 = vpop.f32.mrb[12].mxu1 }
 0x111   :  { %v4038_v13 = vadd.f32 %v236_v1, %v117_v52  ;;  %v238_v7 = vpop.f32.mrb[13].mxu1  ;;  %v4086_v1 = vpack.c.bf16 %v881_v2, %v877_v58  ;;  %v921_v58 = vld [vmem:[%s4811_s2 + $0x168] sm:$0xff]  ;;  %v916_v2 = vld [vmem:[%s4811_s2 + $0x140] sm:$0xff] }
 0x112   :  { %v4040_v10 = vadd.f32 %v238_v7, %v121_v57  ;;  %v876_v7 = vld [vmem:[%s4811_s2] sm:$0xff] }
 0x113   :  { %2755 = vmatprep.subr.bf16.mxu0 %v4086_v1 }
 0x114   :  { %v242_v8 = vpop.f32.mrb[14].mxu1 }
 0x115   :  { %v4042_v11 = vadd.f32 %v242_v8, %v117_v52  ;;  %v244_v35 = vpop.f32.mrb[15].mxu1 }
 0x116   :  { %v4044_v14 = vadd.f32 %v244_v35, %v121_v57  ;;  %v889_v35 = vld [vmem:[%s4811_s2 + $0x68] sm:$0xff] }
 0x117   :  { %v3240_v6 = vpop.eup %3239 }
 0x118   :  { %v3242_v36 = vpop.eup %3241  ;;  %v627_v25 = vmul.f32 %v3240_v6, %v38_v23  ;;  %v900_v6 = vld [vmem:[%s4811_s2 + $0xc0] sm:$0xff] }
 0x119   :  { %v904_v23 = vld [vmem:[%s4811_s2 + $0xe0] sm:$0xff] }
 0x138   :  { %v599_v32 = vpop.f32.mrb[16].mxu1 }
 0x139   :  { %v3202_v52 = vadd.f32 %v599_v32, %v4046_v28  ;;  %v601_v57 = vpop.f32.mrb[17].mxu1  ;;  %v896_v32 = vld [vmem:[%s4811_s2 + $0xa0] sm:$0xff] }
 0x13a   :  { %v3203_v33 = vadd.f32 %v601_v57, %v4048_v31  ;;  %v901_v57 = vld [vmem:[%s4811_s2 + $0xc8] sm:$0xff] }
 0x13b   :  { %3243 = vtanh.f32 %v3202_v52  ;;  %v4130_v52 = vpack.c.bf16 %v896_v32, %v892_v30  ;;  %v933_v30 = vld [vmem:[%s4811_s2 + $0x1c8] sm:$0xff] }
 0x13c   :  { %v2471_v0 = vmul.f32 -1.442695, %v3203_v33  ;;  %v905_v33 = vld [vmem:[%s4811_s2 + $0xe8] sm:$0xff] }
 0x13d   :  { %v937_v32 = vld [vmem:[%s4811_s2 + $0x1e8] sm:$0xff] }
 0x13e   :  { %3245 = vpow2.f32 %v2471_v0  ;;  %v4140_v0 = vpack.c.bf16 %v905_v33, %v901_v57  ;;  %v4208_v57 = vpack.c.bf16 %v928_v24, %v924_v50  ;;  %v4211_v33 = vpack.c.bf16 %v937_v32, %v933_v30 }
 0x145   :  { %v3244_v37 = vpop.eup %3243 }
 0x146   :  { %v628_v15 = vmul.f32 %v3244_v37, %v3242_v36  ;;  %v4148_v36 = vpack.c.bf16 %v904_v23, %v900_v6  ;;  %v909_v37 = vld [vmem:[%s4811_s2 + $0x108] sm:$0xff]  ;;  %v932_v6 = vld [vmem:[%s4811_s2 + $0x1c0] sm:$0xff] }
 0x147   :  { %v936_v23 = vld [vmem:[%s4811_s2 + $0x1e0] sm:$0xff] }
 0x148   :  { %v3246_v42 = vpop.eup %3245  ;;  %v4055_v47 = vadd.f32 %v628_v15, %v627_v25  ;;  %v913_v25 = vld [vmem:[%s4811_s2 + $0x128] sm:$0xff] }
 0x149   :  { %v624_v34 = vadd.f32 1.0, %v3246_v42  ;;  %v4158_v15 = vpack.c.bf16 %v913_v25, %v909_v37  ;;  %v908_v42 = vld [vmem:[%s4811_s2 + $0x100] sm:$0xff]  ;;  %v4220_v37 = vpack.c.bf16 %v936_v23, %v932_v6 }
 0x14a   :  { %3247 = vtanh.f32 %v4055_v47 }
 0x14b   :  { %3249 = vrcp.f32 %v624_v34  ;;  %v912_v34 = vld [vmem:[%s4811_s2 + $0x120] sm:$0xff] }
 0x154   :  { %v3248_v54 = vpop.eup %3247 }
 0x155   :  { %v3250_v48 = vpop.eup %3249 }
 0x156   :  { %v4058_v60 = vmul.f32 %v3250_v48, %v3248_v54  ;;  %v4166_v54 = vpack.c.bf16 %v912_v34, %v908_v42  ;;  %v917_v48 = vld [vmem:[%s4811_s2 + $0x148] sm:$0xff] }
 0x158   :  { %766 = vmatmul.mubr.f32.vlgmr.msra.gmra.mrb[2].mxu0 %v4058_v60  ;;  %837 = vmatmul.mubr.f32.vlgmr.msra.gmra.mrb[18].mxu1 %v4058_v60 }
 0x159   :  { %2789 = vmatpush1.bf16.msra.mxu1 %v3855_v45  ;;  %1004 = vmatprep.mubr.f32.mxu0 %v3363_v3 }
 0x15a   :  { %2791 = vmatprep.subr.bf16.mxu1 %v3858_v46  ;;  %1075 = vmatprep.mubr.f32.mxu1 %v3363_v3 }
 0x15d   :  { %2793 = vmatpush1.bf16.msra.mxu1 %v3876_v51 }
 0x15e   :  { %2795 = vmatprep.subr.bf16.mxu1 %v3879_v53 }
 0x161   :  { %2797 = vmatpush1.bf16.msra.mxu1 %v3896_v56 }
 0x162   :  { %2799 = vmatprep.subr.bf16.mxu1 %v3899_v59 }
 0x165   :  { %2801 = vmatpush1.bf16.msra.mxu1 %v3916_v62 }
 0x166   :  { %2803 = vmatprep.subr.bf16.mxu1 %v3919_v63 }
 0x169   :  { %2805 = vmatpush1.bf16.msra.mxu1 %v3936_v5 }
 0x16a   :  { %2807 = vmatprep.subr.bf16.mxu1 %v3939_v22 }
 0x16d   :  { %2809 = vmatpush1.bf16.msra.mxu1 %v3956_v12 }
 0x16e   :  { %2811 = vmatprep.subr.bf16.mxu1 %v3959_v26 }
 0x171   :  { %2813 = vmatpush1.bf16.msra.mxu1 %v3976_v18 }
 0x172   :  { %2815 = vmatprep.subr.bf16.mxu1 %v3979_v19 }
 0x175   :  { %2817 = vmatpush1.bf16.msra.mxu1 %v3990_v21  ;;  %v880_v21 = vld [vmem:[%s4811_s2 + $0x20] sm:$0xff] }
 0x176   :  { %2851 = vmatprep.subr.bf16.mxu1 %v3837_v40  ;;  %v4094_v8 = vpack.c.bf16 %v880_v21, %v876_v7  ;;  %v885_v40 = vld [vmem:[%s4811_s2 + $0x48] sm:$0xff]  ;;  %v4179_v7 = vpack.c.bf16 %v921_v58, %v917_v48  ;;  %v920_v21 = vld [vmem:[%s4811_s2 + $0x160] sm:$0xff] }
 0x177   :  { %v4104_v16 = vpack.c.bf16 %v889_v35, %v885_v40  ;;  %v925_v40 = vld [vmem:[%s4811_s2 + $0x188] sm:$0xff]  ;;  %v4190_v17 = vpack.c.bf16 %v920_v21, %v916_v2 }
 0x178   :  { %2757 = vmatpush1.bf16.msra.mxu0 %v4094_v8  ;;  %v929_v35 = vld [vmem:[%s4811_s2 + $0x1a8] sm:$0xff] }
 0x179   :  { %2759 = vmatprep.subr.bf16.mxu0 %v4104_v16  ;;  %v4192_v39 = vpack.c.bf16 %v929_v35, %v925_v40 }
 0x17c   :  { %2761 = vmatpush1.bf16.msra.mxu0 %v4112_v44 }
 0x17d   :  { %2763 = vmatprep.subr.bf16.mxu0 %v4122_v27 }
 0x180   :  { %2765 = vmatpush1.bf16.msra.mxu0 %v4130_v52 }
 0x181   :  { %2767 = vmatprep.subr.bf16.mxu0 %v4140_v0 }
 0x184   :  { %2769 = vmatpush1.bf16.msra.mxu0 %v4148_v36 }
 0x185   :  { %2771 = vmatprep.subr.bf16.mxu0 %v4158_v15 }
 0x188   :  { %2773 = vmatpush1.bf16.msra.mxu0 %v4166_v54 }
 0x189   :  { %2775 = vmatprep.subr.bf16.mxu0 %v4179_v7 }
 0x18c   :  { %2777 = vmatpush1.bf16.msra.mxu0 %v4190_v17 }
 0x18d   :  { %2779 = vmatprep.subr.bf16.mxu0 %v4192_v39 }
 0x190   :  { %2781 = vmatpush1.bf16.msra.mxu0 %v4208_v57 }
 0x191   :  { %2783 = vmatprep.subr.bf16.mxu0 %v4211_v33 }
 0x194   :  { %2785 = vmatpush1.bf16.msra.mxu0 %v4220_v37 }
 0x195   :  { %2819 = vmatprep.subr.bf16.mxu0 %v4086_v1 }
 0x22b   :  { %v767_v25 = vpop.f32.mrb[2].mxu0  ;;  %v838_v42 = vpop.f32.mrb[18].mxu1 }
 0x22c   :  { %v843_v34 = vadd.f32 %v767_v25, %v4018_v38  ;;  %v769_v48 = vpop.f32.mrb[3].mxu0  ;;  %v840_v58 = vpop.f32.mrb[19].mxu1  ;;  %v3204_v24 = vadd.f32 %v838_v42, %v4046_v28 }
 0x22d   :  { %v844_v2 = vadd.f32 %v769_v48, %v4020_v20  ;;  %v3205_v35 = vadd.f32 %v840_v58, %v4048_v31 }
 0x22e   :  { %v2472_v21 = vmul.f32 -1.442695, %v843_v34 }
 0x22f   :  { %v2473_v40 = vmul.f32 -1.442695, %v844_v2  ;;  %v2474_v50 = vmul.f32 -1.442695, %v3205_v35 }
 0x230   :  { %3251 = vpow2.f32 %v2472_v21 }
 0x231   :  { %3253 = vpow2.f32 %v2473_v40 }
 0x232   :  { %3255 = vpow2.f32 %v2474_v50 }
 0x233   :  { %3257 = vtanh.f32 %v3204_v24 }
 0x23a   :  { %v3252_v30 = vpop.eup %3251 }
 0x23b   :  { %v3254_v32 = vpop.eup %3253  ;;  %v850_v6 = vadd.f32 1.0, %v3252_v30 }
 0x23c   :  { %v856_v23 = vadd.f32 1.0, %v3254_v32  ;;  %v3256_v38 = vpop.eup %3255 }
 0x23d   :  { %3259 = vrcp.f32 %v850_v6  ;;  %v3258_v25 = vpop.eup %3257  ;;  %v863_v2 = vadd.f32 1.0, %v3256_v38 }
 0x23e   :  { %3261 = vrcp.f32 %v856_v23 }
 0x23f   :  { %3263 = vrcp.f32 %v863_v2 }
 0x247   :  { %v3260_v20 = vpop.eup %3259 }
 0x248   :  { %v3262_v34 = vpop.eup %3261  ;;  %v867_v48 = vmul.f32 %v3260_v20, %v3258_v25 }
 0x249   :  { %v866_v21 = vmul.f32 %v3262_v34, %v4055_v47  ;;  %v3264_v42 = vpop.eup %3263 }
 0x24b   :  { %v4230_v58 = vadd.f32 %v867_v48, %v866_v21  ;;  %v1357_v21 = vld [vmem:[%s4811_s2 + $0x18] sm:$0xff] }
 0x24d   :  { %3265 = vtanh.f32 %v4230_v58 }
 0x257   :  { %v3266_v40 = vpop.eup %3265 }
 0x258   :  { %v4233_v35 = vmul.f32 %v3266_v40, %v3264_v42  ;;  %v1356_v40 = vld [vmem:[%s4811_s2 + $0x10] sm:$0xff] }
 0x25a   :  { %1005 = vmatmul.mubr.f32.vlgmr.msra.gmra.mrb[4].mxu0 %v4233_v35  ;;  %1076 = vmatmul.mubr.f32.vlgmr.msra.gmra.mrb[20].mxu1 %v4233_v35 }
 0x25b   :  { %2821 = vmatpush1.bf16.msra.mxu0 %v4094_v8  ;;  %2853 = vmatpush1.bf16.msra.mxu1 %v3855_v45  ;;  %v1173_v45 = vld [vmem:[%s4811_s2 + $0x1d0] sm:$0xff] }
 0x25c   :  { %2823 = vmatprep.subr.bf16.mxu0 %v4104_v16  ;;  %2855 = vmatprep.subr.bf16.mxu1 %v3858_v46  ;;  %v1177_v46 = vld [vmem:[%s4811_s2 + $0x1f0] sm:$0xff] }
 0x25d   :  { %1243 = vmatprep.mubr.f32.mxu0 %v3363_v3  ;;  %1314 = vmatprep.mubr.f32.mxu1 %v3363_v3 }
 0x25f   :  { %2825 = vmatpush1.bf16.msra.mxu0 %v4112_v44  ;;  %2857 = vmatpush1.bf16.msra.mxu1 %v3876_v51  ;;  %v4275_v51 = vpack.c.bf16 %v1177_v46, %v1173_v45  ;;  %v1360_v45 = vld [vmem:[%s4811_s2 + $0x30] sm:$0xff] }
 0x260   :  { %2827 = vmatprep.subr.bf16.mxu0 %v4122_v27  ;;  %2859 = vmatprep.subr.bf16.mxu1 %v3879_v53  ;;  %v4322_v46 = vpack.c.bf16 %v1360_v45, %v1356_v40  ;;  %v1400_v45 = vld [vmem:[%s4811_s2 + $0x170] sm:$0xff] }
 0x263   :  { %2829 = vmatpush1.bf16.msra.mxu0 %v4130_v52  ;;  %2861 = vmatpush1.bf16.msra.mxu1 %v3896_v56 }
 0x264   :  { %2831 = vmatprep.subr.bf16.mxu0 %v4140_v0  ;;  %2863 = vmatprep.subr.bf16.mxu1 %v3899_v59 }
 0x267   :  { %2833 = vmatpush1.bf16.msra.mxu0 %v4148_v36  ;;  %2865 = vmatpush1.bf16.msra.mxu1 %v3916_v62 }
 0x268   :  { %2835 = vmatprep.subr.bf16.mxu0 %v4158_v15  ;;  %2867 = vmatprep.subr.bf16.mxu1 %v3919_v63 }
 0x26b   :  { %2837 = vmatpush1.bf16.msra.mxu0 %v4166_v54  ;;  %2869 = vmatpush1.bf16.msra.mxu1 %v3936_v5 }
 0x26c   :  { %2839 = vmatprep.subr.bf16.mxu0 %v4179_v7  ;;  %2871 = vmatprep.subr.bf16.mxu1 %v3939_v22 }
 0x26f   :  { %2841 = vmatpush1.bf16.msra.mxu0 %v4190_v17  ;;  %2873 = vmatpush1.bf16.msra.mxu1 %v3956_v12 }
 0x270   :  { %2843 = vmatprep.subr.bf16.mxu0 %v4192_v39  ;;  %2875 = vmatprep.subr.bf16.mxu1 %v3959_v26 }
 0x273   :  { %2845 = vmatpush1.bf16.msra.mxu0 %v4208_v57  ;;  %2877 = vmatpush1.bf16.msra.mxu1 %v3976_v18 }
 0x274   :  { %2847 = vmatprep.subr.bf16.mxu0 %v4211_v33  ;;  %2879 = vmatprep.subr.bf16.mxu1 %v3979_v19 }
 0x277   :  { %2849 = vmatpush1.bf16.msra.mxu0 %v4220_v37  ;;  %2881 = vmatpush1.bf16.msra.mxu1 %v4275_v51 }
 0x278   :  { %2883 = vmatprep.subr.bf16.mxu0 %v4086_v1 }
 0x32d   :  { %v1006_v53 = vpop.f32.mrb[4].mxu0  ;;  %v1077_v56 = vpop.f32.mrb[20].mxu1 }
 0x32e   :  { %v1082_v59 = vadd.f32 %v1006_v53, %v4022_v43  ;;  %v1008_v62 = vpop.f32.mrb[5].mxu0  ;;  %v1079_v63 = vpop.f32.mrb[21].mxu1  ;;  %v3206_v19 = vadd.f32 %v1077_v56, %v4046_v28  ;;  %v1369_v53 = vld [vmem:[%s4811_s2 + $0x78] sm:$0xff] }
 0x32f   :  { %v1083_v5 = vadd.f32 %v1008_v62, %v4024_v29  ;;  %v3207_v26 = vadd.f32 %v1079_v63, %v4048_v31  ;;  %v1368_v62 = vld [vmem:[%s4811_s2 + $0x70] sm:$0xff] }
 0x330   :  { %v2475_v22 = vmul.f32 -1.442695, %v1082_v59  ;;  %v1364_v59 = vld [vmem:[%s4811_s2 + $0x50] sm:$0xff] }
 0x331   :  { %v2476_v12 = vmul.f32 -1.442695, %v1083_v5  ;;  %v2477_v18 = vmul.f32 -1.442695, %v3207_v26  ;;  %v4340_v63 = vpack.c.bf16 %v1368_v62, %v1364_v59  ;;  %v1373_v5 = vld [vmem:[%s4811_s2 + $0x98] sm:$0xff]  ;;  %v1372_v26 = vld [vmem:[%s4811_s2 + $0x90] sm:$0xff] }
 0x332   :  { %3267 = vpow2.f32 %v2475_v22  ;;  %v1377_v22 = vld [vmem:[%s4811_s2 + $0xb8] sm:$0xff] }
 0x333   :  { %3269 = vpow2.f32 %v2476_v12  ;;  %v4350_v12 = vpack.c.bf16 %v1377_v22, %v1373_v5  ;;  %v1404_v5 = vld [vmem:[%s4811_s2 + $0x190] sm:$0xff] }
 0x334   :  { %3271 = vpow2.f32 %v2477_v18  ;;  %v1376_v18 = vld [vmem:[%s4811_s2 + $0xb0] sm:$0xff] }
 0x335   :  { %3273 = vtanh.f32 %v3206_v19  ;;  %v4358_v19 = vpack.c.bf16 %v1376_v18, %v1372_v26  ;;  %v1408_v22 = vld [vmem:[%s4811_s2 + $0x1b0] sm:$0xff]  ;;  %v1413_v26 = vld [vmem:[%s4811_s2 + $0x1d8] sm:$0xff] }
 0x336   :  { %v1417_v18 = vld [vmem:[%s4811_s2 + $0x1f8] sm:$0xff] }
 0x33c   :  { %v3268_v47 = vpop.eup %3267 }
 0x33d   :  { %v3270_v50 = vpop.eup %3269  ;;  %v1089_v24 = vadd.f32 1.0, %v3268_v47  ;;  %v1381_v47 = vld [vmem:[%s4811_s2 + $0xd8] sm:$0xff] }
 0x33e   :  { %v1095_v30 = vadd.f32 1.0, %v3270_v50  ;;  %v3272_v43 = vpop.eup %3271  ;;  %v1385_v50 = vld [vmem:[%s4811_s2 + $0xf8] sm:$0xff] }
 0x33f   :  { %3275 = vrcp.f32 %v1089_v24  ;;  %v3274_v32 = vpop.eup %3273  ;;  %v1102_v38 = vadd.f32 1.0, %v3272_v43  ;;  %v4368_v24 = vpack.c.bf16 %v1385_v50, %v1381_v47  ;;  %v1384_v43 = vld [vmem:[%s4811_s2 + $0xf0] sm:$0xff]  ;;  %v4436_v47 = vpack.c.bf16 %v1408_v22, %v1404_v5 }
 0x340   :  { %3277 = vrcp.f32 %v1095_v30  ;;  %v1380_v30 = vld [vmem:[%s4811_s2 + $0xd0] sm:$0xff]  ;;  %v4439_v50 = vpack.c.bf16 %v1417_v18, %v1413_v26 }
 0x341   :  { %3279 = vrcp.f32 %v1102_v38  ;;  %v1388_v38 = vld [vmem:[%s4811_s2 + $0x110] sm:$0xff] }
 0x349   :  { %v3276_v29 = vpop.eup %3275 }
 0x34a   :  { %v3278_v6 = vpop.eup %3277  ;;  %v1106_v23 = vmul.f32 %v3276_v29, %v3274_v32  ;;  %v4376_v32 = vpack.c.bf16 %v1384_v43, %v1380_v30  ;;  %v1389_v29 = vld [vmem:[%s4811_s2 + $0x118] sm:$0xff] }
 0x34b   :  { %v1105_v25 = vmul.f32 %v3278_v6, %v4230_v58  ;;  %v3280_v34 = vpop.eup %3279  ;;  %v1361_v58 = vld [vmem:[%s4811_s2 + $0x38] sm:$0xff] }
 0x34c   :  { %v4314_v42 = vpack.c.bf16 %v1361_v58, %v1357_v21  ;;  %v1393_v6 = vld [vmem:[%s4811_s2 + $0x138] sm:$0xff]  ;;  %v1396_v58 = vld [vmem:[%s4811_s2 + $0x150] sm:$0xff] }
 0x34d   :  { %v4283_v20 = vadd.f32 %v1106_v23, %v1105_v25  ;;  %v4386_v23 = vpack.c.bf16 %v1393_v6, %v1389_v29  ;;  %v1392_v25 = vld [vmem:[%s4811_s2 + $0x130] sm:$0xff]  ;;  %v1401_v21 = vld [vmem:[%s4811_s2 + $0x178] sm:$0xff]  ;;  %v4418_v59 = vpack.c.bf16 %v1400_v45, %v1396_v58 }
 0x34e   :  { %2915 = vmatprep.subr.bf16.mxu1 %v4314_v42 }
 0x34f   :  { %3281 = vtanh.f32 %v4283_v20 }
 0x359   :  { %v3282_v48 = vpop.eup %3281 }
 0x35a   :  { %v4286_v2 = vmul.f32 %v3282_v48, %v3280_v34  ;;  %v4394_v34 = vpack.c.bf16 %v1392_v25, %v1388_v38  ;;  %v1397_v48 = vld [vmem:[%s4811_s2 + $0x158] sm:$0xff] }
 0x35b   :  { %v4407_v40 = vpack.c.bf16 %v1401_v21, %v1397_v48 }
 0x35c   :  { %1244 = vmatmul.mubr.f32.vlgmr.msra.gmra.mrb[6].mxu0 %v4286_v2  ;;  %1315 = vmatmul.mubr.f32.vlgmr.msra.gmra.mrb[22].mxu1 %v4286_v2 }
 0x35d   :  { %2885 = vmatpush1.bf16.msra.mxu0 %v4094_v8  ;;  %1482 = vmatprep.mubr.f32.mxu0 %v3363_v3 }
 0x35e   :  { %2887 = vmatprep.subr.bf16.mxu0 %v4104_v16  ;;  %1553 = vmatprep.mubr.f32.mxu1 %v3363_v3 }
 0x35f   :  { %2917 = vmatpush1.bf16.msra.mxu1 %v4322_v46 }
 0x361   :  { %2889 = vmatpush1.bf16.msra.mxu0 %v4112_v44 }
 0x362   :  { %2891 = vmatprep.subr.bf16.mxu0 %v4122_v27 }
 0x365   :  { %2893 = vmatpush1.bf16.msra.mxu0 %v4130_v52 }
 0x366   :  { %2895 = vmatprep.subr.bf16.mxu0 %v4140_v0 }
 0x369   :  { %2897 = vmatpush1.bf16.msra.mxu0 %v4148_v36 }
 0x36a   :  { %2899 = vmatprep.subr.bf16.mxu0 %v4158_v15 }
 0x36d   :  { %2901 = vmatpush1.bf16.msra.mxu0 %v4166_v54 }
 0x36e   :  { %2903 = vmatprep.subr.bf16.mxu0 %v4179_v7 }
 0x371   :  { %2905 = vmatpush1.bf16.msra.mxu0 %v4190_v17 }
 0x372   :  { %2907 = vmatprep.subr.bf16.mxu0 %v4192_v39 }
 0x375   :  { %2909 = vmatpush1.bf16.msra.mxu0 %v4208_v57 }
 0x376   :  { %2911 = vmatprep.subr.bf16.mxu0 %v4211_v33 }
 0x379   :  { %2913 = vmatpush1.bf16.msra.mxu0 %v4220_v37 }
 0x37a   :  { %2947 = vmatprep.subr.bf16.mxu0 %v4086_v1  ;;  %v1365_v1 = vld [vmem:[%s4811_s2 + $0x58] sm:$0xff] }
 0x37b   :  { %v4332_v56 = vpack.c.bf16 %v1369_v53, %v1365_v1  ;;  %v1405_v1 = vld [vmem:[%s4811_s2 + $0x198] sm:$0xff] }
 0x37c   :  { %v1409_v53 = vld [vmem:[%s4811_s2 + $0x1b8] sm:$0xff] }
 0x37d   :  { %2919 = vmatprep.subr.bf16.mxu1 %v4332_v56  ;;  %v4420_v62 = vpack.c.bf16 %v1409_v53, %v1405_v1 }
 0x37e   :  { %2921 = vmatpush1.bf16.msra.mxu1 %v4340_v63 }
 0x37f   :  { %2923 = vmatprep.subr.bf16.mxu1 %v4350_v12 }
 0x382   :  { %2925 = vmatpush1.bf16.msra.mxu1 %v4358_v19 }
 0x383   :  { %2927 = vmatprep.subr.bf16.mxu1 %v4368_v24 }
 0x386   :  { %2929 = vmatpush1.bf16.msra.mxu1 %v4376_v32 }
 0x387   :  { %2931 = vmatprep.subr.bf16.mxu1 %v4386_v23 }
 0x38a   :  { %2933 = vmatpush1.bf16.msra.mxu1 %v4394_v34 }
 0x38b   :  { %2935 = vmatprep.subr.bf16.mxu1 %v4407_v40 }
 0x38e   :  { %2937 = vmatpush1.bf16.msra.mxu1 %v4418_v59 }
 0x38f   :  { %2939 = vmatprep.subr.bf16.mxu1 %v4420_v62 }
 0x392   :  { %2941 = vmatpush1.bf16.msra.mxu1 %v4436_v47 }
 0x393   :  { %2943 = vmatprep.subr.bf16.mxu1 %v4439_v50 }
 0x396   :  { %2945 = vmatpush1.bf16.msra.mxu1 %v4275_v51 }
 0x397   :  { %2979 = vmatprep.subr.bf16.mxu1 %v4314_v42 }
 0x42f   :  { %v1245_v30 = vpop.f32.mrb[6].mxu0  ;;  %v1316_v43 = vpop.f32.mrb[22].mxu1 }
 0x430   :  { %v1321_v29 = vadd.f32 %v1245_v30, %v4026_v49  ;;  %v1247_v6 = vpop.f32.mrb[7].mxu0  ;;  %v1318_v38 = vpop.f32.mrb[23].mxu1  ;;  %v3208_v1 = vadd.f32 %v1316_v43, %v4046_v28 }
 0x431   :  { %v1322_v25 = vadd.f32 %v1247_v6, %v4028_v41  ;;  %v3209_v58 = vadd.f32 %v1318_v38, %v4048_v31 }
 0x432   :  { %v2478_v48 = vmul.f32 -1.442695, %v1321_v29 }
 0x433   :  { %v2479_v21 = vmul.f32 -1.442695, %v1322_v25  ;;  %v2480_v45 = vmul.f32 -1.442695, %v3209_v58 }
 0x434   :  { %3283 = vpow2.f32 %v2478_v48 }
 0x435   :  { %3285 = vpow2.f32 %v2479_v21 }
 0x436   :  { %3287 = vpow2.f32 %v2480_v45 }
 0x437   :  { %3289 = vtanh.f32 %v3208_v1 }
 0x43e   :  { %v3284_v53 = vpop.eup %3283 }
 0x43f   :  { %v3286_v5 = vpop.eup %3285  ;;  %v1328_v22 = vadd.f32 1.0, %v3284_v53 }
 0x440   :  { %v1334_v26 = vadd.f32 1.0, %v3286_v5  ;;  %v3288_v49 = vpop.eup %3287 }
 0x441   :  { %3291 = vrcp.f32 %v1328_v22  ;;  %v3290_v18 = vpop.eup %3289  ;;  %v1341_v6 = vadd.f32 1.0, %v3288_v49 }
 0x442   :  { %3293 = vrcp.f32 %v1334_v26 }
 0x443   :  { %3295 = vrcp.f32 %v1341_v6  ;;  %v1836_v6 = vld [vmem:[%s4811_s2 + $0x20] sm:$0xff] }
 0x44b   :  { %v3292_v41 = vpop.eup %3291 }
 0x44c   :  { %v3294_v30 = vpop.eup %3293  ;;  %v1345_v29 = vmul.f32 %v3292_v41, %v3290_v18  ;;  %v1833_v18 = vld [vmem:[%s4811_s2 + $0x8] sm:$0xff] }
 0x44d   :  { %v1344_v25 = vmul.f32 %v3294_v30, %v4283_v20  ;;  %v3296_v43 = vpop.eup %3295  ;;  %v1837_v41 = vld [vmem:[%s4811_s2 + $0x28] sm:$0xff] }
 0x44e   :  { %v3010_v30 = vpack.c.bf16 %v1837_v41, %v1833_v18  ;;  %v1881_v18 = vld [vmem:[%s4811_s2 + $0x188] sm:$0xff] }
 0x44f   :  { %v4450_v38 = vadd.f32 %v1345_v29, %v1344_v25  ;;  %v1832_v29 = vld [vmem:[%s4811_s2] sm:$0xff]  ;;  %v1845_v25 = vld [vmem:[%s4811_s2 + $0x68] sm:$0xff] }
 0x450   :  { %v1885_v41 = vld [vmem:[%s4811_s2 + $0x1a8] sm:$0xff] }
 0x451   :  { %3297 = vtanh.f32 %v4450_v38 }
 0x45b   :  { %v3298_v48 = vpop.eup %3297 }
 0x45c   :  { %v4453_v21 = vmul.f32 %v3298_v48, %v3296_v43  ;;  %v1840_v43 = vld [vmem:[%s4811_s2 + $0x40] sm:$0xff] }
 0x45d   :  { %v1844_v48 = vld [vmem:[%s4811_s2 + $0x60] sm:$0xff] }
 0x45e   :  { %1483 = vmatmul.mubr.f32.vlgmr.msra.gmra.mrb[8].mxu0 %v4453_v21  ;;  %1554 = vmatmul.mubr.f32.vlgmr.msra.gmra.mrb[24].mxu1 %v4453_v21 }
 0x45f   :  { %2949 = vmatpush1.bf16.msra.mxu0 %v4094_v8  ;;  %2981 = vmatpush1.bf16.msra.mxu1 %v4322_v46 }
 0x460   :  { %2951 = vmatprep.subr.bf16.mxu0 %v4104_v16  ;;  %2983 = vmatprep.subr.bf16.mxu1 %v4332_v56 }
 0x461   :  { %1721 = vmatprep.mubr.f32.mxu0 %v3363_v3  ;;  %1792 = vmatprep.mubr.f32.mxu1 %v3363_v3 }
 0x463   :  { %2953 = vmatpush1.bf16.msra.mxu0 %v4112_v44  ;;  %2985 = vmatpush1.bf16.msra.mxu1 %v4340_v63 }
 0x464   :  { %2955 = vmatprep.subr.bf16.mxu0 %v4122_v27  ;;  %2987 = vmatprep.subr.bf16.mxu1 %v4350_v12 }
 0x467   :  { %2957 = vmatpush1.bf16.msra.mxu0 %v4130_v52  ;;  %2989 = vmatpush1.bf16.msra.mxu1 %v4358_v19 }
 0x468   :  { %2959 = vmatprep.subr.bf16.mxu0 %v4140_v0  ;;  %2991 = vmatprep.subr.bf16.mxu1 %v4368_v24 }
 0x46b   :  { %2961 = vmatpush1.bf16.msra.mxu0 %v4148_v36  ;;  %2993 = vmatpush1.bf16.msra.mxu1 %v4376_v32 }
 0x46c   :  { %2963 = vmatprep.subr.bf16.mxu0 %v4158_v15  ;;  %2995 = vmatprep.subr.bf16.mxu1 %v4386_v23 }
 0x46f   :  { %2965 = vmatpush1.bf16.msra.mxu0 %v4166_v54  ;;  %2997 = vmatpush1.bf16.msra.mxu1 %v4394_v34 }
 0x470   :  { %2967 = vmatprep.subr.bf16.mxu0 %v4179_v7  ;;  %2999 = vmatprep.subr.bf16.mxu1 %v4407_v40 }
 0x473   :  { %2969 = vmatpush1.bf16.msra.mxu0 %v4190_v17  ;;  %3001 = vmatpush1.bf16.msra.mxu1 %v4418_v59 }
 0x474   :  { %2971 = vmatprep.subr.bf16.mxu0 %v4192_v39  ;;  %3003 = vmatprep.subr.bf16.mxu1 %v4420_v62 }
 0x477   :  { %2973 = vmatpush1.bf16.msra.mxu0 %v4208_v57  ;;  %3005 = vmatpush1.bf16.msra.mxu1 %v4436_v47 }
 0x478   :  { %2975 = vmatprep.subr.bf16.mxu0 %v4211_v33  ;;  %3007 = vmatprep.subr.bf16.mxu1 %v4439_v50 }
 0x47b   :  { %2977 = vmatpush1.bf16.msra.mxu0 %v4220_v37  ;;  %3009 = vmatpush1.bf16.msra.mxu1 %v4275_v51 }
 0x47c   :  { %3043 = vmatprep.subr.bf16.mxu1 %v4314_v42  ;;  %3011 = vmatprep.subr.bf16.mxu0 %v3010_v30 }
 0x531   :  { %v1484_v8 = vpop.f32.mrb[8].mxu0  ;;  %v1555_v16 = vpop.f32.mrb[24].mxu1 }
 0x532   :  { %v1560_v44 = vadd.f32 %v1484_v8, %v4030_v55  ;;  %v1486_v27 = vpop.f32.mrb[9].mxu0  ;;  %v1557_v52 = vpop.f32.mrb[25].mxu1  ;;  %v3210_v17 = vadd.f32 %v1555_v16, %v4046_v28  ;;  %v4549_v8 = vpack.c.bf16 %v1844_v48, %v1840_v43  ;;  %v1849_v16 = vld [vmem:[%s4811_s2 + $0x88] sm:$0xff] }
 0x533   :  { %v1561_v0 = vadd.f32 %v1486_v27, %v4032_v61  ;;  %v3211_v54 = vadd.f32 %v1557_v52, %v4048_v31  ;;  %v1848_v52 = vld [vmem:[%s4811_s2 + $0x80] sm:$0xff]  ;;  %v1889_v43 = vld [vmem:[%s4811_s2 + $0x1c8] sm:$0xff] }
 0x534   :  { %v2481_v36 = vmul.f32 -1.442695, %v1560_v44  ;;  %v1853_v44 = vld [vmem:[%s4811_s2 + $0xa8] sm:$0xff] }
 0x535   :  { %v2482_v15 = vmul.f32 -1.442695, %v1561_v0  ;;  %v2483_v7 = vmul.f32 -1.442695, %v3211_v54  ;;  %v4559_v27 = vpack.c.bf16 %v1853_v44, %v1849_v16  ;;  %v1852_v0 = vld [vmem:[%s4811_s2 + $0xa0] sm:$0xff]  ;;  %v1861_v54 = vld [vmem:[%s4811_s2 + $0xe8] sm:$0xff] }
 0x536   :  { %3299 = vpow2.f32 %v2481_v36  ;;  %v4567_v36 = vpack.c.bf16 %v1852_v0, %v1848_v52  ;;  %v1893_v48 = vld [vmem:[%s4811_s2 + $0x1e8] sm:$0xff]  ;;  %v1888_v52 = vld [vmem:[%s4811_s2 + $0x1c0] sm:$0xff] }
 0x537   :  { %3301 = vpow2.f32 %v2482_v15  ;;  %v1857_v15 = vld [vmem:[%s4811_s2 + $0xc8] sm:$0xff]  ;;  %v4648_v44 = vpack.c.bf16 %v1893_v48, %v1889_v43  ;;  %v1892_v0 = vld [vmem:[%s4811_s2 + $0x1e0] sm:$0xff] }
 0x538   :  { %3303 = vpow2.f32 %v2483_v7  ;;  %v4577_v7 = vpack.c.bf16 %v1861_v54, %v1857_v15  ;;  %v4657_v15 = vpack.c.bf16 %v1892_v0, %v1888_v52 }
 0x539   :  { %3305 = vtanh.f32 %v3210_v17  ;;  %v1856_v17 = vld [vmem:[%s4811_s2 + $0xc0] sm:$0xff] }
 0x540   :  { %v3300_v39 = vpop.eup %3299 }
 0x541   :  { %v3302_v57 = vpop.eup %3301  ;;  %v1567_v33 = vadd.f32 1.0, %v3300_v39  ;;  %v1860_v39 = vld [vmem:[%s4811_s2 + $0xe0] sm:$0xff] }
 0x542   :  { %v1573_v37 = vadd.f32 1.0, %v3302_v57  ;;  %v3304_v55 = vpop.eup %3303  ;;  %v4585_v57 = vpack.c.bf16 %v1860_v39, %v1856_v17 }
 0x543   :  { %3307 = vrcp.f32 %v1567_v33  ;;  %v3306_v20 = vpop.eup %3305  ;;  %v1580_v1 = vadd.f32 1.0, %v3304_v55  ;;  %v1865_v33 = vld [vmem:[%s4811_s2 + $0x108] sm:$0xff] }
 0x544   :  { %3309 = vrcp.f32 %v1573_v37  ;;  %v1869_v37 = vld [vmem:[%s4811_s2 + $0x128] sm:$0xff] }
 0x545   :  { %3311 = vrcp.f32 %v1580_v1  ;;  %v4595_v55 = vpack.c.bf16 %v1869_v37, %v1865_v33  ;;  %v1877_v1 = vld [vmem:[%s4811_s2 + $0x168] sm:$0xff] }
 0x54d   :  { %v3308_v61 = vpop.eup %3307 }
 0x54e   :  { %v3310_v58 = vpop.eup %3309  ;;  %v1584_v45 = vmul.f32 %v3308_v61, %v3306_v20  ;;  %v1864_v20 = vld [vmem:[%s4811_s2 + $0x100] sm:$0xff] }
 0x54f   :  { %v1583_v53 = vmul.f32 %v3310_v58, %v4450_v38  ;;  %v3312_v22 = vpop.eup %3311  ;;  %v1868_v61 = vld [vmem:[%s4811_s2 + $0x120] sm:$0xff] }
 0x550   :  { %v4603_v58 = vpack.c.bf16 %v1868_v61, %v1864_v20 }
 0x551   :  { %v4495_v5 = vadd.f32 %v1584_v45, %v1583_v53  ;;  %v1873_v45 = vld [vmem:[%s4811_s2 + $0x148] sm:$0xff]  ;;  %v1872_v53 = vld [vmem:[%s4811_s2 + $0x140] sm:$0xff] }
 0x553   :  { %3313 = vtanh.f32 %v4495_v5 }
 0x55d   :  { %v3314_v26 = vpop.eup %3313 }
 0x55e   :  { %v4498_v49 = vmul.f32 %v3314_v26, %v3312_v22  ;;  %v4616_v22 = vpack.c.bf16 %v1877_v1, %v1873_v45  ;;  %v1876_v26 = vld [vmem:[%s4811_s2 + $0x160] sm:$0xff] }
 0x560   :  { %1722 = vmatmul.mubr.f32.vlgmr.msra.gmra.mrb[10].mxu0 %v4498_v49  ;;  %1793 = vmatmul.mubr.f32.vlgmr.msra.gmra.mrb[26].mxu1 %v4498_v49 }
 0x561   :  { %3045 = vmatpush1.bf16.msra.mxu1 %v4322_v46  ;;  %1960 = vmatprep.mubr.f32.mxu0 %v3363_v3 }
 0x562   :  { %3047 = vmatprep.subr.bf16.mxu1 %v4332_v56  ;;  %2031 = vmatprep.mubr.f32.mxu1 %v3363_v3 }
 0x565   :  { %3049 = vmatpush1.bf16.msra.mxu1 %v4340_v63 }
 0x566   :  { %3051 = vmatprep.subr.bf16.mxu1 %v4350_v12 }
 0x569   :  { %3053 = vmatpush1.bf16.msra.mxu1 %v4358_v19 }
 0x56a   :  { %3055 = vmatprep.subr.bf16.mxu1 %v4368_v24 }
 0x56d   :  { %3057 = vmatpush1.bf16.msra.mxu1 %v4376_v32 }
 0x56e   :  { %3059 = vmatprep.subr.bf16.mxu1 %v4386_v23 }
 0x571   :  { %3061 = vmatpush1.bf16.msra.mxu1 %v4394_v34 }
 0x572   :  { %3063 = vmatprep.subr.bf16.mxu1 %v4407_v40 }
 0x575   :  { %3065 = vmatpush1.bf16.msra.mxu1 %v4418_v59 }
 0x576   :  { %3067 = vmatprep.subr.bf16.mxu1 %v4420_v62 }
 0x579   :  { %3069 = vmatpush1.bf16.msra.mxu1 %v4436_v47 }
 0x57a   :  { %3071 = vmatprep.subr.bf16.mxu1 %v4439_v50 }
 0x57d   :  { %3073 = vmatpush1.bf16.msra.mxu1 %v4275_v51  ;;  %v4532_v51 = vpack.c.bf16 %v1836_v6, %v1832_v29  ;;  %v4627_v29 = vpack.c.bf16 %v1876_v26, %v1872_v53  ;;  %v4629_v6 = vpack.c.bf16 %v1885_v41, %v1881_v18 }
 0x57e   :  { %3107 = vmatprep.subr.bf16.mxu1 %v4314_v42  ;;  %v1841_v42 = vld [vmem:[%s4811_s2 + $0x48] sm:$0xff] }
 0x57f   :  { %3013 = vmatpush1.bf16.msra.mxu0 %v4532_v51  ;;  %v4541_v38 = vpack.c.bf16 %v1845_v25, %v1841_v42  ;;  %v1880_v42 = vld [vmem:[%s4811_s2 + $0x180] sm:$0xff] }
 0x580   :  { %v1884_v25 = vld [vmem:[%s4811_s2 + $0x1a0] sm:$0xff] }
 0x581   :  { %3015 = vmatprep.subr.bf16.mxu0 %v4541_v38  ;;  %v4645_v16 = vpack.c.bf16 %v1884_v25, %v1880_v42 }
 0x583   :  { %3017 = vmatpush1.bf16.msra.mxu0 %v4549_v8 }
 0x584   :  { %3019 = vmatprep.subr.bf16.mxu0 %v4559_v27 }
 0x587   :  { %3021 = vmatpush1.bf16.msra.mxu0 %v4567_v36 }
 0x588   :  { %3023 = vmatprep.subr.bf16.mxu0 %v4577_v7 }
 0x58b   :  { %3025 = vmatpush1.bf16.msra.mxu0 %v4585_v57 }
 0x58c   :  { %3027 = vmatprep.subr.bf16.mxu0 %v4595_v55 }
 0x58f   :  { %3029 = vmatpush1.bf16.msra.mxu0 %v4603_v58 }
 0x590   :  { %3031 = vmatprep.subr.bf16.mxu0 %v4616_v22 }
 0x593   :  { %3033 = vmatpush1.bf16.msra.mxu0 %v4627_v29 }
 0x594   :  { %3035 = vmatprep.subr.bf16.mxu0 %v4629_v6 }
 0x597   :  { %3037 = vmatpush1.bf16.msra.mxu0 %v4645_v16 }
 0x598   :  { %3039 = vmatprep.subr.bf16.mxu0 %v4648_v44 }
 0x59b   :  { %3041 = vmatpush1.bf16.msra.mxu0 %v4657_v15 }
 0x59c   :  { %3075 = vmatprep.subr.bf16.mxu0 %v3010_v30 }
 0x633   :  { %v1723_v54 = vpop.f32.mrb[10].mxu0  ;;  %v1794_v17 = vpop.f32.mrb[26].mxu1 }
 0x634   :  { %v1799_v39 = vadd.f32 %v1723_v54, %v4034_v9  ;;  %v1725_v33 = vpop.f32.mrb[11].mxu0  ;;  %v1796_v37 = vpop.f32.mrb[27].mxu1  ;;  %v3212_v26 = vadd.f32 %v1794_v17, %v4046_v28 }
 0x635   :  { %v1800_v20 = vadd.f32 %v1725_v33, %v4036_v4  ;;  %v3213_v1 = vadd.f32 %v1796_v37, %v4048_v31 }
 0x636   :  { %v2484_v61 = vmul.f32 -1.442695, %v1799_v39 }
 0x637   :  { %v2485_v45 = vmul.f32 -1.442695, %v1800_v20  ;;  %v2486_v53 = vmul.f32 -1.442695, %v3213_v1 }
 0x638   :  { %3315 = vpow2.f32 %v2484_v61  ;;  %v2320_v61 = vld [vmem:[%s4816_s6 + $0x20] sm:$0xff] }
 0x639   :  { %3317 = vpow2.f32 %v2485_v45  ;;  %v2321_v45 = vld [vmem:[%s4816_s6 + $0x28] sm:$0xff] }
 0x63a   :  { %3319 = vpow2.f32 %v2486_v53  ;;  %v3146_v1 = vpack.c.bf16 %v2321_v45, %v2320_v61  ;;  %v2322_v53 = vld [vmem:[%s4816_s6 + $0x30] sm:$0xff] }
 0x63b   :  { %3321 = vtanh.f32 %v3212_v26  ;;  %v2323_v26 = vld [vmem:[%s4816_s6 + $0x38] sm:$0xff] }
 0x642   :  { %v3316_v18 = vpop.eup %3315 }
 0x643   :  { %v3318_v41 = vpop.eup %3317  ;;  %v1806_v30 = vadd.f32 1.0, %v3316_v18  ;;  %v3150_v18 = vpack.c.bf16 %v2323_v26, %v2322_v53 }
 0x644   :  { %v1812_v42 = vadd.f32 1.0, %v3318_v41  ;;  %v3320_v9 = vpop.eup %3319  ;;  %v2324_v41 = vld [vmem:[%s4816_s6 + $0x40] sm:$0xff] }
 0x645   :  { %3323 = vrcp.f32 %v1806_v30  ;;  %v3322_v25 = vpop.eup %3321  ;;  %v1819_v52 = vadd.f32 1.0, %v3320_v9  ;;  %v2327_v9 = vld [vmem:[%s4816_s6 + $0x58] sm:$0xff] }
 0x646   :  { %3325 = vrcp.f32 %v1812_v42  ;;  %v2326_v42 = vld [vmem:[%s4816_s6 + $0x50] sm:$0xff] }
 0x647   :  { %3327 = vrcp.f32 %v1819_v52  ;;  %v2330_v52 = vld [vmem:[%s4816_s6 + $0x70] sm:$0xff] }
 0x64f   :  { %v3324_v4 = vpop.eup %3323 }
 0x650   :  { %v3326_v43 = vpop.eup %3325  ;;  %v1823_v48 = vmul.f32 %v3324_v4, %v3322_v25  ;;  %v3158_v25 = vpack.c.bf16 %v2327_v9, %v2326_v42  ;;  %v2328_v4 = vld [vmem:[%s4816_s6 + $0x60] sm:$0xff] }
 0x651   :  { %v1822_v0 = vmul.f32 %v3326_v43, %v4495_v5  ;;  %v3328_v17 = vpop.eup %3327  ;;  %v2329_v43 = vld [vmem:[%s4816_s6 + $0x68] sm:$0xff] }
 0x653   :  { %v4666_v54 = vadd.f32 %v1823_v48, %v1822_v0  ;;  %v3162_v48 = vpack.c.bf16 %v2329_v43, %v2328_v4  ;;  %v2331_v0 = vld [vmem:[%s4816_s6 + $0x78] sm:$0xff] }
 0x655   :  { %3329 = vtanh.f32 %v4666_v54 }
 0x65f   :  { %v3330_v39 = vpop.eup %3329 }
 0x660   :  { %v4669_v33 = vmul.f32 %v3330_v39, %v3328_v17 }
 0x662   :  { %1961 = vmatmul.mubr.f32.vlgmr.msra.gmra.mrb[12].mxu0 %v4669_v33  ;;  %2032 = vmatmul.mubr.f32.vlgmr.msra.gmra.mrb[28].mxu1 %v4669_v33 }
 0x663   :  { %3077 = vmatpush1.bf16.msra.mxu0 %v4532_v51  ;;  %3109 = vmatpush1.bf16.msra.mxu1 %v4322_v46  ;;  %v2133_v46 = vld [vmem:[%s4811_s2 + $0x1f0] sm:$0xff] }
 0x664   :  { %3079 = vmatprep.subr.bf16.mxu0 %v4541_v38  ;;  %3111 = vmatprep.subr.bf16.mxu1 %v4332_v56 }
 0x665   :  { %2199 = vmatprep.mubr.f32.mxu0 %v3363_v3  ;;  %2270 = vmatprep.mubr.f32.mxu1 %v3363_v3  ;;  %v2129_v3 = vld [vmem:[%s4811_s2 + $0x1d0] sm:$0xff] }
 0x666   :  { %v3136_v56 = vpack.c.bf16 %v2133_v46, %v2129_v3 }
 0x667   :  { %3081 = vmatpush1.bf16.msra.mxu0 %v4549_v8  ;;  %3113 = vmatpush1.bf16.msra.mxu1 %v4340_v63  ;;  %v2316_v63 = vld [vmem:[%s4816_s6] sm:$0xff] }
 0x668   :  { %3083 = vmatprep.subr.bf16.mxu0 %v4559_v27  ;;  %3115 = vmatprep.subr.bf16.mxu1 %v4350_v12  ;;  %v2317_v12 = vld [vmem:[%s4816_s6 + $0x8] sm:$0xff] }
 0x66b   :  { %3085 = vmatpush1.bf16.msra.mxu0 %v4567_v36  ;;  %3117 = vmatpush1.bf16.msra.mxu1 %v4358_v19  ;;  %v3138_v19 = vpack.c.bf16 %v2317_v12, %v2316_v63 }
 0x66c   :  { %3087 = vmatprep.subr.bf16.mxu0 %v4577_v7  ;;  %3119 = vmatprep.subr.bf16.mxu1 %v4368_v24 }
 0x66f   :  { %3089 = vmatpush1.bf16.msra.mxu0 %v4585_v57  ;;  %3121 = vmatpush1.bf16.msra.mxu1 %v4376_v32 }
 0x670   :  { %3091 = vmatprep.subr.bf16.mxu0 %v4595_v55  ;;  %3123 = vmatprep.subr.bf16.mxu1 %v4386_v23 }
 0x673   :  { %3093 = vmatpush1.bf16.msra.mxu0 %v4603_v58  ;;  %3125 = vmatpush1.bf16.msra.mxu1 %v4394_v34 }
 0x674   :  { %3095 = vmatprep.subr.bf16.mxu0 %v4616_v22  ;;  %3127 = vmatprep.subr.bf16.mxu1 %v4407_v40 }
 0x677   :  { %3097 = vmatpush1.bf16.msra.mxu0 %v4627_v29  ;;  %3129 = vmatpush1.bf16.msra.mxu1 %v4418_v59 }
 0x678   :  { %3099 = vmatprep.subr.bf16.mxu0 %v4629_v6  ;;  %3131 = vmatprep.subr.bf16.mxu1 %v4420_v62  ;;  %v2318_v6 = vld [vmem:[%s4816_s6 + $0x10] sm:$0xff] }
 0x67b   :  { %3101 = vmatpush1.bf16.msra.mxu0 %v4645_v16  ;;  %3133 = vmatpush1.bf16.msra.mxu1 %v4436_v47  ;;  %v2319_v16 = vld [vmem:[%s4816_s6 + $0x18] sm:$0xff] }
 0x67c   :  { %3103 = vmatprep.subr.bf16.mxu0 %v4648_v44  ;;  %3135 = vmatprep.subr.bf16.mxu1 %v4439_v50  ;;  %v3142_v20 = vpack.c.bf16 %v2319_v16, %v2318_v6 }
 0x67f   :  { %3105 = vmatpush1.bf16.msra.mxu0 %v4657_v15  ;;  %3137 = vmatpush1.bf16.msra.mxu1 %v3136_v56 }
 0x680   :  { %3139 = vmatprep.subr.bf16.mxu0 %v3138_v19 }
 0x735   :  { %v1962_v24 = vpop.f32.mrb[12].mxu0  ;;  %v2033_v32 = vpop.f32.mrb[28].mxu1 }
 0x736   :  { %v2038_v23 = vadd.f32 %v1962_v24, %v4038_v13  ;;  %v1964_v34 = vpop.f32.mrb[13].mxu0  ;;  %v2035_v40 = vpop.f32.mrb[29].mxu1  ;;  %v3214_v51 = vadd.f32 %v2033_v32, %v4046_v28 }
 0x737   :  { %v2039_v59 = vadd.f32 %v1964_v34, %v4040_v10  ;;  %v3215_v50 = vadd.f32 %v2035_v40, %v4048_v31 }
 0x738   :  { %v2487_v62 = vmul.f32 -1.442695, %v2038_v23 }
 0x739   :  { %v2488_v47 = vmul.f32 -1.442695, %v2039_v59  ;;  %v2489_v5 = vmul.f32 -1.442695, %v3215_v50 }
 0x73a   :  { %3331 = vpow2.f32 %v2487_v62 }
 0x73b   :  { %3333 = vpow2.f32 %v2488_v47 }
 0x73c   :  { %3335 = vpow2.f32 %v2489_v5 }
 0x73d   :  { %3337 = vtanh.f32 %v3214_v51 }
 0x744   :  { %v3332_v38 = vpop.eup %3331 }
 0x745   :  { %v3334_v8 = vpop.eup %3333  ;;  %v2045_v27 = vadd.f32 1.0, %v3332_v38 }
 0x746   :  { %v2051_v36 = vadd.f32 1.0, %v3334_v8  ;;  %v3336_v13 = vpop.eup %3335 }
 0x747   :  { %3339 = vrcp.f32 %v2045_v27  ;;  %v3338_v7 = vpop.eup %3337  ;;  %v2058_v58 = vadd.f32 1.0, %v3336_v13 }
 0x748   :  { %3341 = vrcp.f32 %v2051_v36 }
 0x749   :  { %3343 = vrcp.f32 %v2058_v58 }
 0x751   :  { %v3340_v10 = vpop.eup %3339 }
 0x752   :  { %v3342_v57 = vpop.eup %3341  ;;  %v2062_v55 = vmul.f32 %v3340_v10, %v3338_v7 }
 0x753   :  { %v2061_v22 = vmul.f32 %v3342_v57, %v4666_v54  ;;  %v3344_v44 = vpop.eup %3343  ;;  %v3166_v54 = vpack.c.bf16 %v2331_v0, %v2330_v52 }
 0x755   :  { %v4721_v29 = vadd.f32 %v2062_v55, %v2061_v22 }
 0x757   :  { %3345 = vtanh.f32 %v4721_v29 }
 0x761   :  { %v3346_v15 = vpop.eup %3345 }
 0x762   :  { %v2065_v37 = vmul.f32 %v3346_v15, %v3344_v44 }
 0x764   :  { %2200 = vmatmul.mubr.f32.vlgmr.msra.gmra.mrb[14].mxu0 %v2065_v37  ;;  %2271 = vmatmul.mubr.f32.vlgmr.msra.gmra.mrb[30].mxu1 %v2065_v37 }
 0x765   :  { %3141 = vmatpush3.bf16.msra.mxu0 %v3138_v19  ;;  %2550 = vmatprep.mubr.f32.mxu0 %v4058_v60  ;;  %v2325_v60 = vld [vmem:[%s4816_s6 + $0x48] sm:$0xff] }
 0x766   :  { %3143 = vmatprep.subr.bf16.mxu0 %v3142_v20  ;;  %v3154_v30 = vpack.c.bf16 %v2325_v60, %v2324_v41 }
 0x769   :  { %3145 = vmatpush3.bf16.msra.mxu0 %v3142_v20 }
 0x76a   :  { %3147 = vmatprep.subr.bf16.mxu0 %v3146_v1 }
 0x76d   :  { %3149 = vmatpush3.bf16.msra.mxu0 %v3146_v1 }
 0x76e   :  { %3151 = vmatprep.subr.bf16.mxu0 %v3150_v18 }
 0x771   :  { %3153 = vmatpush3.bf16.msra.mxu0 %v3150_v18 }
 0x772   :  { %3155 = vmatprep.subr.bf16.mxu0 %v3154_v30 }
 0x775   :  { %3157 = vmatpush3.bf16.msra.mxu0 %v3154_v30 }
 0x776   :  { %3159 = vmatprep.subr.bf16.mxu0 %v3158_v25 }
 0x779   :  { %3161 = vmatpush3.bf16.msra.mxu0 %v3158_v25 }
 0x77a   :  { %3163 = vmatprep.subr.bf16.mxu0 %v3162_v48 }
 0x77d   :  { %3165 = vmatpush3.bf16.msra.mxu0 %v3162_v48 }
 0x77e   :  { %3167 = vmatprep.subr.bf16.mxu0 %v3166_v54 }
 0x781   :  { %3169 = vmatpush3.bf16.msra.mxu0 %v3166_v54 }
 0x784   :  { %2551 = vmatmul.mubr.f32.vlgmr.msra.gmra.mrb[16].mxu0 %v4233_v35 }
 0x785   :  { %2553 = vmatprep.mubr.f32.mxu0 %v4286_v2 }
 0x788   :  { %2554 = vmatmul.mubr.f32.gmra.mrb[18].mxu0 %v4453_v21 }
 0x789   :  { %2556 = vmatprep.mubr.f32.mxu0 %v4498_v49 }
 0x78c   :  { %2557 = vmatmul.mubr.f32.gmra.mrb[20].mxu0 %v4669_v33 }
 0x78d   :  { %2559 = vmatprep.mubr.f32.mxu0 %v2065_v37 }
 0x837   :  { %v2201_v17 = vpop.f32.mrb[14].mxu0  ;;  %v2272_v39 = vpop.f32.mrb[30].mxu1 }
 0x838   :  { %v2277_v3 = vadd.f32 %v2201_v17, %v4042_v11  ;;  %v2203_v46 = vpop.f32.mrb[15].mxu0  ;;  %v2274_v56 = vpop.f32.mrb[31].mxu1  ;;  %v3216_v21 = vadd.f32 %v2272_v39, %v4046_v28  ;;  %v2493_v28 = vld [vmem:[%s4817_s7] ss:$0 sm:$0xff] }
 0x839   :  { %v2278_v63 = vadd.f32 %v2203_v46, %v4044_v14  ;;  %v3217_v35 = vadd.f32 %v2274_v56, %v4048_v31 }
 0x83a   :  { %v2490_v12 = vmul.f32 -1.442695, %v2277_v3 }
 0x83b   :  { %v2491_v19 = vmul.f32 -1.442695, %v2278_v63  ;;  %v2492_v2 = vmul.f32 -1.442695, %v3217_v35 }
 0x83c   :  { %3347 = vpow2.f32 %v2490_v12 }
 0x83d   :  { %3349 = vpow2.f32 %v2491_v19 }
 0x83e   :  { %3351 = vpow2.f32 %v2492_v2 }
 0x83f   :  { %3353 = vtanh.f32 %v3216_v21 }
 0x846   :  { %v3348_v49 = vpop.eup %3347 }
 0x847   :  { %v3350_v33 = vpop.eup %3349  ;;  %v2284_v24 = vadd.f32 1.0, %v3348_v49 }
 0x848   :  { %v2290_v32 = vadd.f32 1.0, %v3350_v33  ;;  %v3352_v11 = vpop.eup %3351 }
 0x849   :  { %3355 = vrcp.f32 %v2284_v24  ;;  %v3354_v23 = vpop.eup %3353  ;;  %v2297_v59 = vadd.f32 1.0, %v3352_v11 }
 0x84a   :  { %3357 = vrcp.f32 %v2290_v32 }
 0x84b   :  { %3359 = vrcp.f32 %v2297_v59 }
 0x853   :  { %v3356_v14 = vpop.eup %3355 }
 0x854   :  { %v3358_v34 = vpop.eup %3357  ;;  %v2301_v40 = vmul.f32 %v3356_v14, %v3354_v23 }
 0x855   :  { %v2300_v62 = vmul.f32 %v3358_v34, %v4721_v29  ;;  %v3360_v55 = vpop.eup %3359 }
 0x857   :  { %v2552_v31 = vpop.f32.mrb[16].mxu0  ;;  %v2302_v47 = vadd.f32 %v2301_v40, %v2300_v62 }
 0x858   :  { %v2411_v50 = vadd.f32 %v2552_v31, %v2493_v28  ;;  %v2405_v5 = vpop.f32.mrb[17].mxu0 }
 0x859   :  { %v2406_v51 = vadd.f32 %v2493_v28, %v2405_v5  ;;  %3361 = vtanh.f32 %v2302_v47  ;;  %2456 = vst [vmem:[%s4818_s10] sm:$0xff] %v2302_v47 }
 0x85a   :  { %2445 = vst [vmem:[%s4819_s8 + $0x8] sm:$0xff] %v2411_v50 }
 0x85b   :  { %2444 = vst [vmem:[%s4819_s8] sm:$0xff] %v2406_v51  ;;  %v2555_v38 = vpop.f32.mrb[18].mxu0 }
 0x85c   :  { %v2421_v8 = vadd.f32 %v2555_v38, %v2493_v28  ;;  %v2415_v27 = vpop.f32.mrb[19].mxu0 }
 0x85d   :  { %v2416_v36 = vadd.f32 %v2493_v28, %v2415_v27 }
 0x85e   :  { %2447 = vst [vmem:[%s4819_s8 + $0x18] sm:$0xff] %v2421_v8 }
 0x85f   :  { %2446 = vst [vmem:[%s4819_s8 + $0x10] sm:$0xff] %v2416_v36  ;;  %v2558_v13 = vpop.f32.mrb[20].mxu0 }
 0x860   :  { %v2431_v7 = vadd.f32 %v2558_v13, %v2493_v28  ;;  %v2425_v10 = vpop.f32.mrb[21].mxu0 }
 0x861   :  { %v2426_v57 = vadd.f32 %v2493_v28, %v2425_v10 }
 0x862   :  { %2449 = vst [vmem:[%s4819_s8 + $0x28] sm:$0xff] %v2431_v7 }
 0x863   :  { %v3362_v58 = vpop.eup %3361  ;;  %2448 = vst [vmem:[%s4819_s8 + $0x20] sm:$0xff] %v2426_v57 }
 0x864   :  { %v2304_v22 = vmul.f32 %v3362_v58, %v3360_v55 }
 0x866   :  { %2560 = vmatmul.mubr.f32.gmra.mrb[22].mxu0 %v2304_v22  ;;  %2455 = vst [vmem:[%s4820_s9] sm:$0xff] %v2304_v22 }
 0x939   :  { %v2561_v29 = vpop.f32.mrb[22].mxu0 }
 0x93a   :  { %v2441_v6 = vadd.f32 %v2561_v29, %v2493_v28  ;;  %v2435_v16 = vpop.f32.mrb[23].mxu0 }
 0x93b   :  { %v2436_v44 = vadd.f32 %v2493_v28, %v2435_v16 }
 0x93c   :  { %2451 = vst [vmem:[%s4819_s8 + $0x38] sm:$0xff] %v2441_v6 }
 0x93d   :  { %2450 = vst [vmem:[%s4819_s8 + $0x30] sm:$0xff] %v2436_v44 }

// kernel: char_rnn_forward.2
= control target key start
LH: loop header
LB: loop body
LE: loop exit
PB: predicated region body
PF: predicated region fallthrough
CT: control target
= control target key end

     0   :  { %v3126_v3 = vmov 0.0   ;;  %s4351_s1 = inlined_call_operand.vmem [shape: f32[128,512], index: 1, kind: input, shape index: {}]   ;;  %s4352_s2 = inlined_call_operand.vmem [shape: f32[128,512], index: 2, kind: input, shape index: {}]   ;;  %s4353_s0 = inlined_call_operand.vmem [shape: f32[8,8,128], index: 0, kind: input, shape index: {}]   ;;  %s4354_s4 = inlined_call_operand.vmem [shape: f32[8,128], index: 4, kind: input, shape index: {}]   ;;  %s4355_s3 = inlined_call_operand.vmem [shape: f32[1,512], index: 3, kind: input, shape index: {}]   ;;  %s4356_s5 = inlined_call_operand.vmem [shape: f32[8,128], index: 5, kind: input, shape index: {}]   ;;  %s4357_s6 = inlined_call_operand.vmem [shape: f32[8,8,128], index: 6, kind: output, shape index: {0}]   ;;  %s4358_s8 = inlined_call_operand.vmem [shape: f32[8,128], index: 8, kind: output, shape index: {2}]   ;;  %s4359_s7 = inlined_call_operand.vmem [shape: f32[8,128], index: 7, kind: output, shape index: {1}]  }
   0x1   :  { %v43_v0 = vld [vmem:[%s4351_s1 + $0x8] sm:$0xff]  ;;  %v45_v2 = vld [vmem:[%s4351_s1 + $0x18] sm:$0xff]  ;;  %192 = vmatprep.mubr.f32.mxu0 %v3126_v3  ;;  %305 = vmatprep.mubr.f32.mxu1 %v3126_v3  ;;  %v42_v6 = vld [vmem:[%s4351_s1] sm:$0xff] }
   0x2   :  { %v47_v1 = vld [vmem:[%s4351_s1 + $0x28] sm:$0xff]  ;;  %v49_v5 = vld [vmem:[%s4351_s1 + $0x38] sm:$0xff]  ;;  %v46_v7 = vld [vmem:[%s4351_s1 + $0x20] sm:$0xff] }
   0x3   :  { %v2357_v4 = vpack.c.bf16 %v47_v1, %v43_v0  ;;  %v2389_v8 = vpack.c.bf16 %v49_v5, %v45_v2  ;;  %v2359_v9 = vpack.c.bf16 %v46_v7, %v42_v6  ;;  %v44_v10 = vld [vmem:[%s4351_s1 + $0x10] sm:$0xff]  ;;  %v51_v12 = vld [vmem:[%s4351_s1 + $0x48] sm:$0xff]  ;;  %v53_v15 = vld [vmem:[%s4351_s1 + $0x58] sm:$0xff] }
   0x4   :  { %v48_v11 = vld [vmem:[%s4351_s1 + $0x30] sm:$0xff]  ;;  %v55_v14 = vld [vmem:[%s4351_s1 + $0x68] sm:$0xff]  ;;  %v57_v16 = vld [vmem:[%s4351_s1 + $0x78] sm:$0xff] }
   0x5   :  { %2358 = vmatprep.subr.bf16.mxu0 %v2357_v4  ;;  %v2391_v13 = vpack.c.bf16 %v48_v11, %v44_v10  ;;  %2390 = vmatprep.subr.bf16.mxu1 %v2389_v8  ;;  %v2361_v17 = vpack.c.bf16 %v55_v14, %v51_v12  ;;  %v2393_v18 = vpack.c.bf16 %v57_v16, %v53_v15  ;;  %v50_v19 = vld [vmem:[%s4351_s1 + $0x40] sm:$0xff]  ;;  %v52_v21 = vld [vmem:[%s4351_s1 + $0x50] sm:$0xff]  ;;  %v59_v24 = vld [vmem:[%s4351_s1 + $0x88] sm:$0xff] }
   0x6   :  { %2360 = vmatpush1.bf16.msra.mxu0 %v2359_v9  ;;  %v54_v20 = vld [vmem:[%s4351_s1 + $0x60] sm:$0xff]  ;;  %v56_v23 = vld [vmem:[%s4351_s1 + $0x70] sm:$0xff]  ;;  %v63_v25 = vld [vmem:[%s4351_s1 + $0xa8] sm:$0xff] }
   0x7   :  { %2392 = vmatpush1.bf16.msra.mxu1 %v2391_v13  ;;  %v2363_v22 = vpack.c.bf16 %v54_v20, %v50_v19  ;;  %2362 = vmatprep.subr.bf16.mxu0 %v2361_v17  ;;  %v2395_v26 = vpack.c.bf16 %v56_v23, %v52_v21  ;;  %v2365_v27 = vpack.c.bf16 %v63_v25, %v59_v24  ;;  %v61_v28 = vld [vmem:[%s4351_s1 + $0x98] sm:$0xff]  ;;  %v58_v30 = vld [vmem:[%s4351_s1 + $0x80] sm:$0xff]  ;;  %v60_v33 = vld [vmem:[%s4351_s1 + $0x90] sm:$0xff] }
   0x8   :  { %2394 = vmatprep.subr.bf16.mxu1 %v2393_v18  ;;  %v65_v29 = vld [vmem:[%s4351_s1 + $0xb8] sm:$0xff]  ;;  %v62_v32 = vld [vmem:[%s4351_s1 + $0xa0] sm:$0xff]  ;;  %v64_v34 = vld [vmem:[%s4351_s1 + $0xb0] sm:$0xff] }
   0x9   :  { %v2397_v31 = vpack.c.bf16 %v65_v29, %v61_v28  ;;  %v2367_v35 = vpack.c.bf16 %v62_v32, %v58_v30  ;;  %v67_v36 = vld [vmem:[%s4351_s1 + $0xc8] sm:$0xff]  ;;  %v69_v38 = vld [vmem:[%s4351_s1 + $0xd8] sm:$0xff]  ;;  %v2399_v39 = vpack.c.bf16 %v64_v34, %v60_v33  ;;  %v66_v42 = vld [vmem:[%s4351_s1 + $0xc0] sm:$0xff] }
   0xa   :  { %2364 = vmatpush1.bf16.msra.mxu0 %v2363_v22  ;;  %v71_v37 = vld [vmem:[%s4351_s1 + $0xe8] sm:$0xff]  ;;  %v73_v41 = vld [vmem:[%s4351_s1 + $0xf8] sm:$0xff]  ;;  %v70_v43 = vld [vmem:[%s4351_s1 + $0xe0] sm:$0xff] }
   0xb   :  { %2396 = vmatpush1.bf16.msra.mxu1 %v2395_v26  ;;  %2366 = vmatprep.subr.bf16.mxu0 %v2365_v27  ;;  %v2369_v40 = vpack.c.bf16 %v71_v37, %v67_v36  ;;  %v2401_v44 = vpack.c.bf16 %v73_v41, %v69_v38  ;;  %v68_v45 = vld [vmem:[%s4351_s1 + $0xd0] sm:$0xff]  ;;  %v75_v47 = vld [vmem:[%s4351_s1 + $0x108] sm:$0xff]  ;;  %v77_v49 = vld [vmem:[%s4351_s1 + $0x118] sm:$0xff]  ;;  %v2371_v51 = vpack.c.bf16 %v70_v43, %v66_v42 }
   0xc   :  { %2398 = vmatprep.subr.bf16.mxu1 %v2397_v31  ;;  %v72_v46 = vld [vmem:[%s4351_s1 + $0xf0] sm:$0xff]  ;;  %v79_v48 = vld [vmem:[%s4351_s1 + $0x128] sm:$0xff]  ;;  %v81_v50 = vld [vmem:[%s4351_s1 + $0x138] sm:$0xff] }
   0xd   :  { %v2403_v52 = vpack.c.bf16 %v72_v46, %v68_v45  ;;  %v2373_v53 = vpack.c.bf16 %v79_v48, %v75_v47  ;;  %v74_v54 = vld [vmem:[%s4351_s1 + $0x100] sm:$0xff]  ;;  %v76_v56 = vld [vmem:[%s4351_s1 + $0x110] sm:$0xff]  ;;  %v2405_v57 = vpack.c.bf16 %v81_v50, %v77_v49  ;;  %v83_v59 = vld [vmem:[%s4351_s1 + $0x148] sm:$0xff] }
   0xe   :  { %2368 = vmatpush1.bf16.msra.mxu0 %v2367_v35  ;;  %v78_v55 = vld [vmem:[%s4351_s1 + $0x120] sm:$0xff]  ;;  %v80_v58 = vld [vmem:[%s4351_s1 + $0x130] sm:$0xff]  ;;  %v87_v60 = vld [vmem:[%s4351_s1 + $0x168] sm:$0xff] }
   0xf   :  { %2400 = vmatpush1.bf16.msra.mxu1 %v2399_v39  ;;  %2370 = vmatprep.subr.bf16.mxu0 %v2369_v40  ;;  %v85_v61 = vld [vmem:[%s4351_s1 + $0x158] sm:$0xff]  ;;  %v2375_v63 = vpack.c.bf16 %v78_v55, %v74_v54  ;;  %v2407_v0 = vpack.c.bf16 %v80_v58, %v76_v56  ;;  %v2377_v1 = vpack.c.bf16 %v87_v60, %v83_v59  ;;  %v82_v2 = vld [vmem:[%s4351_s1 + $0x140] sm:$0xff]  ;;  %v84_v5 = vld [vmem:[%s4351_s1 + $0x150] sm:$0xff] }
  0x10   :  { %2402 = vmatprep.subr.bf16.mxu1 %v2401_v44  ;;  %v89_v62 = vld [vmem:[%s4351_s1 + $0x178] sm:$0xff]  ;;  %v86_v4 = vld [vmem:[%s4351_s1 + $0x160] sm:$0xff]  ;;  %v88_v7 = vld [vmem:[%s4351_s1 + $0x170] sm:$0xff] }
  0x11   :  { %v2409_v6 = vpack.c.bf16 %v89_v62, %v85_v61  ;;  %v91_v8 = vld [vmem:[%s4351_s1 + $0x188] sm:$0xff]  ;;  %v93_v10 = vld [vmem:[%s4351_s1 + $0x198] sm:$0xff]  ;;  %v2379_v12 = vpack.c.bf16 %v86_v4, %v82_v2  ;;  %v2411_v13 = vpack.c.bf16 %v88_v7, %v84_v5  ;;  %v90_v15 = vld [vmem:[%s4351_s1 + $0x180] sm:$0xff] }
  0x12   :  { %2372 = vmatpush1.bf16.msra.mxu0 %v2371_v51  ;;  %v95_v9 = vld [vmem:[%s4351_s1 + $0x1a8] sm:$0xff]  ;;  %v97_v11 = vld [vmem:[%s4351_s1 + $0x1b8] sm:$0xff]  ;;  %v94_v16 = vld [vmem:[%s4351_s1 + $0x1a0] sm:$0xff] }
  0x13   :  { %2404 = vmatpush1.bf16.msra.mxu1 %v2403_v52  ;;  %2374 = vmatprep.subr.bf16.mxu0 %v2373_v53  ;;  %v2381_v14 = vpack.c.bf16 %v95_v9, %v91_v8  ;;  %v92_v17 = vld [vmem:[%s4351_s1 + $0x190] sm:$0xff]  ;;  %v2413_v18 = vpack.c.bf16 %v97_v11, %v93_v10  ;;  %v99_v20 = vld [vmem:[%s4351_s1 + $0x1c8] sm:$0xff]  ;;  %v101_v22 = vld [vmem:[%s4351_s1 + $0x1d8] sm:$0xff]  ;;  %v2383_v24 = vpack.c.bf16 %v94_v16, %v90_v15 }
  0x14   :  { %2406 = vmatprep.subr.bf16.mxu1 %v2405_v57  ;;  %v96_v19 = vld [vmem:[%s4351_s1 + $0x1b0] sm:$0xff]  ;;  %v103_v21 = vld [vmem:[%s4351_s1 + $0x1e8] sm:$0xff]  ;;  %v105_v23 = vld [vmem:[%s4351_s1 + $0x1f8] sm:$0xff] }
  0x15   :  { %v2415_v25 = vpack.c.bf16 %v96_v19, %v92_v17  ;;  %v2385_v26 = vpack.c.bf16 %v103_v21, %v99_v20  ;;  %v98_v27 = vld [vmem:[%s4351_s1 + $0x1c0] sm:$0xff]  ;;  %v100_v29 = vld [vmem:[%s4351_s1 + $0x1d0] sm:$0xff]  ;;  %v2417_v30 = vpack.c.bf16 %v105_v23, %v101_v22  ;;  %v393_v32 = vld [vmem:[%s4352_s2 + $0x8] sm:$0xff] }
  0x16   :  { %2376 = vmatpush1.bf16.msra.mxu0 %v2375_v63  ;;  %v102_v28 = vld [vmem:[%s4351_s1 + $0x1e0] sm:$0xff]  ;;  %v104_v31 = vld [vmem:[%s4351_s1 + $0x1f0] sm:$0xff]  ;;  %v397_v33 = vld [vmem:[%s4352_s2 + $0x28] sm:$0xff] }
  0x17   :  { %2408 = vmatpush1.bf16.msra.mxu1 %v2407_v0  ;;  %2378 = vmatprep.subr.bf16.mxu0 %v2377_v1  ;;  %v395_v34 = vld [vmem:[%s4352_s2 + $0x18] sm:$0xff]  ;;  %v2387_v36 = vpack.c.bf16 %v102_v28, %v98_v27  ;;  %v2419_v37 = vpack.c.bf16 %v104_v31, %v100_v29  ;;  %v3378_v38 = vpack.c.bf16 %v397_v33, %v393_v32  ;;  %v392_v39 = vld [vmem:[%s4352_s2] sm:$0xff]  ;;  %v394_v42 = vld [vmem:[%s4352_s2 + $0x10] sm:$0xff] }
  0x18   :  { %2410 = vmatprep.subr.bf16.mxu1 %v2409_v6  ;;  %v399_v35 = vld [vmem:[%s4352_s2 + $0x38] sm:$0xff]  ;;  %v396_v40 = vld [vmem:[%s4352_s2 + $0x20] sm:$0xff]  ;;  %v398_v43 = vld [vmem:[%s4352_s2 + $0x30] sm:$0xff] }
  0x19   :  { %v3386_v41 = vpack.c.bf16 %v399_v35, %v395_v34  ;;  %v401_v44 = vld [vmem:[%s4352_s2 + $0x48] sm:$0xff]  ;;  %v34_v46 = vld [vmem:[%s4353_s0] sm:$0xff]  ;;  %v3403_v47 = vpack.c.bf16 %v396_v40, %v392_v39  ;;  %v403_v48 = vld [vmem:[%s4352_s2 + $0x58] sm:$0xff]  ;;  %v3412_v50 = vpack.c.bf16 %v398_v43, %v394_v42 }
  0x1a   :  { %2380 = vmatpush1.bf16.msra.mxu0 %v2379_v12  ;;  %v405_v45 = vld [vmem:[%s4352_s2 + $0x68] sm:$0xff]  ;;  %v407_v49 = vld [vmem:[%s4352_s2 + $0x78] sm:$0xff]  ;;  %v400_v51 = vld [vmem:[%s4352_s2 + $0x40] sm:$0xff] }
  0x1b   :  { %2412 = vmatpush1.bf16.msra.mxu1 %v2411_v13  ;;  %2382 = vmatprep.subr.bf16.mxu0 %v2381_v14  ;;  %v404_v52 = vld [vmem:[%s4352_s2 + $0x60] sm:$0xff]  ;;  %v3421_v53 = vpack.c.bf16 %v405_v45, %v401_v44  ;;  %v402_v54 = vld [vmem:[%s4352_s2 + $0x50] sm:$0xff]  ;;  %v3429_v56 = vpack.c.bf16 %v407_v49, %v403_v48  ;;  %v409_v57 = vld [vmem:[%s4352_s2 + $0x88] sm:$0xff] }
  0x1c   :  { %2414 = vmatprep.subr.bf16.mxu1 %v2413_v18  ;;  %v406_v55 = vld [vmem:[%s4352_s2 + $0x70] sm:$0xff]  ;;  %v413_v58 = vld [vmem:[%s4352_s2 + $0xa8] sm:$0xff]  ;;  %v3441_v60 = vpack.c.bf16 %v404_v52, %v400_v51  ;;  %v411_v61 = vld [vmem:[%s4352_s2 + $0x98] sm:$0xff] }
  0x1d   :  { %v35_v59 = vld [vmem:[%s4353_s0 + $0x8] sm:$0xff]  ;;  %v415_v62 = vld [vmem:[%s4352_s2 + $0xb8] sm:$0xff]  ;;  %v3451_v63 = vpack.c.bf16 %v406_v55, %v402_v54  ;;  %v408_v0 = vld [vmem:[%s4352_s2 + $0x80] sm:$0xff]  ;;  %v3461_v2 = vpack.c.bf16 %v413_v58, %v409_v57 }
  0x1e   :  { %2384 = vmatpush1.bf16.msra.mxu0 %v2383_v24  ;;  %v412_v1 = vld [vmem:[%s4352_s2 + $0xa0] sm:$0xff]  ;;  %v410_v4 = vld [vmem:[%s4352_s2 + $0x90] sm:$0xff]  ;;  %v3470_v6 = vpack.c.bf16 %v415_v62, %v411_v61  ;;  %v417_v7 = vld [vmem:[%s4352_s2 + $0xc8] sm:$0xff] }
  0x1f   :  { %2416 = vmatpush1.bf16.msra.mxu1 %v2415_v25  ;;  %2386 = vmatprep.subr.bf16.mxu0 %v2385_v26  ;;  %v414_v5 = vld [vmem:[%s4352_s2 + $0xb0] sm:$0xff]  ;;  %v421_v8 = vld [vmem:[%s4352_s2 + $0xe8] sm:$0xff]  ;;  %v3482_v10 = vpack.c.bf16 %v412_v1, %v408_v0  ;;  %v419_v11 = vld [vmem:[%s4352_s2 + $0xd8] sm:$0xff] }
  0x20   :  { %2418 = vmatprep.subr.bf16.mxu1 %v2417_v30  ;;  %v36_v9 = vld [vmem:[%s4353_s0 + $0x10] sm:$0xff]  ;;  %v423_v12 = vld [vmem:[%s4352_s2 + $0xf8] sm:$0xff]  ;;  %v3492_v13 = vpack.c.bf16 %v414_v5, %v410_v4  ;;  %v416_v14 = vld [vmem:[%s4352_s2 + $0xc0] sm:$0xff]  ;;  %v3502_v16 = vpack.c.bf16 %v421_v8, %v417_v7 }
  0x21   :  { %v420_v15 = vld [vmem:[%s4352_s2 + $0xe0] sm:$0xff]  ;;  %v418_v17 = vld [vmem:[%s4352_s2 + $0xd0] sm:$0xff]  ;;  %v3511_v19 = vpack.c.bf16 %v423_v12, %v419_v11  ;;  %v425_v20 = vld [vmem:[%s4352_s2 + $0x108] sm:$0xff] }
  0x22   :  { %2388 = vmatpush1.bf16.msra.mxu0 %v2387_v36  ;;  %v422_v18 = vld [vmem:[%s4352_s2 + $0xf0] sm:$0xff]  ;;  %v429_v21 = vld [vmem:[%s4352_s2 + $0x128] sm:$0xff]  ;;  %v37_v22 = vld [vmem:[%s4353_s0 + $0x18] sm:$0xff]  ;;  %v3523_v23 = vpack.c.bf16 %v420_v15, %v416_v14 }
  0x23   :  { %2420 = vmatpush1.bf16.msra.mxu1 %v2419_v37  ;;  %2422 = vmatprep.subr.bf16.mxu0 %v3378_v38  ;;  %v427_v24 = vld [vmem:[%s4352_s2 + $0x118] sm:$0xff]  ;;  %v3533_v26 = vpack.c.bf16 %v422_v18, %v418_v17  ;;  %v424_v27 = vld [vmem:[%s4352_s2 + $0x100] sm:$0xff]  ;;  %v3543_v29 = vpack.c.bf16 %v429_v21, %v425_v20  ;;  %v426_v30 = vld [vmem:[%s4352_s2 + $0x110] sm:$0xff] }
  0x24   :  { %2454 = vmatprep.subr.bf16.mxu1 %v3386_v41  ;;  %v431_v25 = vld [vmem:[%s4352_s2 + $0x138] sm:$0xff]  ;;  %v428_v28 = vld [vmem:[%s4352_s2 + $0x120] sm:$0xff]  ;;  %v430_v31 = vld [vmem:[%s4352_s2 + $0x130] sm:$0xff] }
  0x25   :  { %193 = vmatmul.mubr.f32.vlgmr.msra.gmra.mrb[0].mxu0 %v34_v46  ;;  %v3552_v32 = vpack.c.bf16 %v431_v25, %v427_v24  ;;  %v433_v33 = vld [vmem:[%s4352_s2 + $0x148] sm:$0xff]  ;;  %v38_v35 = vld [vmem:[%s4353_s0 + $0x20] sm:$0xff]  ;;  %v3564_v36 = vpack.c.bf16 %v428_v28, %v424_v27  ;;  %v435_v37 = vld [vmem:[%s4352_s2 + $0x158] sm:$0xff]  ;;  %v3574_v40 = vpack.c.bf16 %v430_v31, %v426_v30  ;;  %v108_v30 = vlaneseq }
  0x26   :  { %306 = vmatmul.mubr.f32.vlgmr.msra.gmra.mrb[0].mxu1 %v34_v46  ;;  %2424 = vmatpush1.bf16.msra.mxu0 %v3403_v47  ;;  %v437_v34 = vld [vmem:[%s4352_s2 + $0x168] sm:$0xff]  ;;  %v439_v39 = vld [vmem:[%s4352_s2 + $0x178] sm:$0xff]  ;;  %v432_v42 = vld [vmem:[%s4352_s2 + $0x140] sm:$0xff] }
  0x27   :  { %2456 = vmatpush1.bf16.msra.mxu1 %v3412_v50  ;;  %198 = vmatprep.mubr.f32.mxu0 %v3126_v3  ;;  %v436_v43 = vld [vmem:[%s4352_s2 + $0x160] sm:$0xff]  ;;  %v3584_v44 = vpack.c.bf16 %v437_v34, %v433_v33  ;;  %v434_v45 = vld [vmem:[%s4352_s2 + $0x150] sm:$0xff]  ;;  %v3593_v48 = vpack.c.bf16 %v439_v39, %v435_v37  ;;  %v441_v49 = vld [vmem:[%s4352_s2 + $0x188] sm:$0xff]  ;;  %v109_v31 = vshrl.u32 %v108_v30, 7 }
  0x28   :  { %311 = vmatprep.mubr.f32.mxu1 %v3126_v3  ;;  %2426 = vmatprep.subr.bf16.mxu0 %v3421_v53  ;;  %v438_v46 = vld [vmem:[%s4352_s2 + $0x170] sm:$0xff]  ;;  %v445_v51 = vld [vmem:[%s4352_s2 + $0x1a8] sm:$0xff]  ;;  %v3605_v54 = vpack.c.bf16 %v436_v43, %v432_v42  ;;  %v443_v55 = vld [vmem:[%s4352_s2 + $0x198] sm:$0xff] }
  0x29   :  { %199 = vmatmul.mubr.f32.gmra.mrb[2].mxu0 %v35_v59  ;;  %2458 = vmatprep.subr.bf16.mxu1 %v3429_v56  ;;  %v39_v52 = vld [vmem:[%s4353_s0 + $0x28] sm:$0xff]  ;;  %v447_v57 = vld [vmem:[%s4352_s2 + $0x1b8] sm:$0xff]  ;;  %v3615_v58 = vpack.c.bf16 %v438_v46, %v434_v45  ;;  %v444_v61 = vld [vmem:[%s4352_s2 + $0x1a0] sm:$0xff]  ;;  %v3625_v62 = vpack.c.bf16 %v445_v51, %v441_v49  ;;  %v110_v33 = vsub.s32 0, %v109_v31  ;;  %v122_v43 = vsub.s32 3, %v109_v31 }
  0x2a   :  { %312 = vmatmul.mubr.f32.gmra.mrb[2].mxu1 %v35_v59  ;;  %2428 = vmatpush1.bf16.msra.mxu0 %v3441_v60  ;;  %v440_v59 = vld [vmem:[%s4352_s2 + $0x180] sm:$0xff]  ;;  %v442_v0 = vld [vmem:[%s4352_s2 + $0x190] sm:$0xff]  ;;  %v3634_v4 = vpack.c.bf16 %v447_v57, %v443_v55  ;;  %v449_v5 = vld [vmem:[%s4352_s2 + $0x1c8] sm:$0xff]  ;;  %v118_v57 = vsub.s32 2, %v109_v31 }
  0x2b   :  { %2460 = vmatpush1.bf16.msra.mxu1 %v3451_v63  ;;  %204 = vmatprep.mubr.f32.mxu0 %v3126_v3  ;;  %v446_v1 = vld [vmem:[%s4352_s2 + $0x1b0] sm:$0xff]  ;;  %v453_v7 = vld [vmem:[%s4352_s2 + $0x1e8] sm:$0xff]  ;;  %v451_v11 = vld [vmem:[%s4352_s2 + $0x1d8] sm:$0xff] }
  0x2c   :  { %317 = vmatprep.mubr.f32.mxu1 %v3126_v3  ;;  %2430 = vmatprep.subr.bf16.mxu0 %v3461_v2  ;;  %v40_v8 = vld [vmem:[%s4353_s0 + $0x30] sm:$0xff]  ;;  %v455_v12 = vld [vmem:[%s4352_s2 + $0x1f8] sm:$0xff]  ;;  %v3656_v14 = vpack.c.bf16 %v446_v1, %v442_v0  ;;  %v448_v15 = vld [vmem:[%s4352_s2 + $0x1c0] sm:$0xff]  ;;  %v3666_v18 = vpack.c.bf16 %v453_v7, %v449_v5 }
  0x2d   :  { %205 = vmatmul.mubr.f32.gmra.mrb[4].mxu0 %v36_v9  ;;  %2462 = vmatprep.subr.bf16.mxu1 %v3470_v6  ;;  %v452_v17 = vld [vmem:[%s4352_s2 + $0x1e0] sm:$0xff]  ;;  %v450_v20 = vld [vmem:[%s4352_s2 + $0x1d0] sm:$0xff]  ;;  %v41_v24 = vld [vmem:[%s4353_s0 + $0x38] sm:$0xff] }
  0x2e   :  { %318 = vmatmul.mubr.f32.gmra.mrb[4].mxu1 %v36_v9  ;;  %2432 = vmatpush1.bf16.msra.mxu0 %v3482_v10  ;;  %v3646_v9 = vpack.c.bf16 %v444_v61, %v440_v59  ;;  %v454_v21 = vld [vmem:[%s4352_s2 + $0x1f0] sm:$0xff]  ;;  %v3681_v25 = vpack.c.bf16 %v452_v17, %v448_v15  ;;  %v30_v28 = vld [vmem:[%s4354_s4] sm:$0xff] }
  0x2f   :  { %2464 = vmatpush1.bf16.msra.mxu1 %v3492_v13  ;;  %210 = vmatprep.mubr.f32.mxu0 %v3126_v3  ;;  %v3685_v27 = vpack.c.bf16 %v454_v21, %v450_v20  ;;  %v106_v34 = vld [vmem:[%s4355_s3] sm:$0xf] }
  0x30   :  { %323 = vmatprep.mubr.f32.mxu1 %v3126_v3  ;;  %2434 = vmatprep.subr.bf16.mxu0 %v3502_v16  ;;  %v3736_v37 = vrot.slane %v106_v34, %v110_v33  ;;  %v3742_v55 = vrot.slane %v106_v34, %v122_v43  ;;  %v3745_v61 = vrot.slane %v106_v34, %v118_v57  ;;  %v32_v17 = vld [vmem:[%s4356_s5] sm:$0xff] }
  0x31   :  { %211 = vmatmul.mubr.f32.gmra.mrb[6].mxu0 %v37_v22  ;;  %2466 = vmatprep.subr.bf16.mxu1 %v3511_v19 }
  0x32   :  { %324 = vmatmul.mubr.f32.gmra.mrb[6].mxu1 %v37_v22  ;;  %2436 = vmatpush1.bf16.msra.mxu0 %v3523_v23  ;;  %v3675_v22 = vpack.c.bf16 %v455_v12, %v451_v11 }
  0x33   :  { %2468 = vmatpush1.bf16.msra.mxu1 %v3533_v26  ;;  %216 = vmatprep.mubr.f32.mxu0 %v3126_v3 }
  0x34   :  { %329 = vmatprep.mubr.f32.mxu1 %v3126_v3  ;;  %2438 = vmatprep.subr.bf16.mxu0 %v3543_v29 }
  0x35   :  { %217 = vmatmul.mubr.f32.gmra.mrb[8].mxu0 %v38_v35  ;;  %2470 = vmatprep.subr.bf16.mxu1 %v3552_v32 }
  0x36   :  { %330 = vmatmul.mubr.f32.gmra.mrb[8].mxu1 %v38_v35  ;;  %2440 = vmatpush1.bf16.msra.mxu0 %v3564_v36  ;;  %v114_v35 = vsub.s32 1, %v109_v31 }
  0x37   :  { %2472 = vmatpush1.bf16.msra.mxu1 %v3574_v40  ;;  %222 = vmatprep.mubr.f32.mxu0 %v3126_v3 }
  0x38   :  { %335 = vmatprep.mubr.f32.mxu1 %v3126_v3  ;;  %2442 = vmatprep.subr.bf16.mxu0 %v3584_v44  ;;  %v3738_v39 = vrot.slane %v106_v34, %v114_v35 }
  0x39   :  { %223 = vmatmul.mubr.f32.gmra.mrb[10].mxu0 %v39_v52  ;;  %2474 = vmatprep.subr.bf16.mxu1 %v3593_v48 }
  0x3a   :  { %336 = vmatmul.mubr.f32.gmra.mrb[10].mxu1 %v39_v52  ;;  %2444 = vmatpush1.bf16.msra.mxu0 %v3605_v54 }
  0x3b   :  { %2476 = vmatpush1.bf16.msra.mxu1 %v3615_v58  ;;  %228 = vmatprep.mubr.f32.mxu0 %v3126_v3 }
  0x3c   :  { %341 = vmatprep.mubr.f32.mxu1 %v3126_v3  ;;  %2446 = vmatprep.subr.bf16.mxu0 %v3625_v62 }
  0x3d   :  { %229 = vmatmul.mubr.f32.gmra.mrb[12].mxu0 %v40_v8  ;;  %2478 = vmatprep.subr.bf16.mxu1 %v3634_v4 }
  0x3e   :  { %342 = vmatmul.mubr.f32.gmra.mrb[12].mxu1 %v40_v8  ;;  %2448 = vmatpush1.bf16.msra.mxu0 %v3646_v9 }
  0x3f   :  { %2480 = vmatpush1.bf16.msra.mxu1 %v3656_v14  ;;  %234 = vmatprep.mubr.f32.mxu0 %v3126_v3 }
  0x40   :  { %347 = vmatprep.mubr.f32.mxu1 %v3126_v3  ;;  %2450 = vmatprep.subr.bf16.mxu0 %v3666_v18 }
  0x41   :  { %235 = vmatmul.mubr.f32.gmra.mrb[14].mxu0 %v41_v24  ;;  %2482 = vmatprep.subr.bf16.mxu1 %v3675_v22 }
  0x42   :  { %348 = vmatmul.mubr.f32.gmra.mrb[14].mxu1 %v41_v24  ;;  %2452 = vmatpush1.bf16.msra.mxu0 %v3681_v25 }
  0x43   :  { %2484 = vmatpush1.bf16.msra.mxu1 %v3685_v27  ;;  %520 = vmatprep.mubr.f32.mxu0 %v3126_v3 }
  0x44   :  { %591 = vmatprep.mubr.f32.mxu1 %v3126_v3  ;;  %2486 = vmatprep.subr.bf16.mxu0 %v3378_v38 }
  0x45   :  { %521 = vmatmul.mubr.f32.vlgmr.msra.gmra.mrb[0].mxu0 %v30_v28  ;;  %2518 = vmatprep.subr.bf16.mxu1 %v3386_v41 }
  0x46   :  { %592 = vmatmul.mubr.f32.vlgmr.msra.gmra.mrb[0].mxu1 %v30_v28  ;;  %2488 = vmatpush1.bf16.msra.mxu0 %v3403_v47 }
  0x47   :  { %2520 = vmatpush1.bf16.msra.mxu1 %v3412_v50  ;;  %2490 = vmatprep.subr.bf16.mxu0 %v3421_v53 }
  0x48   :  { %2522 = vmatprep.subr.bf16.mxu1 %v3429_v56  ;;  %759 = vmatprep.mubr.f32.mxu0 %v3126_v3 }
  0x49   :  { %830 = vmatprep.mubr.f32.mxu1 %v3126_v3 }
  0x4a   :  { %2492 = vmatpush1.bf16.msra.mxu0 %v3441_v60 }
  0x4b   :  { %2524 = vmatpush1.bf16.msra.mxu1 %v3451_v63  ;;  %2494 = vmatprep.subr.bf16.mxu0 %v3461_v2 }
  0x4c   :  { %2526 = vmatprep.subr.bf16.mxu1 %v3470_v6 }
  0x4e   :  { %2496 = vmatpush1.bf16.msra.mxu0 %v3482_v10 }
  0x4f   :  { %2528 = vmatpush1.bf16.msra.mxu1 %v3492_v13  ;;  %2498 = vmatprep.subr.bf16.mxu0 %v3502_v16 }
  0x50   :  { %2530 = vmatprep.subr.bf16.mxu1 %v3511_v19 }
  0x52   :  { %2500 = vmatpush1.bf16.msra.mxu0 %v3523_v23 }
  0x53   :  { %2532 = vmatpush1.bf16.msra.mxu1 %v3533_v26  ;;  %2502 = vmatprep.subr.bf16.mxu0 %v3543_v29 }
  0x54   :  { %2534 = vmatprep.subr.bf16.mxu1 %v3552_v32 }
  0x56   :  { %2504 = vmatpush1.bf16.msra.mxu0 %v3564_v36 }
  0x57   :  { %2536 = vmatpush1.bf16.msra.mxu1 %v3574_v40  ;;  %2506 = vmatprep.subr.bf16.mxu0 %v3584_v44 }
  0x58   :  { %2538 = vmatprep.subr.bf16.mxu1 %v3593_v48 }
  0x5a   :  { %2508 = vmatpush1.bf16.msra.mxu0 %v3605_v54 }
  0x5b   :  { %2540 = vmatpush1.bf16.msra.mxu1 %v3615_v58  ;;  %2510 = vmatprep.subr.bf16.mxu0 %v3625_v62 }
  0x5c   :  { %2542 = vmatprep.subr.bf16.mxu1 %v3634_v4 }
  0x5e   :  { %2512 = vmatpush1.bf16.msra.mxu0 %v3646_v9 }
  0x5f   :  { %2544 = vmatpush1.bf16.msra.mxu1 %v3656_v14  ;;  %2514 = vmatprep.subr.bf16.mxu0 %v3666_v18 }
  0x60   :  { %2546 = vmatprep.subr.bf16.mxu1 %v3675_v22 }
  0x62   :  { %2516 = vmatpush1.bf16.msra.mxu0 %v3681_v25 }
  0x63   :  { %2548 = vmatpush1.bf16.msra.mxu1 %v3685_v27  ;;  %2550 = vmatprep.subr.bf16.mxu0 %v3378_v38 }
  0x64   :  { %2582 = vmatprep.subr.bf16.mxu1 %v3386_v41 }
 0x118   :  { %v522_v42 = vpop.f32.mrb[0].mxu0 }
 0x119   :  { %v2933_v45 = vadd.f32 %v522_v42, %v3736_v37  ;;  %v593_v46 = vpop.f32.mrb[0].mxu1  ;;  %v524_v38 = vpop.f32.mrb[1].mxu0 }
 0x11a   :  { %v2934_v41 = vadd.f32 %v524_v38, %v3738_v39  ;;  %v595_v49 = vpop.f32.mrb[1].mxu1  ;;  %v2949_v1 = vadd.f32 %v593_v46, %v3745_v61 }
 0x11b   :  { %v2326_v51 = vmul.f32 -1.442695, %v2933_v45  ;;  %v2950_v59 = vadd.f32 %v595_v49, %v3742_v55 }
 0x11c   :  { %v2327_v52 = vmul.f32 -1.442695, %v2934_v41 }
 0x11d   :  { %2998 = vpow2.f32 %v2326_v51  ;;  %v2328_v0 = vmul.f32 -1.442695, %v2950_v59 }
 0x11e   :  { %3000 = vpow2.f32 %v2327_v52 }
 0x11f   :  { %3002 = vpow2.f32 %v2328_v0 }
 0x120   :  { %3004 = vtanh.f32 %v2949_v1 }
 0x127   :  { %v2999_v5 = vpop.eup %2998 }
 0x128   :  { %v3001_v7 = vpop.eup %3000  ;;  %v605_v8 = vadd.f32 1.0, %v2999_v5 }
 0x129   :  { %v611_v11 = vadd.f32 1.0, %v3001_v7  ;;  %v3003_v12 = vpop.eup %3002 }
 0x12a   :  { %3006 = vrcp.f32 %v605_v8  ;;  %v3005_v15 = vpop.eup %3004  ;;  %v618_v28 = vadd.f32 1.0, %v3003_v12  ;;  %v1116_v12 = vld [vmem:[%s4352_s2 + $0x28] sm:$0xff] }
 0x12b   :  { %3008 = vrcp.f32 %v611_v11  ;;  %v1112_v11 = vld [vmem:[%s4352_s2 + $0x8] sm:$0xff] }
 0x12c   :  { %3010 = vrcp.f32 %v618_v28 }
 0x134   :  { %v3007_v20 = vpop.eup %3006 }
 0x135   :  { %v3009_v21 = vpop.eup %3008  ;;  %v622_v24 = vmul.f32 %v3007_v20, %v3005_v15  ;;  %v1114_v15 = vld [vmem:[%s4352_s2 + $0x18] sm:$0xff] }
 0x136   :  { %v621_v30 = vmul.f32 %v3009_v21, %v32_v17  ;;  %v3011_v33 = vpop.eup %3010  ;;  %v3811_v17 = vpack.c.bf16 %v1116_v12, %v1112_v11  ;;  %v1118_v20 = vld [vmem:[%s4352_s2 + $0x38] sm:$0xff]  ;;  %v1111_v21 = vld [vmem:[%s4352_s2] sm:$0xff] }
 0x137   :  { %v3822_v28 = vpack.c.bf16 %v1118_v20, %v1114_v15 }
 0x138   :  { %v3751_v31 = vadd.f32 %v622_v24, %v621_v30  ;;  %v1115_v24 = vld [vmem:[%s4352_s2 + $0x20] sm:$0xff] }
 0x139   :  { %v3824_v30 = vpack.c.bf16 %v1115_v24, %v1111_v21  ;;  %v1380_v21 = vld [vmem:[%s4352_s2 + $0xe8] sm:$0xff]  ;;  %v1378_v24 = vld [vmem:[%s4352_s2 + $0xd8] sm:$0xff] }
 0x13a   :  { %3012 = vtanh.f32 %v3751_v31 }
 0x144   :  { %v3013_v34 = vpop.eup %3012 }
 0x145   :  { %v625_v35 = vmul.f32 %v3013_v34, %v3011_v33  ;;  %v1117_v33 = vld [vmem:[%s4352_s2 + $0x30] sm:$0xff] }
 0x147   :  { %626 = vst [vmem:[%s4357_s6] sm:$0xff] %v625_v35  ;;  %760 = vmatmul.mubr.f32.vlgmr.msra.gmra.mrb[2].mxu0 %v625_v35  ;;  %831 = vmatmul.mubr.f32.vlgmr.msra.gmra.mrb[2].mxu1 %v625_v35  ;;  %v1120_v35 = vld [vmem:[%s4352_s2 + $0x48] sm:$0xff] }
 0x148   :  { %2552 = vmatpush1.bf16.msra.mxu0 %v3403_v47  ;;  %2584 = vmatpush1.bf16.msra.mxu1 %v3412_v50 }
 0x149   :  { %2554 = vmatprep.subr.bf16.mxu0 %v3421_v53  ;;  %2586 = vmatprep.subr.bf16.mxu1 %v3429_v56 }
 0x14a   :  { %999 = vmatprep.mubr.f32.mxu0 %v3126_v3  ;;  %1070 = vmatprep.mubr.f32.mxu1 %v3126_v3 }
 0x14c   :  { %2556 = vmatpush1.bf16.msra.mxu0 %v3441_v60  ;;  %2588 = vmatpush1.bf16.msra.mxu1 %v3451_v63 }
 0x14d   :  { %2558 = vmatprep.subr.bf16.mxu0 %v3461_v2  ;;  %2590 = vmatprep.subr.bf16.mxu1 %v3470_v6 }
 0x150   :  { %2560 = vmatpush1.bf16.msra.mxu0 %v3482_v10  ;;  %2592 = vmatpush1.bf16.msra.mxu1 %v3492_v13 }
 0x151   :  { %2562 = vmatprep.subr.bf16.mxu0 %v3502_v16  ;;  %2594 = vmatprep.subr.bf16.mxu1 %v3511_v19 }
 0x154   :  { %2564 = vmatpush1.bf16.msra.mxu0 %v3523_v23  ;;  %2596 = vmatpush1.bf16.msra.mxu1 %v3533_v26 }
 0x155   :  { %2566 = vmatprep.subr.bf16.mxu0 %v3543_v29  ;;  %2598 = vmatprep.subr.bf16.mxu1 %v3552_v32 }
 0x158   :  { %2568 = vmatpush1.bf16.msra.mxu0 %v3564_v36  ;;  %2600 = vmatpush1.bf16.msra.mxu1 %v3574_v40 }
 0x159   :  { %2570 = vmatprep.subr.bf16.mxu0 %v3584_v44  ;;  %2602 = vmatprep.subr.bf16.mxu1 %v3593_v48 }
 0x15c   :  { %2572 = vmatpush1.bf16.msra.mxu0 %v3605_v54  ;;  %2604 = vmatpush1.bf16.msra.mxu1 %v3615_v58 }
 0x15d   :  { %2574 = vmatprep.subr.bf16.mxu0 %v3625_v62  ;;  %2606 = vmatprep.subr.bf16.mxu1 %v3634_v4 }
 0x160   :  { %2576 = vmatpush1.bf16.msra.mxu0 %v3646_v9  ;;  %2608 = vmatpush1.bf16.msra.mxu1 %v3656_v14 }
 0x161   :  { %2578 = vmatprep.subr.bf16.mxu0 %v3666_v18  ;;  %2610 = vmatprep.subr.bf16.mxu1 %v3675_v22 }
 0x164   :  { %2580 = vmatpush1.bf16.msra.mxu0 %v3681_v25  ;;  %2612 = vmatpush1.bf16.msra.mxu1 %v3685_v27 }
 0x165   :  { %2614 = vmatprep.subr.bf16.mxu0 %v3811_v17  ;;  %2646 = vmatprep.subr.bf16.mxu1 %v3822_v28 }
 0x21a   :  { %v761_v47 = vpop.f32.mrb[2].mxu0  ;;  %v832_v50 = vpop.f32.mrb[2].mxu1 }
 0x21b   :  { %v2935_v53 = vadd.f32 %v761_v47, %v3736_v37  ;;  %v763_v56 = vpop.f32.mrb[3].mxu0  ;;  %v834_v60 = vpop.f32.mrb[3].mxu1  ;;  %v2951_v42 = vadd.f32 %v832_v50, %v3745_v61  ;;  %v1124_v47 = vld [vmem:[%s4352_s2 + $0x68] sm:$0xff]  ;;  %v1122_v50 = vld [vmem:[%s4352_s2 + $0x58] sm:$0xff] }
 0x21c   :  { %v2936_v63 = vadd.f32 %v763_v56, %v3738_v39  ;;  %v2952_v10 = vadd.f32 %v834_v60, %v3742_v55  ;;  %v1126_v56 = vld [vmem:[%s4352_s2 + $0x78] sm:$0xff]  ;;  %v1119_v60 = vld [vmem:[%s4352_s2 + $0x40] sm:$0xff] }
 0x21d   :  { %v2329_v2 = vmul.f32 -1.442695, %v2935_v53  ;;  %v3847_v53 = vpack.c.bf16 %v1124_v47, %v1120_v35  ;;  %v1375_v35 = vld [vmem:[%s4352_s2 + $0xc0] sm:$0xff] }
 0x21e   :  { %v2330_v6 = vmul.f32 -1.442695, %v2936_v63  ;;  %v2331_v13 = vmul.f32 -1.442695, %v2952_v10  ;;  %v1123_v63 = vld [vmem:[%s4352_s2 + $0x60] sm:$0xff]  ;;  %v1121_v10 = vld [vmem:[%s4352_s2 + $0x50] sm:$0xff] }
 0x21f   :  { %3014 = vpow2.f32 %v2329_v2  ;;  %v3858_v2 = vpack.c.bf16 %v1126_v56, %v1122_v50  ;;  %v1379_v47 = vld [vmem:[%s4352_s2 + $0xe0] sm:$0xff] }
 0x220   :  { %3016 = vpow2.f32 %v2330_v6  ;;  %v3860_v6 = vpack.c.bf16 %v1123_v63, %v1119_v60  ;;  %v3977_v56 = vpack.c.bf16 %v1379_v47, %v1375_v35  ;;  %v1377_v60 = vld [vmem:[%s4352_s2 + $0xd0] sm:$0xff]  ;;  %v1410_v47 = vld [vmem:[%s4352_s2 + $0x1d8] sm:$0xff] }
 0x221   :  { %3018 = vpow2.f32 %v2331_v13  ;;  %v1125_v13 = vld [vmem:[%s4352_s2 + $0x70] sm:$0xff] }
 0x222   :  { %3020 = vtanh.f32 %v2951_v42  ;;  %v3869_v42 = vpack.c.bf16 %v1125_v13, %v1121_v10  ;;  %v1381_v63 = vld [vmem:[%s4352_s2 + $0xf0] sm:$0xff]  ;;  %v1384_v13 = vld [vmem:[%s4352_s2 + $0x108] sm:$0xff] }
 0x223   :  { %v3986_v10 = vpack.c.bf16 %v1381_v63, %v1377_v60  ;;  %v1414_v60 = vld [vmem:[%s4352_s2 + $0x1f8] sm:$0xff]  ;;  %v1407_v63 = vld [vmem:[%s4352_s2 + $0x1c0] sm:$0xff] }
 0x229   :  { %v3015_v43 = vpop.eup %3014 }
 0x22a   :  { %v3017_v45 = vpop.eup %3016  ;;  %v844_v46 = vadd.f32 1.0, %v3015_v43  ;;  %v1128_v43 = vld [vmem:[%s4352_s2 + $0x88] sm:$0xff] }
 0x22b   :  { %v850_v38 = vadd.f32 1.0, %v3017_v45  ;;  %v3019_v41 = vpop.eup %3018  ;;  %v1132_v45 = vld [vmem:[%s4352_s2 + $0xa8] sm:$0xff] }
 0x22c   :  { %3022 = vrcp.f32 %v844_v46  ;;  %v3021_v49 = vpop.eup %3020  ;;  %v857_v59 = vadd.f32 1.0, %v3019_v41  ;;  %v1130_v46 = vld [vmem:[%s4352_s2 + $0x98] sm:$0xff] }
 0x22d   :  { %3024 = vrcp.f32 %v850_v38  ;;  %v3883_v38 = vpack.c.bf16 %v1132_v45, %v1128_v43  ;;  %v1134_v41 = vld [vmem:[%s4352_s2 + $0xb8] sm:$0xff]  ;;  %v1388_v43 = vld [vmem:[%s4352_s2 + $0x128] sm:$0xff] }
 0x22e   :  { %3026 = vrcp.f32 %v857_v59  ;;  %v1129_v59 = vld [vmem:[%s4352_s2 + $0x90] sm:$0xff]  ;;  %v1386_v45 = vld [vmem:[%s4352_s2 + $0x118] sm:$0xff] }
 0x236   :  { %v3023_v51 = vpop.eup %3022 }
 0x237   :  { %v3025_v52 = vpop.eup %3024  ;;  %v861_v57 = vmul.f32 %v3023_v51, %v3021_v49  ;;  %v1127_v49 = vld [vmem:[%s4352_s2 + $0x80] sm:$0xff] }
 0x238   :  { %v860_v0 = vmul.f32 %v3025_v52, %v3751_v31  ;;  %v3027_v5 = vpop.eup %3026  ;;  %v1113_v31 = vld [vmem:[%s4352_s2 + $0x10] sm:$0xff]  ;;  %v1131_v51 = vld [vmem:[%s4352_s2 + $0xa0] sm:$0xff]  ;;  %v3894_v52 = vpack.c.bf16 %v1134_v41, %v1130_v46  ;;  %v4000_v46 = vpack.c.bf16 %v1388_v43, %v1384_v13  ;;  %v1390_v41 = vld [vmem:[%s4352_s2 + $0x138] sm:$0xff]  ;;  %v4114_v13 = vpack.c.bf16 %v1414_v60, %v1410_v47 }
 0x239   :  { %v3833_v34 = vpack.c.bf16 %v1117_v33, %v1113_v31  ;;  %v1382_v33 = vld [vmem:[%s4352_s2 + $0xf8] sm:$0xff]  ;;  %v1411_v43 = vld [vmem:[%s4352_s2 + $0x1e0] sm:$0xff] }
 0x23a   :  { %v3794_v1 = vadd.f32 %v861_v57, %v860_v0  ;;  %v3896_v57 = vpack.c.bf16 %v1131_v51, %v1127_v49  ;;  %v1133_v0 = vld [vmem:[%s4352_s2 + $0xb0] sm:$0xff]  ;;  %v3975_v50 = vpack.c.bf16 %v1382_v33, %v1378_v24  ;;  %v1383_v49 = vld [vmem:[%s4352_s2 + $0x100] sm:$0xff]  ;;  %v1412_v24 = vld [vmem:[%s4352_s2 + $0x1e8] sm:$0xff] }
 0x23b   :  { %v1387_v51 = vld [vmem:[%s4352_s2 + $0x120] sm:$0xff] }
 0x23c   :  { %3028 = vtanh.f32 %v3794_v1 }
 0x246   :  { %v3029_v7 = vpop.eup %3028 }
 0x247   :  { %v864_v8 = vmul.f32 %v3029_v7, %v3027_v5  ;;  %v3905_v5 = vpack.c.bf16 %v1133_v0, %v1129_v59  ;;  %v4011_v59 = vpack.c.bf16 %v1390_v41, %v1386_v45  ;;  %v4013_v0 = vpack.c.bf16 %v1387_v51, %v1383_v49  ;;  %v1409_v45 = vld [vmem:[%s4352_s2 + $0x1d0] sm:$0xff] }
 0x248   :  { %v1413_v41 = vld [vmem:[%s4352_s2 + $0x1f0] sm:$0xff]  ;;  %v4126_v49 = vpack.c.bf16 %v1411_v43, %v1407_v63 }
 0x249   :  { %2332 = vst [vmem:[%s4357_s6 + $0x8] sm:$0xff] %v864_v8  ;;  %1000 = vmatmul.mubr.f32.vlgmr.msra.gmra.mrb[4].mxu0 %v864_v8  ;;  %1071 = vmatmul.mubr.f32.vlgmr.msra.gmra.mrb[4].mxu1 %v864_v8  ;;  %v4130_v51 = vpack.c.bf16 %v1413_v41, %v1409_v45 }
 0x24a   :  { %1239 = vmatprep.mubr.f32.mxu0 %v3126_v3  ;;  %1310 = vmatprep.mubr.f32.mxu1 %v3126_v3 }
 0x24b   :  { %2616 = vmatpush1.bf16.msra.mxu0 %v3824_v30  ;;  %2648 = vmatpush1.bf16.msra.mxu1 %v3833_v34 }
 0x24c   :  { %2618 = vmatprep.subr.bf16.mxu0 %v3847_v53  ;;  %2650 = vmatprep.subr.bf16.mxu1 %v3858_v2 }
 0x24f   :  { %2620 = vmatpush1.bf16.msra.mxu0 %v3860_v6  ;;  %2652 = vmatpush1.bf16.msra.mxu1 %v3869_v42 }
 0x250   :  { %2622 = vmatprep.subr.bf16.mxu0 %v3883_v38  ;;  %2654 = vmatprep.subr.bf16.mxu1 %v3894_v52 }
 0x253   :  { %2624 = vmatpush1.bf16.msra.mxu0 %v3896_v57  ;;  %2656 = vmatpush1.bf16.msra.mxu1 %v3905_v5 }
 0x254   :  { %2626 = vmatprep.subr.bf16.mxu0 %v3502_v16  ;;  %2658 = vmatprep.subr.bf16.mxu1 %v3511_v19 }
 0x257   :  { %2628 = vmatpush1.bf16.msra.mxu0 %v3523_v23  ;;  %2660 = vmatpush1.bf16.msra.mxu1 %v3533_v26 }
 0x258   :  { %2630 = vmatprep.subr.bf16.mxu0 %v3543_v29  ;;  %2662 = vmatprep.subr.bf16.mxu1 %v3552_v32 }
 0x25b   :  { %2632 = vmatpush1.bf16.msra.mxu0 %v3564_v36  ;;  %2664 = vmatpush1.bf16.msra.mxu1 %v3574_v40 }
 0x25c   :  { %2634 = vmatprep.subr.bf16.mxu0 %v3584_v44  ;;  %2666 = vmatprep.subr.bf16.mxu1 %v3593_v48 }
 0x25f   :  { %2636 = vmatpush1.bf16.msra.mxu0 %v3605_v54  ;;  %2668 = vmatpush1.bf16.msra.mxu1 %v3615_v58 }
 0x260   :  { %2638 = vmatprep.subr.bf16.mxu0 %v3625_v62  ;;  %2670 = vmatprep.subr.bf16.mxu1 %v3634_v4 }
 0x263   :  { %2640 = vmatpush1.bf16.msra.mxu0 %v3646_v9  ;;  %2672 = vmatpush1.bf16.msra.mxu1 %v3656_v14 }
 0x264   :  { %2642 = vmatprep.subr.bf16.mxu0 %v3666_v18  ;;  %2674 = vmatprep.subr.bf16.mxu1 %v3675_v22 }
 0x267   :  { %2644 = vmatpush1.bf16.msra.mxu0 %v3681_v25  ;;  %2676 = vmatpush1.bf16.msra.mxu1 %v3685_v27 }
 0x268   :  { %2678 = vmatprep.subr.bf16.mxu0 %v3811_v17  ;;  %2710 = vmatprep.subr.bf16.mxu1 %v3822_v28 }
 0x31c   :  { %v1001_v16 = vpop.f32.mrb[4].mxu0  ;;  %v1072_v19 = vpop.f32.mrb[4].mxu1 }
 0x31d   :  { %v2937_v23 = vadd.f32 %v1001_v16, %v3736_v37  ;;  %v1003_v26 = vpop.f32.mrb[5].mxu0  ;;  %v1074_v29 = vpop.f32.mrb[5].mxu1  ;;  %v2953_v54 = vadd.f32 %v1072_v19, %v3745_v61  ;;  %v1385_v16 = vld [vmem:[%s4352_s2 + $0x110] sm:$0xff] }
 0x31e   :  { %v2938_v32 = vadd.f32 %v1003_v26, %v3738_v39  ;;  %v2954_v44 = vadd.f32 %v1074_v29, %v3742_v55  ;;  %v1389_v19 = vld [vmem:[%s4352_s2 + $0x130] sm:$0xff]  ;;  %v1392_v26 = vld [vmem:[%s4352_s2 + $0x148] sm:$0xff] }
 0x31f   :  { %v2333_v36 = vmul.f32 -1.442695, %v2937_v23  ;;  %v4022_v23 = vpack.c.bf16 %v1389_v19, %v1385_v16  ;;  %v1396_v29 = vld [vmem:[%s4352_s2 + $0x168] sm:$0xff] }
 0x320   :  { %v2334_v40 = vmul.f32 -1.442695, %v2938_v32  ;;  %v2335_v48 = vmul.f32 -1.442695, %v2954_v44  ;;  %v1394_v32 = vld [vmem:[%s4352_s2 + $0x158] sm:$0xff]  ;;  %v1391_v44 = vld [vmem:[%s4352_s2 + $0x140] sm:$0xff] }
 0x321   :  { %3030 = vpow2.f32 %v2333_v36  ;;  %v4035_v36 = vpack.c.bf16 %v1396_v29, %v1392_v26 }
 0x322   :  { %3032 = vpow2.f32 %v2334_v40  ;;  %v1398_v40 = vld [vmem:[%s4352_s2 + $0x178] sm:$0xff] }
 0x323   :  { %3034 = vpow2.f32 %v2335_v48  ;;  %v1395_v48 = vld [vmem:[%s4352_s2 + $0x160] sm:$0xff] }
 0x324   :  { %3036 = vtanh.f32 %v2953_v54  ;;  %v4047_v54 = vpack.c.bf16 %v1398_v40, %v1394_v32 }
 0x32b   :  { %v3031_v58 = vpop.eup %3030 }
 0x32c   :  { %v3033_v62 = vpop.eup %3032  ;;  %v1084_v4 = vadd.f32 1.0, %v3031_v58  ;;  %v4049_v58 = vpack.c.bf16 %v1395_v48, %v1391_v44 }
 0x32d   :  { %v1090_v9 = vadd.f32 1.0, %v3033_v62  ;;  %v3035_v14 = vpop.eup %3034  ;;  %v1393_v62 = vld [vmem:[%s4352_s2 + $0x150] sm:$0xff] }
 0x32e   :  { %3038 = vrcp.f32 %v1084_v4  ;;  %v3037_v18 = vpop.eup %3036  ;;  %v1097_v7 = vadd.f32 1.0, %v3035_v14  ;;  %v1397_v4 = vld [vmem:[%s4352_s2 + $0x170] sm:$0xff] }
 0x32f   :  { %3040 = vrcp.f32 %v1090_v9  ;;  %v1400_v9 = vld [vmem:[%s4352_s2 + $0x188] sm:$0xff]  ;;  %v4061_v14 = vpack.c.bf16 %v1397_v4, %v1393_v62 }
 0x330   :  { %3042 = vrcp.f32 %v1097_v7 }
 0x338   :  { %v3039_v22 = vpop.eup %3038 }
 0x339   :  { %v3041_v25 = vpop.eup %3040  ;;  %v1101_v27 = vmul.f32 %v3039_v22, %v3037_v18  ;;  %v1404_v18 = vld [vmem:[%s4352_s2 + $0x1a8] sm:$0xff]  ;;  %v1402_v22 = vld [vmem:[%s4352_s2 + $0x198] sm:$0xff] }
 0x33a   :  { %v1100_v8 = vmul.f32 %v3041_v25, %v3794_v1  ;;  %v3043_v12 = vpop.eup %3042  ;;  %v1376_v1 = vld [vmem:[%s4352_s2 + $0xc8] sm:$0xff]  ;;  %v1406_v25 = vld [vmem:[%s4352_s2 + $0x1b8] sm:$0xff] }
 0x33b   :  { %v3964_v31 = vpack.c.bf16 %v1380_v21, %v1376_v1  ;;  %v4075_v7 = vpack.c.bf16 %v1406_v25, %v1402_v22  ;;  %v1405_v1 = vld [vmem:[%s4352_s2 + $0x1b0] sm:$0xff]  ;;  %v1408_v21 = vld [vmem:[%s4352_s2 + $0x1c8] sm:$0xff] }
 0x33c   :  { %v3937_v11 = vadd.f32 %v1101_v27, %v1100_v8  ;;  %v4073_v27 = vpack.c.bf16 %v1404_v18, %v1400_v9  ;;  %v1399_v8 = vld [vmem:[%s4352_s2 + $0x180] sm:$0xff]  ;;  %v4102_v35 = vpack.c.bf16 %v1412_v24, %v1408_v21 }
 0x33e   :  { %3044 = vtanh.f32 %v3937_v11 }
 0x348   :  { %v3045_v15 = vpop.eup %3044 }
 0x349   :  { %v1104_v20 = vmul.f32 %v3045_v15, %v3043_v12  ;;  %v1403_v12 = vld [vmem:[%s4352_s2 + $0x1a0] sm:$0xff]  ;;  %v1401_v15 = vld [vmem:[%s4352_s2 + $0x190] sm:$0xff] }
 0x34a   :  { %v4100_v33 = vpack.c.bf16 %v1405_v1, %v1401_v15 }
 0x34b   :  { %2336 = vst [vmem:[%s4357_s6 + $0x10] sm:$0xff] %v1104_v20  ;;  %1240 = vmatmul.mubr.f32.vlgmr.msra.gmra.mrb[6].mxu0 %v1104_v20  ;;  %1311 = vmatmul.mubr.f32.vlgmr.msra.gmra.mrb[6].mxu1 %v1104_v20  ;;  %v4087_v20 = vpack.c.bf16 %v1403_v12, %v1399_v8 }
 0x34c   :  { %2680 = vmatpush1.bf16.msra.mxu0 %v3824_v30  ;;  %2712 = vmatpush1.bf16.msra.mxu1 %v3833_v34 }
 0x34d   :  { %2682 = vmatprep.subr.bf16.mxu0 %v3847_v53  ;;  %2714 = vmatprep.subr.bf16.mxu1 %v3858_v2 }
 0x34e   :  { %1479 = vmatprep.mubr.f32.mxu0 %v3126_v3  ;;  %1550 = vmatprep.mubr.f32.mxu1 %v3126_v3 }
 0x350   :  { %2684 = vmatpush1.bf16.msra.mxu0 %v3860_v6  ;;  %2716 = vmatpush1.bf16.msra.mxu1 %v3869_v42 }
 0x351   :  { %2686 = vmatprep.subr.bf16.mxu0 %v3883_v38  ;;  %2718 = vmatprep.subr.bf16.mxu1 %v3894_v52 }
 0x354   :  { %2688 = vmatpush1.bf16.msra.mxu0 %v3896_v57  ;;  %2720 = vmatpush1.bf16.msra.mxu1 %v3905_v5 }
 0x355   :  { %2690 = vmatprep.subr.bf16.mxu0 %v3964_v31  ;;  %2722 = vmatprep.subr.bf16.mxu1 %v3975_v50 }
 0x358   :  { %2692 = vmatpush1.bf16.msra.mxu0 %v3977_v56  ;;  %2724 = vmatpush1.bf16.msra.mxu1 %v3986_v10 }
 0x359   :  { %2694 = vmatprep.subr.bf16.mxu0 %v4000_v46  ;;  %2726 = vmatprep.subr.bf16.mxu1 %v4011_v59 }
 0x35c   :  { %2696 = vmatpush1.bf16.msra.mxu0 %v4013_v0  ;;  %2728 = vmatpush1.bf16.msra.mxu1 %v4022_v23 }
 0x35d   :  { %2698 = vmatprep.subr.bf16.mxu0 %v4035_v36  ;;  %2730 = vmatprep.subr.bf16.mxu1 %v4047_v54 }
 0x360   :  { %2700 = vmatpush1.bf16.msra.mxu0 %v4049_v58  ;;  %2732 = vmatpush1.bf16.msra.mxu1 %v4061_v14 }
 0x361   :  { %2702 = vmatprep.subr.bf16.mxu0 %v4073_v27  ;;  %2734 = vmatprep.subr.bf16.mxu1 %v4075_v7 }
 0x364   :  { %2704 = vmatpush1.bf16.msra.mxu0 %v4087_v20  ;;  %2736 = vmatpush1.bf16.msra.mxu1 %v4100_v33 }
 0x365   :  { %2706 = vmatprep.subr.bf16.mxu0 %v4102_v35  ;;  %2738 = vmatprep.subr.bf16.mxu1 %v4114_v13 }
 0x368   :  { %2708 = vmatpush1.bf16.msra.mxu0 %v4126_v49  ;;  %2740 = vmatpush1.bf16.msra.mxu1 %v4130_v51 }
 0x369   :  { %2742 = vmatprep.subr.bf16.mxu0 %v3811_v17  ;;  %2774 = vmatprep.subr.bf16.mxu1 %v3822_v28 }
 0x41e   :  { %v1241_v16 = vpop.f32.mrb[6].mxu0  ;;  %v1312_v19 = vpop.f32.mrb[6].mxu1 }
 0x41f   :  { %v2939_v26 = vadd.f32 %v1241_v16, %v3736_v37  ;;  %v1243_v29 = vpop.f32.mrb[7].mxu0  ;;  %v1314_v32 = vpop.f32.mrb[7].mxu1  ;;  %v2955_v9 = vadd.f32 %v1312_v19, %v3745_v61 }
 0x420   :  { %v2940_v40 = vadd.f32 %v1243_v29, %v3738_v39  ;;  %v2956_v62 = vadd.f32 %v1314_v32, %v3742_v55 }
 0x421   :  { %v2337_v44 = vmul.f32 -1.442695, %v2939_v26 }
 0x422   :  { %v2338_v48 = vmul.f32 -1.442695, %v2940_v40  ;;  %v2339_v4 = vmul.f32 -1.442695, %v2956_v62 }
 0x423   :  { %3046 = vpow2.f32 %v2337_v44 }
 0x424   :  { %3048 = vpow2.f32 %v2338_v48 }
 0x425   :  { %3050 = vpow2.f32 %v2339_v4 }
 0x426   :  { %3052 = vtanh.f32 %v2955_v9 }
 0x42d   :  { %v3047_v18 = vpop.eup %3046 }
 0x42e   :  { %v3049_v22 = vpop.eup %3048  ;;  %v1324_v25 = vadd.f32 1.0, %v3047_v18 }
 0x42f   :  { %v1330_v8 = vadd.f32 1.0, %v3049_v22  ;;  %v3051_v12 = vpop.eup %3050 }
 0x430   :  { %3054 = vrcp.f32 %v1324_v25  ;;  %v3053_v15 = vpop.eup %3052  ;;  %v1337_v47 = vadd.f32 1.0, %v3051_v12 }
 0x431   :  { %3056 = vrcp.f32 %v1330_v8 }
 0x432   :  { %3058 = vrcp.f32 %v1337_v47 }
 0x43a   :  { %v3055_v1 = vpop.eup %3054 }
 0x43b   :  { %v3057_v21 = vpop.eup %3056  ;;  %v1341_v24 = vmul.f32 %v3055_v1, %v3053_v15 }
 0x43c   :  { %v1340_v60 = vmul.f32 %v3057_v21, %v3937_v11  ;;  %v3059_v43 = vpop.eup %3058 }
 0x43e   :  { %v4142_v63 = vadd.f32 %v1341_v24, %v1340_v60 }
 0x440   :  { %3060 = vtanh.f32 %v4142_v63 }
 0x44a   :  { %v3061_v45 = vpop.eup %3060 }
 0x44b   :  { %v1344_v41 = vmul.f32 %v3061_v45, %v3059_v43 }
 0x44d   :  { %2340 = vst [vmem:[%s4357_s6 + $0x18] sm:$0xff] %v1344_v41  ;;  %1480 = vmatmul.mubr.f32.vlgmr.msra.gmra.mrb[8].mxu0 %v1344_v41  ;;  %1551 = vmatmul.mubr.f32.vlgmr.msra.gmra.mrb[8].mxu1 %v1344_v41 }
 0x44e   :  { %2744 = vmatpush1.bf16.msra.mxu0 %v3824_v30  ;;  %2776 = vmatpush1.bf16.msra.mxu1 %v3833_v34 }
 0x44f   :  { %2746 = vmatprep.subr.bf16.mxu0 %v3847_v53  ;;  %2778 = vmatprep.subr.bf16.mxu1 %v3858_v2 }
 0x450   :  { %1719 = vmatprep.mubr.f32.mxu0 %v3126_v3  ;;  %1790 = vmatprep.mubr.f32.mxu1 %v3126_v3 }
 0x452   :  { %2748 = vmatpush1.bf16.msra.mxu0 %v3860_v6  ;;  %2780 = vmatpush1.bf16.msra.mxu1 %v3869_v42 }
 0x453   :  { %2750 = vmatprep.subr.bf16.mxu0 %v3883_v38  ;;  %2782 = vmatprep.subr.bf16.mxu1 %v3894_v52 }
 0x456   :  { %2752 = vmatpush1.bf16.msra.mxu0 %v3896_v57  ;;  %2784 = vmatpush1.bf16.msra.mxu1 %v3905_v5 }
 0x457   :  { %2754 = vmatprep.subr.bf16.mxu0 %v3964_v31  ;;  %2786 = vmatprep.subr.bf16.mxu1 %v3975_v50 }
 0x45a   :  { %2756 = vmatpush1.bf16.msra.mxu0 %v3977_v56  ;;  %2788 = vmatpush1.bf16.msra.mxu1 %v3986_v10 }
 0x45b   :  { %2758 = vmatprep.subr.bf16.mxu0 %v4000_v46  ;;  %2790 = vmatprep.subr.bf16.mxu1 %v4011_v59 }
 0x45e   :  { %2760 = vmatpush1.bf16.msra.mxu0 %v4013_v0  ;;  %2792 = vmatpush1.bf16.msra.mxu1 %v4022_v23 }
 0x45f   :  { %2762 = vmatprep.subr.bf16.mxu0 %v4035_v36  ;;  %2794 = vmatprep.subr.bf16.mxu1 %v4047_v54 }
 0x462   :  { %2764 = vmatpush1.bf16.msra.mxu0 %v4049_v58  ;;  %2796 = vmatpush1.bf16.msra.mxu1 %v4061_v14 }
 0x463   :  { %2766 = vmatprep.subr.bf16.mxu0 %v4073_v27  ;;  %2798 = vmatprep.subr.bf16.mxu1 %v4075_v7 }
 0x466   :  { %2768 = vmatpush1.bf16.msra.mxu0 %v4087_v20  ;;  %2800 = vmatpush1.bf16.msra.mxu1 %v4100_v33 }
 0x467   :  { %2770 = vmatprep.subr.bf16.mxu0 %v4102_v35  ;;  %2802 = vmatprep.subr.bf16.mxu1 %v4114_v13 }
 0x46a   :  { %2772 = vmatpush1.bf16.msra.mxu0 %v4126_v49  ;;  %2804 = vmatpush1.bf16.msra.mxu1 %v4130_v51 }
 0x46b   :  { %2806 = vmatprep.subr.bf16.mxu0 %v3811_v17  ;;  %2838 = vmatprep.subr.bf16.mxu1 %v3822_v28 }
 0x520   :  { %v1481_v11 = vpop.f32.mrb[8].mxu0  ;;  %v1552_v16 = vpop.f32.mrb[8].mxu1 }
 0x521   :  { %v2941_v19 = vadd.f32 %v1481_v11, %v3736_v37  ;;  %v1483_v26 = vpop.f32.mrb[9].mxu0  ;;  %v1554_v29 = vpop.f32.mrb[9].mxu1  ;;  %v2957_v4 = vadd.f32 %v1552_v16, %v3745_v61 }
 0x522   :  { %v2942_v32 = vadd.f32 %v1483_v26, %v3738_v39  ;;  %v2958_v48 = vadd.f32 %v1554_v29, %v3742_v55 }
 0x523   :  { %v2341_v40 = vmul.f32 -1.442695, %v2941_v19 }
 0x524   :  { %v2342_v44 = vmul.f32 -1.442695, %v2942_v32  ;;  %v2343_v62 = vmul.f32 -1.442695, %v2958_v48 }
 0x525   :  { %3062 = vpow2.f32 %v2341_v40 }
 0x526   :  { %3064 = vpow2.f32 %v2342_v44 }
 0x527   :  { %3066 = vpow2.f32 %v2343_v62 }
 0x528   :  { %3068 = vtanh.f32 %v2957_v4 }
 0x52f   :  { %v3063_v17 = vpop.eup %3062 }
 0x530   :  { %v3065_v9 = vpop.eup %3064  ;;  %v1564_v28 = vadd.f32 1.0, %v3063_v17 }
 0x531   :  { %v1570_v18 = vadd.f32 1.0, %v3065_v9  ;;  %v3067_v22 = vpop.eup %3066 }
 0x532   :  { %3070 = vrcp.f32 %v1564_v28  ;;  %v3069_v25 = vpop.eup %3068  ;;  %v1577_v1 = vadd.f32 1.0, %v3067_v22  ;;  %v2072_v28 = vld [vmem:[%s4352_s2 + $0x8] sm:$0xff]  ;;  %v2074_v22 = vld [vmem:[%s4352_s2 + $0x18] sm:$0xff] }
 0x533   :  { %3072 = vrcp.f32 %v1570_v18  ;;  %v2076_v18 = vld [vmem:[%s4352_s2 + $0x28] sm:$0xff] }
 0x534   :  { %3074 = vrcp.f32 %v1577_v1 }
 0x53c   :  { %v3071_v8 = vpop.eup %3070 }
 0x53d   :  { %v3073_v12 = vpop.eup %3072  ;;  %v1581_v15 = vmul.f32 %v3071_v8, %v3069_v25  ;;  %v2869_v25 = vpack.c.bf16 %v2076_v18, %v2072_v28  ;;  %v2078_v8 = vld [vmem:[%s4352_s2 + $0x38] sm:$0xff] }
 0x53e   :  { %v1580_v21 = vmul.f32 %v3073_v12, %v4142_v63  ;;  %v3075_v47 = vpop.eup %3074  ;;  %v2075_v12 = vld [vmem:[%s4352_s2 + $0x20] sm:$0xff] }
 0x540   :  { %v4187_v24 = vadd.f32 %v1581_v15, %v1580_v21  ;;  %v2901_v15 = vpack.c.bf16 %v2078_v8, %v2074_v22  ;;  %v2073_v21 = vld [vmem:[%s4352_s2 + $0x10] sm:$0xff] }
 0x542   :  { %3076 = vtanh.f32 %v4187_v24 }
 0x54c   :  { %v3077_v60 = vpop.eup %3076 }
 0x54d   :  { %v1584_v43 = vmul.f32 %v3077_v60, %v3075_v47  ;;  %v2080_v60 = vld [vmem:[%s4352_s2 + $0x48] sm:$0xff] }
 0x54f   :  { %2344 = vst [vmem:[%s4357_s6 + $0x20] sm:$0xff] %v1584_v43  ;;  %1720 = vmatmul.mubr.f32.vlgmr.msra.gmra.mrb[10].mxu0 %v1584_v43  ;;  %1791 = vmatmul.mubr.f32.vlgmr.msra.gmra.mrb[10].mxu1 %v1584_v43  ;;  %v2084_v43 = vld [vmem:[%s4352_s2 + $0x68] sm:$0xff] }
 0x550   :  { %2808 = vmatpush1.bf16.msra.mxu0 %v3824_v30  ;;  %2840 = vmatpush1.bf16.msra.mxu1 %v3833_v34 }
 0x551   :  { %2810 = vmatprep.subr.bf16.mxu0 %v3847_v53  ;;  %2842 = vmatprep.subr.bf16.mxu1 %v3858_v2 }
 0x552   :  { %1959 = vmatprep.mubr.f32.mxu0 %v3126_v3  ;;  %2030 = vmatprep.mubr.f32.mxu1 %v3126_v3 }
 0x554   :  { %2812 = vmatpush1.bf16.msra.mxu0 %v3860_v6  ;;  %2844 = vmatpush1.bf16.msra.mxu1 %v3869_v42 }
 0x555   :  { %2814 = vmatprep.subr.bf16.mxu0 %v3883_v38  ;;  %2846 = vmatprep.subr.bf16.mxu1 %v3894_v52 }
 0x558   :  { %2816 = vmatpush1.bf16.msra.mxu0 %v3896_v57  ;;  %2848 = vmatpush1.bf16.msra.mxu1 %v3905_v5 }
 0x559   :  { %2818 = vmatprep.subr.bf16.mxu0 %v3964_v31  ;;  %2850 = vmatprep.subr.bf16.mxu1 %v3975_v50 }
 0x55c   :  { %2820 = vmatpush1.bf16.msra.mxu0 %v3977_v56  ;;  %2852 = vmatpush1.bf16.msra.mxu1 %v3986_v10 }
 0x55d   :  { %2822 = vmatprep.subr.bf16.mxu0 %v4000_v46  ;;  %2854 = vmatprep.subr.bf16.mxu1 %v4011_v59 }
 0x560   :  { %2824 = vmatpush1.bf16.msra.mxu0 %v4013_v0  ;;  %2856 = vmatpush1.bf16.msra.mxu1 %v4022_v23 }
 0x561   :  { %2826 = vmatprep.subr.bf16.mxu0 %v4035_v36  ;;  %2858 = vmatprep.subr.bf16.mxu1 %v4047_v54 }
 0x564   :  { %2828 = vmatpush1.bf16.msra.mxu0 %v4049_v58  ;;  %2860 = vmatpush1.bf16.msra.mxu1 %v4061_v14 }
 0x565   :  { %2830 = vmatprep.subr.bf16.mxu0 %v4073_v27  ;;  %2862 = vmatprep.subr.bf16.mxu1 %v4075_v7 }
 0x568   :  { %2832 = vmatpush1.bf16.msra.mxu0 %v4087_v20  ;;  %2864 = vmatpush1.bf16.msra.mxu1 %v4100_v33 }
 0x569   :  { %2834 = vmatprep.subr.bf16.mxu0 %v4102_v35  ;;  %2866 = vmatprep.subr.bf16.mxu1 %v4114_v13 }
 0x56c   :  { %2836 = vmatpush1.bf16.msra.mxu0 %v4126_v49  ;;  %2868 = vmatpush1.bf16.msra.mxu1 %v4130_v51 }
 0x56d   :  { %2870 = vmatprep.subr.bf16.mxu0 %v2869_v25  ;;  %2902 = vmatprep.subr.bf16.mxu1 %v2901_v15 }
 0x622   :  { %v1721_v30 = vpop.f32.mrb[10].mxu0  ;;  %v1792_v34 = vpop.f32.mrb[10].mxu1 }
 0x623   :  { %v2943_v53 = vadd.f32 %v1721_v30, %v3736_v37  ;;  %v1723_v2 = vpop.f32.mrb[11].mxu0  ;;  %v1794_v6 = vpop.f32.mrb[11].mxu1  ;;  %v2959_v63 = vadd.f32 %v1792_v34, %v3745_v61  ;;  %v2082_v30 = vld [vmem:[%s4352_s2 + $0x58] sm:$0xff]  ;;  %v2873_v34 = vpack.c.bf16 %v2084_v43, %v2080_v60 }
 0x624   :  { %v2944_v42 = vadd.f32 %v1723_v2, %v3738_v39  ;;  %v2960_v57 = vadd.f32 %v1794_v6, %v3742_v55  ;;  %v2079_v2 = vld [vmem:[%s4352_s2 + $0x40] sm:$0xff] }
 0x625   :  { %v2345_v38 = vmul.f32 -1.442695, %v2943_v53  ;;  %v2086_v53 = vld [vmem:[%s4352_s2 + $0x78] sm:$0xff]  ;;  %v2083_v6 = vld [vmem:[%s4352_s2 + $0x60] sm:$0xff] }
 0x626   :  { %v2346_v52 = vmul.f32 -1.442695, %v2944_v42  ;;  %v2347_v5 = vmul.f32 -1.442695, %v2960_v57  ;;  %v2905_v42 = vpack.c.bf16 %v2086_v53, %v2082_v30  ;;  %v2085_v57 = vld [vmem:[%s4352_s2 + $0x70] sm:$0xff] }
 0x627   :  { %3078 = vpow2.f32 %v2345_v38  ;;  %v2875_v38 = vpack.c.bf16 %v2083_v6, %v2079_v2 }
 0x628   :  { %3080 = vpow2.f32 %v2346_v52  ;;  %v2081_v52 = vld [vmem:[%s4352_s2 + $0x50] sm:$0xff] }
 0x629   :  { %3082 = vpow2.f32 %v2347_v5  ;;  %v2907_v5 = vpack.c.bf16 %v2085_v57, %v2081_v52 }
 0x62a   :  { %3084 = vtanh.f32 %v2959_v63  ;;  %v2088_v63 = vld [vmem:[%s4352_s2 + $0x88] sm:$0xff] }
 0x631   :  { %v3079_v45 = vpop.eup %3078 }
 0x632   :  { %v3081_v41 = vpop.eup %3080  ;;  %v1804_v11 = vadd.f32 1.0, %v3079_v45  ;;  %v2092_v45 = vld [vmem:[%s4352_s2 + $0xa8] sm:$0xff] }
 0x633   :  { %v1810_v16 = vadd.f32 1.0, %v3081_v41  ;;  %v3083_v19 = vpop.eup %3082  ;;  %v2090_v41 = vld [vmem:[%s4352_s2 + $0x98] sm:$0xff] }
 0x634   :  { %3086 = vrcp.f32 %v1804_v11  ;;  %v3085_v26 = vpop.eup %3084  ;;  %v1817_v44 = vadd.f32 1.0, %v3083_v19  ;;  %v2877_v11 = vpack.c.bf16 %v2092_v45, %v2088_v63  ;;  %v2087_v19 = vld [vmem:[%s4352_s2 + $0x80] sm:$0xff] }
 0x635   :  { %3088 = vrcp.f32 %v1810_v16  ;;  %v2094_v16 = vld [vmem:[%s4352_s2 + $0xb8] sm:$0xff] }
 0x636   :  { %3090 = vrcp.f32 %v1817_v44  ;;  %v2093_v44 = vld [vmem:[%s4352_s2 + $0xb0] sm:$0xff] }
 0x63e   :  { %v3087_v29 = vpop.eup %3086 }
 0x63f   :  { %v3089_v32 = vpop.eup %3088  ;;  %v1821_v40 = vmul.f32 %v3087_v29, %v3085_v26  ;;  %v2091_v26 = vld [vmem:[%s4352_s2 + $0xa0] sm:$0xff]  ;;  %v2909_v29 = vpack.c.bf16 %v2094_v16, %v2090_v41 }
 0x640   :  { %v1820_v48 = vmul.f32 %v3089_v32, %v4187_v24  ;;  %v3091_v4 = vpop.eup %3090  ;;  %v2077_v24 = vld [vmem:[%s4352_s2 + $0x30] sm:$0xff]  ;;  %v2879_v32 = vpack.c.bf16 %v2091_v26, %v2087_v19 }
 0x641   :  { %v2903_v47 = vpack.c.bf16 %v2077_v24, %v2073_v21 }
 0x642   :  { %v4230_v62 = vadd.f32 %v1821_v40, %v1820_v48  ;;  %v2089_v40 = vld [vmem:[%s4352_s2 + $0x90] sm:$0xff] }
 0x643   :  { %v2911_v48 = vpack.c.bf16 %v2093_v44, %v2089_v40 }
 0x644   :  { %3092 = vtanh.f32 %v4230_v62 }
 0x64e   :  { %v3093_v17 = vpop.eup %3092 }
 0x64f   :  { %v1824_v9 = vmul.f32 %v3093_v17, %v3091_v4 }
 0x651   :  { %2348 = vst [vmem:[%s4357_s6 + $0x28] sm:$0xff] %v1824_v9  ;;  %1960 = vmatmul.mubr.f32.vlgmr.msra.gmra.mrb[12].mxu0 %v1824_v9  ;;  %2031 = vmatmul.mubr.f32.vlgmr.msra.gmra.mrb[12].mxu1 %v1824_v9 }
 0x652   :  { %2199 = vmatprep.mubr.f32.mxu0 %v3126_v3  ;;  %2270 = vmatprep.mubr.f32.mxu1 %v3126_v3  ;;  %v2071_v3 = vld [vmem:[%s4352_s2] sm:$0xff] }
 0x653   :  { %v2871_v1 = vpack.c.bf16 %v2075_v12, %v2071_v3  ;;  %2904 = vmatpush1.bf16.msra.mxu1 %v2903_v47 }
 0x654   :  { %2906 = vmatprep.subr.bf16.mxu1 %v2905_v42 }
 0x655   :  { %2872 = vmatpush1.bf16.msra.mxu0 %v2871_v1 }
 0x656   :  { %2874 = vmatprep.subr.bf16.mxu0 %v2873_v34 }
 0x657   :  { %2908 = vmatpush1.bf16.msra.mxu1 %v2907_v5 }
 0x658   :  { %2910 = vmatprep.subr.bf16.mxu1 %v2909_v29 }
 0x659   :  { %2876 = vmatpush1.bf16.msra.mxu0 %v2875_v38 }
 0x65a   :  { %2878 = vmatprep.subr.bf16.mxu0 %v2877_v11 }
 0x65b   :  { %2912 = vmatpush1.bf16.msra.mxu1 %v2911_v48 }
 0x65c   :  { %2914 = vmatprep.subr.bf16.mxu1 %v3975_v50 }
 0x65d   :  { %2880 = vmatpush1.bf16.msra.mxu0 %v2879_v32 }
 0x65e   :  { %2882 = vmatprep.subr.bf16.mxu0 %v3964_v31 }
 0x65f   :  { %2916 = vmatpush1.bf16.msra.mxu1 %v3986_v10 }
 0x660   :  { %2918 = vmatprep.subr.bf16.mxu1 %v4011_v59 }
 0x661   :  { %2884 = vmatpush1.bf16.msra.mxu0 %v3977_v56 }
 0x662   :  { %2886 = vmatprep.subr.bf16.mxu0 %v4000_v46 }
 0x663   :  { %2920 = vmatpush1.bf16.msra.mxu1 %v4022_v23 }
 0x664   :  { %2922 = vmatprep.subr.bf16.mxu1 %v4047_v54 }
 0x665   :  { %2888 = vmatpush1.bf16.msra.mxu0 %v4013_v0 }
 0x666   :  { %2890 = vmatprep.subr.bf16.mxu0 %v4035_v36 }
 0x667   :  { %2924 = vmatpush1.bf16.msra.mxu1 %v4061_v14 }
 0x668   :  { %2926 = vmatprep.subr.bf16.mxu1 %v4075_v7 }
 0x669   :  { %2892 = vmatpush1.bf16.msra.mxu0 %v4049_v58 }
 0x66a   :  { %2894 = vmatprep.subr.bf16.mxu0 %v4073_v27 }
 0x66b   :  { %2928 = vmatpush1.bf16.msra.mxu1 %v4100_v33 }
 0x66c   :  { %2930 = vmatprep.subr.bf16.mxu1 %v4114_v13 }
 0x66d   :  { %2896 = vmatpush1.bf16.msra.mxu0 %v4087_v20 }
 0x66e   :  { %2898 = vmatprep.subr.bf16.mxu0 %v4102_v35 }
 0x66f   :  { %2932 = vmatpush1.bf16.msra.mxu1 %v4130_v51 }
 0x671   :  { %2900 = vmatpush1.bf16.msra.mxu0 %v4126_v49 }
 0x724   :  { %v1961_v31 = vpop.f32.mrb[12].mxu0  ;;  %v2032_v50 = vpop.f32.mrb[12].mxu1 }
 0x725   :  { %v2945_v56 = vadd.f32 %v1961_v31, %v3736_v37  ;;  %v1963_v10 = vpop.f32.mrb[13].mxu0  ;;  %v2034_v46 = vpop.f32.mrb[13].mxu1  ;;  %v2961_v58 = vadd.f32 %v2032_v50, %v3745_v61 }
 0x726   :  { %v2946_v59 = vadd.f32 %v1963_v10, %v3738_v39  ;;  %v2962_v36 = vadd.f32 %v2034_v46, %v3742_v55 }
 0x727   :  { %v2349_v0 = vmul.f32 -1.442695, %v2945_v56 }
 0x728   :  { %v2350_v23 = vmul.f32 -1.442695, %v2946_v59  ;;  %v2351_v54 = vmul.f32 -1.442695, %v2962_v36 }
 0x729   :  { %3094 = vpow2.f32 %v2349_v0 }
 0x72a   :  { %3096 = vpow2.f32 %v2350_v23 }
 0x72b   :  { %3098 = vpow2.f32 %v2351_v54 }
 0x72c   :  { %3100 = vtanh.f32 %v2961_v58 }
 0x733   :  { %v3095_v14 = vpop.eup %3094 }
 0x734   :  { %v3097_v27 = vpop.eup %3096  ;;  %v2044_v7 = vadd.f32 1.0, %v3095_v14 }
 0x735   :  { %v2050_v20 = vadd.f32 1.0, %v3097_v27  ;;  %v3099_v33 = vpop.eup %3098 }
 0x736   :  { %3102 = vrcp.f32 %v2044_v7  ;;  %v3101_v35 = vpop.eup %3100  ;;  %v2057_v4 = vadd.f32 1.0, %v3099_v33 }
 0x737   :  { %3104 = vrcp.f32 %v2050_v20 }
 0x738   :  { %3106 = vrcp.f32 %v2057_v4 }
 0x740   :  { %v3103_v13 = vpop.eup %3102 }
 0x741   :  { %v3105_v49 = vpop.eup %3104  ;;  %v2061_v51 = vmul.f32 %v3103_v13, %v3101_v35 }
 0x742   :  { %v2060_v17 = vmul.f32 %v3105_v49, %v4230_v62  ;;  %v3107_v28 = vpop.eup %3106 }
 0x744   :  { %v2062_v9 = vadd.f32 %v2061_v51, %v2060_v17 }
 0x746   :  { %3108 = vtanh.f32 %v2062_v9 }
 0x750   :  { %v3109_v18 = vpop.eup %3108 }
 0x751   :  { %v2064_v22 = vmul.f32 %v3109_v18, %v3107_v28 }
 0x753   :  { %2352 = vst [vmem:[%s4357_s6 + $0x30] sm:$0xff] %v2064_v22  ;;  %2200 = vmatmul.mubr.f32.vlgmr.msra.gmra.mrb[14].mxu0 %v2064_v22  ;;  %2271 = vmatmul.mubr.f32.vlgmr.msra.gmra.mrb[14].mxu1 %v2064_v22 }
 0x826   :  { %v2201_v25 = vpop.f32.mrb[14].mxu0  ;;  %v2272_v8 = vpop.f32.mrb[14].mxu1 }
 0x827   :  { %v2947_v3 = vadd.f32 %v2201_v25, %v3736_v37  ;;  %v2203_v12 = vpop.f32.mrb[15].mxu0  ;;  %v2274_v15 = vpop.f32.mrb[15].mxu1  ;;  %v2963_v60 = vadd.f32 %v2272_v8, %v3745_v61 }
 0x828   :  { %v2948_v62 = vadd.f32 %v2203_v12, %v3738_v39  ;;  %v2964_v24 = vadd.f32 %v2274_v15, %v3742_v55 }
 0x829   :  { %v2353_v1 = vmul.f32 -1.442695, %v2947_v3 }
 0x82a   :  { %v2354_v21 = vmul.f32 -1.442695, %v2948_v62  ;;  %v2355_v47 = vmul.f32 -1.442695, %v2964_v24 }
 0x82b   :  { %3110 = vpow2.f32 %v2353_v1 }
 0x82c   :  { %3112 = vpow2.f32 %v2354_v21 }
 0x82d   :  { %3114 = vpow2.f32 %v2355_v47 }
 0x82e   :  { %3116 = vtanh.f32 %v2963_v60 }
 0x835   :  { %v3111_v43 = vpop.eup %3110 }
 0x836   :  { %v3113_v30 = vpop.eup %3112  ;;  %v2284_v34 = vadd.f32 1.0, %v3111_v43 }
 0x837   :  { %v2290_v53 = vadd.f32 1.0, %v3113_v30  ;;  %v3115_v37 = vpop.eup %3114 }
 0x838   :  { %3118 = vrcp.f32 %v2284_v34  ;;  %v3117_v2 = vpop.eup %3116  ;;  %v2297_v38 = vadd.f32 1.0, %v3115_v37 }
 0x839   :  { %3120 = vrcp.f32 %v2290_v53 }
 0x83a   :  { %3122 = vrcp.f32 %v2297_v38 }
 0x842   :  { %v3119_v39 = vpop.eup %3118 }
 0x843   :  { %v3121_v6 = vpop.eup %3120  ;;  %v2301_v42 = vmul.f32 %v3119_v39, %v3117_v2 }
 0x844   :  { %v2300_v52 = vmul.f32 %v3121_v6, %v2062_v9  ;;  %v3123_v55 = vpop.eup %3122 }
 0x846   :  { %v2302_v57 = vadd.f32 %v2301_v42, %v2300_v52 }
 0x848   :  { %3124 = vtanh.f32 %v2302_v57  ;;  %2313 = vst [vmem:[%s4358_s8] sm:$0xff] %v2302_v57 }
 0x852   :  { %v3125_v61 = vpop.eup %3124 }
 0x853   :  { %v2304_v5 = vmul.f32 %v3125_v61, %v3123_v55 }
 0x855   :  { %2356 = vst [vmem:[%s4357_s6 + $0x38] sm:$0xff] %v2304_v5  ;;  %2312 = vst [vmem:[%s4359_s7] sm:$0xff] %v2304_v5 }

</bundles_post_ra>
